<compile_context>
chip_gen: v6e
topology: v6e:2x2x1
jax: 0.10.0
libtpu: 0.0.40
codegen_flags: <defaults>
</compile_context>

<pallas_src>
import numpy as np
import jax
import jax.numpy as jnp
from jax import lax
from jax.experimental import pallas as pl
from jax.experimental.pallas import tpu as pltpu

# ----------------------- static model configuration -----------------------
NUM_MEC   = 16                  # config.num_mec
NUM       = NUM_MEC * NUM_MEC   # number of MEC grid cells = 256
NUM_HPC   = 128                 # config.num_hpc
DIAMETER  = 2.0                 # config.env.diameter
DT        = 1.0                 # config.dt
RATIO     = 1.0
ANGLE     = 0.3

TAU          = 1.0
TAU_V        = 10.0
TAU_E        = 1000.0
GAUSS_WIDTH  = np.pi / 2
GAUSS_HEIGHT = 10.0
K            = 1.0 / NUM * 20
CONN_MAT_MAX = 1.0 / NUM * 20
M_COEF       = 1.0 * TAU / TAU_V
POS2PHASE    = RATIO * 2.0 * np.pi / DIAMETER
SHARED_T     = (0.0, 1.0)       # odeint time grid; solution read at SHARED_T[1]
TWO_PI       = 2.0 * np.pi
SQRT3        = float(np.sqrt(3.0))
INV_GW_SQ    = float(1.0 / (GAUSS_WIDTH * GAUSS_WIDTH))


# ----------------------------- shared helpers ------------------------------
def _period_bound(x):
    """Wrap phases into [-pi, pi)."""
    return x - TWO_PI * jnp.floor((x + np.pi) / TWO_PI)


def _postophase_batch(pos_seq, rot, coor_transform):
    """GridModel.Postophase vectorised over a (T, 2) position sequence."""
    loc = (pos_seq @ rot.T) * POS2PHASE
    phase = loc @ coor_transform.T + np.pi
    return jnp.fmod(phase, TWO_PI) - np.pi


# ------------------------------ Pallas kernel ------------------------------
def _make_rollout_kernel(use_hpc, hpc2mec_stre, dt_ode, chunk):
    # Exact exponential step of the decoupled linear ODE solved by odeint:
    # du/dt = (c_u - u)/tau with c_u = input_total - v_old (constant during the step),
    # dv/dt = (c_v - v)/tau_v with c_v = m * u_old.
    eu = float(np.exp(-dt_ode / TAU))
    ev = float(np.exp(-dt_ode / TAU_V))

    def kernel(*refs):
        if use_hpc:
            (pp_ref,                               # SMEM (2T,) flattened phase positions
             xg_ref, yg_ref,                       # VMEM (1, NUM) f32, resident
             r0_ref, u0_ref, v0_ref,               # VMEM (1, NUM) f32, resident
             cm_ref,                               # VMEM (NUM, NUM) bf16, resident
             rhpc_ref,                             # VMEM (CHUNK, NUM_HPC) f32, per-chunk
             cin_ref,                              # VMEM (NUM_HPC, NUM) bf16, resident
             rtraj_ref,                            # VMEM (CHUNK, NUM) f32, per-chunk
             u_ref, v_ref, r_ref,                  # VMEM (1, NUM) f32, resident state
             inp_ref, it_ref) = refs               # VMEM (1, NUM) f32, resident
        else:
            (pp_ref,
             xg_ref, yg_ref,
             r0_ref, u0_ref, v0_ref,
             cm_ref,
             rtraj_ref,
             u_ref, v_ref, r_ref,
             inp_ref, it_ref) = refs

        c = pl.program_id(0)

        @pl.when(c == 0)
        def _init():
            r_ref[...] = r0_ref[...]
            u_ref[...] = u0_ref[...]
            v_ref[...] = v0_ref[...]

        xg = xg_ref[...]                           # (1, NUM)
        yg = yg_ref[...]
        r = r_ref[...]
        u = u_ref[...]
        v = v_ref[...]

        inp = jnp.zeros_like(r)
        inp_total = jnp.zeros_like(r)

        # CHUNK update steps, fully unrolled: all VMEM indices are static, only the
        # two SMEM scalar reads per step use a dynamic index.
        for i in range(chunk):
            t = c * chunk + i
            px = pp_ref[2 * t]
            py = pp_ref[2 * t + 1]

            # --- stimulus from the true position (get_stimulus_by_pos) ---
            # squared hex distance used directly (reference sqrt is re-squared anyway)
            dx = _period_bound(px - xg)
            dy = _period_bound(py - yg)
            ex = dx + 0.5 * dy
            ey = dy * (SQRT3 / 2.0)
            d_sq = ex * ex + ey * ey
            inp = GAUSS_HEIGHT * jnp.exp(-0.25 * d_sq * INV_GW_SQ)

            # --- hippocampal feedback (statically pruned when hpc2mec_stre == 0) ---
            if use_hpc:
                rh = rhpc_ref[pl.ds(i, 1), :].astype(jnp.bfloat16)          # (1, NUM_HPC)
                ih = jnp.dot(rh, cin_ref[...],
                             preferred_element_type=jnp.float32) - 0.1
                inp = inp + jnp.maximum(ih, 0.0) * hpc2mec_stre

            # --- recurrent input: conn_mat @ r (bf16 weights, f32 accumulation) ---
            irec = jnp.dot(r.astype(jnp.bfloat16), cm_ref[...],
                           preferred_element_type=jnp.float32)
            inp_total = inp + irec

            # --- exact exponential step of the decoupled adaptation ODE ---
            cu = inp_total - v
            cv = M_COEF * u
            u1 = cu + (u - cu) * eu
            v = cv + (v - cv) * ev
            u = jnp.maximum(u1, 0.0)

            # --- divisive normalisation ---
            r1 = u * u
            denom = 1.0 + K * jnp.sum(r1, axis=-1, keepdims=True)            # (1, 1)
            r = r1 * pl.reciprocal(denom, approx=True)

            rtraj_ref[pl.ds(i, 1), :] = r

        u_ref[...] = u
        v_ref[...] = v
        r_ref[...] = r

        @pl.when(c == pl.num_programs(0) - 1)
        def _finalize():
            inp_ref[...] = inp
            it_ref[...] = inp_total

    return kernel


def grid_rollout_pallas(phase_pos_seq, xg, yg, r0, u0, v0,
                        r_hpc_seq, conn_mat_t, conn_in_t,
                        *, hpc2mec_stre, dt_ode):
    """T fused GridModel.update hot-path steps in one pallas_call (grid=(T/CHUNK,))."""
    T = int(phase_pos_seq.shape[0])
    chunk = max(cc for cc in (8, 4, 2, 1) if T % cc == 0)
    n_chunks = T // chunk
    use_hpc = (float(hpc2mec_stre) != 0.0) and (conn_in_t is not None)
    kernel = _make_rollout_kernel(use_hpc, float(hpc2mec_stre), float(dt_ode), chunk)

    vec_shape = jax.ShapeDtypeStruct((1, NUM), jnp.float32)

    def resident_vec():
        return pl.BlockSpec((1, NUM), lambda c: (0, 0))

    in_specs = [pl.BlockSpec(memory_space=pltpu.MemorySpace.SMEM),   # phase positions (2T,)
                resident_vec(), resident_vec(),                      # x_grid, y_grid
                resident_vec(), resident_vec(), resident_vec(),      # r0, u0, v0
                pl.BlockSpec((NUM, NUM), lambda c: (0, 0))]          # conn_mat^T, resident
    args = [phase_pos_seq.astype(jnp.float32).reshape(-1),
            xg, yg, r0, u0, v0, conn_mat_t]

    if use_hpc:
        in_specs.append(pl.BlockSpec((chunk, NUM_HPC), lambda c: (c, 0)))
        args.append(r_hpc_seq.astype(jnp.float32))
        in_specs.append(pl.BlockSpec((NUM_HPC, NUM), lambda c: (0, 0)))
        args.append(conn_in_t)

    out_shape = (jax.ShapeDtypeStruct((T, NUM), jnp.float32),        # r trajectory
                 vec_shape, vec_shape, vec_shape,                    # u, v, r (final)
                 vec_shape, vec_shape)                               # input, input_total
    out_specs = (pl.BlockSpec((chunk, NUM), lambda c: (c, 0)),
                 resident_vec(), resident_vec(), resident_vec(),
                 resident_vec(), resident_vec())

    return pl.pallas_call(
        kernel,
        grid=(n_chunks,),
        out_shape=out_shape,
        in_specs=in_specs,
        out_specs=out_specs,
        compiler_params=pltpu.CompilerParams(
            dimension_semantics=("arbitrary",)),      # serial recurrence over time
    )(*args)


# ------------------------------- JAX glue ----------------------------------
def build_params(conn_in_scale=0.0, key=None):
    x = np.linspace(-np.pi, np.pi, NUM_MEC, endpoint=False)
    y = np.linspace(-np.pi, np.pi, NUM_MEC, endpoint=False)
    x_g, y_g = np.meshgrid(x, y)
    x_grid = x_g.flatten().astype(np.float32)
    y_grid = y_g.flatten().astype(np.float32)
    value_grid = np.stack([x_grid, y_grid], axis=1)                     # (NUM, 2)
    d = np.sum((value_grid[:, None, :] - value_grid[None, :, :]) ** 2, axis=-1)
    conn_mat = (CONN_MAT_MAX * np.exp(-0.5 * d / GAUSS_WIDTH ** 2)
                / (np.sqrt(2 * np.pi) * GAUSS_WIDTH)).astype(np.float32)
    rot = np.array([[np.cos(ANGLE), -np.sin(ANGLE)],
                    [np.sin(ANGLE),  np.cos(ANGLE)]], np.float32)
    ct = np.array([[1.0, -1.0 / SQRT3],
                   [0.0,  2.0 / SQRT3]], np.float32)
    # GridModel.__init__ sets conn_in to zeros; conn_in_scale>0 only to exercise the
    # hippocampal matvec with non-trivial synthetic weights.
    if conn_in_scale > 0.0 and key is not None:
        conn_in = jax.random.uniform(key, (NUM, NUM_HPC), jnp.float32,
                                     0.0, conn_in_scale)
    else:
        conn_in = jnp.zeros((NUM, NUM_HPC), jnp.float32)
    return dict(
        x_grid=jnp.asarray(x_grid).reshape(1, NUM),
        y_grid=jnp.asarray(y_grid).reshape(1, NUM),
        conn_mat_t=jnp.asarray(conn_mat.T).astype(jnp.bfloat16),   # r @ W^T, bf16 weights
        conn_in_t=jnp.transpose(conn_in).astype(jnp.bfloat16),     # (NUM_HPC, NUM)
        rot=jnp.asarray(rot),
        coor_transform=jnp.asarray(ct),
    )


def init_state(loc, params):
    """GridModel.reset_state(loc)."""
    phase = _postophase_batch(loc[None, :], params['rot'],
                              params['coor_transform'])[0]
    zeros_vec = jnp.zeros((1, NUM), jnp.float32)
    return dict(r=zeros_vec, u=zeros_vec, v=zeros_vec,
                input=zeros_vec, input_total=zeros_vec,
                center=phase, centerI=jnp.zeros(2, jnp.float32),
                center_ideal=phase, phase_estimate=phase)


def grid_model_rollout(state, params, pos_seq, velocity_seq, r_hpc_seq,
                       get_loc=1, hpc2mec_stre=0.0):
    """Functional GridModel.update (train=0) applied T times with one fused kernel."""
    if get_loc != 1:
        # TODO(synk): get_loc != 1 (motion-driven stimulus) needs the atan2 centre read-out
        # feeding phase_estimate inside the step recurrence; only get_loc==1 is fused here.
        raise NotImplementedError("only get_loc=1 (position-driven stimulus) is fused")

    rot = params['rot']
    ct = params['coor_transform']
    xg = params['x_grid']
    yg = params['y_grid']

    # ---- per-step 2-vector geometry, vectorised over the whole rollout ----
    phase_pos_seq = _postophase_batch(pos_seq, rot, ct)                  # (T, 2)
    v_phase_seq = ((velocity_seq @ rot.T) * POS2PHASE) @ ct.T            # (T, 2)

    # ---- fused Pallas hot path: T steps of stimulus / matvecs / ODE / norm ----
    r_traj, u_fin, v_fin, r_fin, inp_fin, inp_tot_fin = grid_rollout_pallas(
        phase_pos_seq, xg, yg, state['r'], state['u'], state['v'],
        r_hpc_seq, params['conn_mat_t'], params['conn_in_t'],
        hpc2mec_stre=hpc2mec_stre, dt_ode=SHARED_T[1] - SHARED_T[0])

    # ---- get_center() read-out for every step (uses r *before* that step) ----
    # TODO(synk): the atan2 read-out stays as one vectorised JAX pass over (T, NUM).
    r_hist = jnp.concatenate([state['r'], r_traj[:-1, :]], axis=0)       # (T, NUM)
    rmax = jnp.max(r_hist, axis=-1, keepdims=True)
    r_thr = jnp.where(r_hist > rmax * 0.1, r_hist, 0.0)
    centers = jnp.stack(
        [jnp.arctan2(jnp.sum(jnp.sin(xg) * r_thr, axis=-1),
                     jnp.sum(jnp.cos(xg) * r_thr, axis=-1)),
         jnp.arctan2(jnp.sum(jnp.sin(yg) * r_thr, axis=-1),
                     jnp.sum(jnp.cos(yg) * r_thr, axis=-1))],
        axis=-1)                                                         # (T, 2)

    # ---- tiny 2-vector recurrences (center_ideal / phase_estimate): one scan ----
    def _step(carry, xs):
        phase_est, center_ideal = carry
        center_t, v_phase_t = xs
        center_ideal = _period_bound(center_ideal + v_phase_t * DT)
        dis_phase = _period_bound(center_t - phase_est)
        phase_est = _period_bound(phase_est + (dis_phase / TAU_E + v_phase_t) * DT)
        return (phase_est, center_ideal), None

    (phase_est_fin, center_ideal_fin), _ = lax.scan(
        _step, (state['phase_estimate'], state['center_ideal']),
        (centers, v_phase_seq))

    # TODO(synk): train>0 branch (conn_out_update / conn_in_update / keep_top_n) is not
    # implemented; forward() defaults to train=0 so it is never reached.
    return dict(r=r_fin, u=u_fin, v=v_fin, input=inp_fin, input_total=inp_tot_fin,
                center=centers[-1], centerI=phase_pos_seq[-1],
                center_ideal=center_ideal_fin, phase_estimate=phase_est_fin,
                r_traj=r_traj)


# --------------------------- pure-JAX reference -----------------------------
def grid_rollout_reference(phase_pos_seq, xg, yg, r0, u0, v0,
                           r_hpc_seq, conn_mat_t, conn_in_t,
                           *, hpc2mec_stre, dt_ode):
    """Reference for the fused hot path (same closed-form ODE, same bf16 weights)."""
    eu = float(np.exp(-dt_ode / TAU))
    ev = float(np.exp(-dt_ode / TAU_V))
    W = conn_mat_t.astype(jnp.float32)
    Win = conn_in_t.astype(jnp.float32)
    use_hpc = float(hpc2mec_stre) != 0.0

    def step(carry, xs):
        r, u, v = carry
        pp, rh = xs
        dx = _period_bound(pp[0] - xg)
        dy = _period_bound(pp[1] - yg)
        ex = dx + 0.5 * dy
        ey = dy * (SQRT3 / 2.0)
        inp = GAUSS_HEIGHT * jnp.exp(-0.25 * (ex * ex + ey * ey) * INV_GW_SQ)
        if use_hpc:
            rhb = rh.reshape(1, -1).astype(jnp.bfloat16).astype(jnp.float32)
            inp = inp + jnp.maximum(rhb @ Win - 0.1, 0.0) * hpc2mec_stre
        irec = r.astype(jnp.bfloat16).astype(jnp.float32) @ W
        it = inp + irec
        cu = it - v
        cv = M_COEF * u
        u1 = cu + (u - cu) * eu
        v1 = cv + (v - cv) * ev
        un = jnp.maximum(u1, 0.0)
        r1 = un * un
        rn = r1 / (1.0 + K * jnp.sum(r1, axis=-1, keepdims=True))
        return (rn, un, v1), rn

    (r_f, u_f, v_f), r_traj = lax.scan(step, (r0, u0, v0), (phase_pos_seq, r_hpc_seq))
    return r_traj[:, 0, :], u_f, v_f, r_f


# --------------------------------- driver ----------------------------------
if __name__ == "__main__":
    key = jax.random.PRNGKey(0)
    k_hpc, _ = jax.random.split(key)

    params = build_params()                 # conn_in = zeros, as in GridModel.__init__
    loc0 = jnp.array([0.0, 0.0], jnp.float32)
    state = init_state(loc0, params)

    # small deterministic trajectory: T update steps fused into one pallas_call
    T = 8
    ts = jnp.arange(T, dtype=jnp.float32)
    pos_seq = jnp.stack([0.3 + 0.05 * ts, -0.2 + 0.02 * ts], axis=-1)        # (T, 2)
    velocity_seq = jnp.tile(jnp.array([[0.05, 0.02]], jnp.float32), (T, 1))  # (T, 2)
    r_hpc_seq = jax.random.uniform(k_hpc, (T, NUM_HPC), jnp.float32, 0.0, 1.0)

    rollout = jax.jit(grid_model_rollout, static_argnames=("get_loc", "hpc2mec_stre"))

    # rollout 1: hippocampal feedback path active (conn_in matvec on the MXU)
    # rollout 2: hpc2mec_stre == 0.0 -> HPC path statically pruned from the kernel
    for stre in (0.5, 0.0):
        prev_rv = (state['r'], state['u'], state['v'])
        state = rollout(state, params, pos_seq, velocity_seq, r_hpc_seq,
                        get_loc=1, hpc2mec_stre=stre)
        jax.block_until_ready(state['r'])

        # pure-JAX reference check of the fused hot path
        pp_seq = _postophase_batch(pos_seq, params['rot'], params['coor_transform'])
        r_traj_ref, u_ref_, v_ref_, r_ref_ = grid_rollout_reference(
            pp_seq, params['x_grid'], params['y_grid'],
            prev_rv[0], prev_rv[1], prev_rv[2], r_hpc_seq,
            params['conn_mat_t'], params['conn_in_t'],
            hpc2mec_stre=stre, dt_ode=SHARED_T[1] - SHARED_T[0])
        assert bool(jnp.allclose(state['r_traj'], r_traj_ref, rtol=5e-2, atol=5e-2))
        assert bool(jnp.allclose(state['r'], r_ref_, rtol=5e-2, atol=5e-2))
        assert bool(jnp.allclose(state['u'], u_ref_, rtol=5e-2, atol=5e-2))

    assert state['r'].shape == (1, NUM)
    assert state['u'].shape == (1, NUM) and state['v'].shape == (1, NUM)
    assert state['r_traj'].shape == (T, NUM)
    assert bool(jnp.all(jnp.isfinite(state['r'])))
    assert bool(jnp.all(jnp.isfinite(state['input_total'])))
    assert bool(jnp.all(jnp.isfinite(state['phase_estimate'])))
    print("KERNEL_OK")
</pallas_src>

<mosaic_0001>
module attributes {stable_mosaic.version = 11 : i64} {
  func.func @kernel(%arg0: i32, %arg1: memref<16xf32, #tpu.memory_space<smem>>, %arg2: memref<1x256xf32, #tpu.memory_space<vmem>>, %arg3: memref<1x256xf32, #tpu.memory_space<vmem>>, %arg4: memref<1x256xf32, #tpu.memory_space<vmem>>, %arg5: memref<1x256xf32, #tpu.memory_space<vmem>>, %arg6: memref<1x256xf32, #tpu.memory_space<vmem>>, %arg7: memref<256x256xbf16, #tpu.memory_space<vmem>>, %arg8: memref<8x128xf32, #tpu.memory_space<vmem>>, %arg9: memref<128x256xbf16, #tpu.memory_space<vmem>>, %arg10: memref<8x256xf32, #tpu.memory_space<vmem>>, %arg11: memref<1x256xf32, #tpu.memory_space<vmem>>, %arg12: memref<1x256xf32, #tpu.memory_space<vmem>>, %arg13: memref<1x256xf32, #tpu.memory_space<vmem>>, %arg14: memref<1x256xf32, #tpu.memory_space<vmem>>, %arg15: memref<1x256xf32, #tpu.memory_space<vmem>>) attributes {dimension_semantics = [#tpu.dimension_semantics<arbitrary>], iteration_bounds = array<i64: 1>, scalar_prefetch = 0 : i64, scratch_operands = 0 : i64, tpu.core_type = #tpu.core_type<tc>, window_params = [{transform_indices = @transform_0, window_bounds = array<i64: 16>}, {pipeline_mode = #tpu.pipeline_mode<synchronous>, transform_indices = @transform_1, window_bounds = array<i64: 1, 256>}, {pipeline_mode = #tpu.pipeline_mode<synchronous>, transform_indices = @transform_2, window_bounds = array<i64: 1, 256>}, {pipeline_mode = #tpu.pipeline_mode<synchronous>, transform_indices = @transform_3, window_bounds = array<i64: 1, 256>}, {pipeline_mode = #tpu.pipeline_mode<synchronous>, transform_indices = @transform_4, window_bounds = array<i64: 1, 256>}, {pipeline_mode = #tpu.pipeline_mode<synchronous>, transform_indices = @transform_5, window_bounds = array<i64: 1, 256>}, {pipeline_mode = #tpu.pipeline_mode<synchronous>, transform_indices = @transform_6, window_bounds = array<i64: 256, 256>}, {transform_indices = @transform_7, window_bounds = array<i64: 8, 128>}, {pipeline_mode = #tpu.pipeline_mode<synchronous>, transform_indices = @transform_8, window_bounds = array<i64: 128, 256>}, {transform_indices = @transform_9, window_bounds = array<i64: 8, 256>}, {pipeline_mode = #tpu.pipeline_mode<synchronous>, transform_indices = @transform_10, window_bounds = array<i64: 1, 256>}, {pipeline_mode = #tpu.pipeline_mode<synchronous>, transform_indices = @transform_11, window_bounds = array<i64: 1, 256>}, {pipeline_mode = #tpu.pipeline_mode<synchronous>, transform_indices = @transform_12, window_bounds = array<i64: 1, 256>}, {pipeline_mode = #tpu.pipeline_mode<synchronous>, transform_indices = @transform_13, window_bounds = array<i64: 1, 256>}, {pipeline_mode = #tpu.pipeline_mode<synchronous>, transform_indices = @transform_14, window_bounds = array<i64: 1, 256>}]} {
    %c0_i32 = arith.constant 0 : i32
    %0 = arith.cmpi eq, %arg0, %c0_i32 : i32
    %1 = arith.extui %0 : i1 to i32
    %c0_i32_0 = arith.constant 0 : i32
    %2 = arith.cmpi ne, %1, %c0_i32_0 : i32
    scf.if %2 {
      %c0_290 = arith.constant 0 : index
      %c0_291 = arith.constant 0 : index
      %678 = vector.load %arg4[%c0_290, %c0_291] : memref<1x256xf32, #tpu.memory_space<vmem>>, vector<1x256xf32>
      %c0_292 = arith.constant 0 : index
      %c0_293 = arith.constant 0 : index
      %679 = vector.load %arg13[%c0_292, %c0_293] : memref<1x256xf32, #tpu.memory_space<vmem>>, vector<1x256xf32>
      tpu.vector_store %arg13[%c0_292, %c0_293], %678 {strides = array<i32>} : memref<1x256xf32, #tpu.memory_space<vmem>>, vector<1x256xf32>,
      %c0_294 = arith.constant 0 : index
      %c0_295 = arith.constant 0 : index
      %680 = vector.load %arg5[%c0_294, %c0_295] : memref<1x256xf32, #tpu.memory_space<vmem>>, vector<1x256xf32>
      %c0_296 = arith.constant 0 : index
      %c0_297 = arith.constant 0 : index
      %681 = vector.load %arg11[%c0_296, %c0_297] : memref<1x256xf32, #tpu.memory_space<vmem>>, vector<1x256xf32>
      tpu.vector_store %arg11[%c0_296, %c0_297], %680 {strides = array<i32>} : memref<1x256xf32, #tpu.memory_space<vmem>>, vector<1x256xf32>,
      %c0_298 = arith.constant 0 : index
      %c0_299 = arith.constant 0 : index
      %682 = vector.load %arg6[%c0_298, %c0_299] : memref<1x256xf32, #tpu.memory_space<vmem>>, vector<1x256xf32>
      %c0_300 = arith.constant 0 : index
      %c0_301 = arith.constant 0 : index
      %683 = vector.load %arg12[%c0_300, %c0_301] : memref<1x256xf32, #tpu.memory_space<vmem>>, vector<1x256xf32>
      tpu.vector_store %arg12[%c0_300, %c0_301], %682 {strides = array<i32>} : memref<1x256xf32, #tpu.memory_space<vmem>>, vector<1x256xf32>,
    } else {
    }
    %c0 = arith.constant 0 : index
    %c0_1 = arith.constant 0 : index
    %3 = vector.load %arg2[%c0, %c0_1] : memref<1x256xf32, #tpu.memory_space<vmem>>, vector<1x256xf32>
    %c0_2 = arith.constant 0 : index
    %c0_3 = arith.constant 0 : index
    %4 = vector.load %arg3[%c0_2, %c0_3] : memref<1x256xf32, #tpu.memory_space<vmem>>, vector<1x256xf32>
    %c0_4 = arith.constant 0 : index
    %c0_5 = arith.constant 0 : index
    %5 = vector.load %arg13[%c0_4, %c0_5] : memref<1x256xf32, #tpu.memory_space<vmem>>, vector<1x256xf32>
    %c0_6 = arith.constant 0 : index
    %c0_7 = arith.constant 0 : index
    %6 = vector.load %arg11[%c0_6, %c0_7] : memref<1x256xf32, #tpu.memory_space<vmem>>, vector<1x256xf32>
    %c0_8 = arith.constant 0 : index
    %c0_9 = arith.constant 0 : index
    %7 = vector.load %arg12[%c0_8, %c0_9] : memref<1x256xf32, #tpu.memory_space<vmem>>, vector<1x256xf32>
    %c8_i32 = arith.constant 8 : i32
    %8 = arith.muli %arg0, %c8_i32 : i32
    %c0_i32_10 = arith.constant 0 : i32
    %9 = arith.addi %8, %c0_i32_10 : i32
    %c2_i32 = arith.constant 2 : i32
    %10 = arith.muli %c2_i32, %9 : i32
    %11 = arith.index_cast %10 : i32 to index
    %12 = memref.load %arg1[%11] : memref<16xf32, #tpu.memory_space<smem>>
    %c2_i32_11 = arith.constant 2 : i32
    %13 = arith.muli %c2_i32_11, %9 : i32
    %c1_i32 = arith.constant 1 : i32
    %14 = arith.addi %13, %c1_i32 : i32
    %15 = arith.index_cast %14 : i32 to index
    %16 = memref.load %arg1[%15] : memref<16xf32, #tpu.memory_space<smem>>
    %17 = vector.broadcast %12 : f32 to vector<1x256xf32>
    %18 = arith.subf %17, %3 : vector<1x256xf32>
    %cst = arith.constant 3.14159274 : f32
    %19 = vector.broadcast %cst : f32 to vector<1x256xf32>
    %20 = arith.addf %18, %19 : vector<1x256xf32>
    %cst_12 = arith.constant 6.28318548 : f32
    %21 = vector.broadcast %cst_12 : f32 to vector<1x256xf32>
    %22 = arith.divf %20, %21 : vector<1x256xf32>
    %23 = math.floor %22 : vector<1x256xf32>
    %cst_13 = arith.constant 6.28318548 : f32
    %24 = vector.broadcast %cst_13 : f32 to vector<1x256xf32>
    %25 = arith.mulf %24, %23 : vector<1x256xf32>
    %26 = arith.subf %18, %25 : vector<1x256xf32>
    %27 = vector.broadcast %16 : f32 to vector<1x256xf32>
    %28 = arith.subf %27, %4 : vector<1x256xf32>
    %cst_14 = arith.constant 3.14159274 : f32
    %29 = vector.broadcast %cst_14 : f32 to vector<1x256xf32>
    %30 = arith.addf %28, %29 : vector<1x256xf32>
    %cst_15 = arith.constant 6.28318548 : f32
    %31 = vector.broadcast %cst_15 : f32 to vector<1x256xf32>
    %32 = arith.divf %30, %31 : vector<1x256xf32>
    %33 = math.floor %32 : vector<1x256xf32>
    %cst_16 = arith.constant 6.28318548 : f32
    %34 = vector.broadcast %cst_16 : f32 to vector<1x256xf32>
    %35 = arith.mulf %34, %33 : vector<1x256xf32>
    %36 = arith.subf %28, %35 : vector<1x256xf32>
    %cst_17 = arith.constant 5.000000e-01 : f32
    %37 = vector.broadcast %cst_17 : f32 to vector<1x256xf32>
    %38 = arith.mulf %37, %36 : vector<1x256xf32>
    %39 = arith.addf %26, %38 : vector<1x256xf32>
    %cst_18 = arith.constant 0.866025388 : f32
    %40 = vector.broadcast %cst_18 : f32 to vector<1x256xf32>
    %41 = arith.mulf %36, %40 : vector<1x256xf32>
    %42 = arith.mulf %39, %39 : vector<1x256xf32>
    %43 = arith.mulf %41, %41 : vector<1x256xf32>
    %44 = arith.addf %42, %43 : vector<1x256xf32>
    %cst_19 = arith.constant -2.500000e-01 : f32
    %45 = vector.broadcast %cst_19 : f32 to vector<1x256xf32>
    %46 = arith.mulf %45, %44 : vector<1x256xf32>
    %cst_20 = arith.constant 0.405284733 : f32
    %47 = vector.broadcast %cst_20 : f32 to vector<1x256xf32>
    %48 = arith.mulf %46, %47 : vector<1x256xf32>
    %49 = math.exp %48 : vector<1x256xf32>
    %cst_21 = arith.constant 1.000000e+01 : f32
    %50 = vector.broadcast %cst_21 : f32 to vector<1x256xf32>
    %51 = arith.mulf %50, %49 : vector<1x256xf32>
    %c0_22 = arith.constant 0 : index
    %c0_23 = arith.constant 0 : index
    %52 = vector.load %arg8[%c0_22, %c0_23] : memref<8x128xf32, #tpu.memory_space<vmem>>, vector<1x128xf32>
    %53 = arith.truncf %52 : vector<1x128xf32> to vector<1x128xbf16>
    %c0_24 = arith.constant 0 : index
    %c0_25 = arith.constant 0 : index
    %54 = vector.load %arg9[%c0_24, %c0_25] : memref<128x256xbf16, #tpu.memory_space<vmem>>, vector<128x256xbf16>
    %cst_26 = arith.constant dense<0.000000e+00> : vector<1x256xf32>
    %55 = tpu.matmul %53, %54, %cst_26 {dimension_numbers = #tpu.dot_dimension_numbers<[1], [0], [0], [1], [0, 0, 1, 1], [], []>} : vector<1x128xbf16>, vector<128x256xbf16>, vector<1x256xf32> -> vector<1x256xf32>
    %cst_27 = arith.constant 1.000000e-01 : f32
    %56 = vector.broadcast %cst_27 : f32 to vector<1x256xf32>
    %57 = arith.subf %55, %56 : vector<1x256xf32>
    %cst_28 = arith.constant 0.000000e+00 : f32
    %58 = vector.broadcast %cst_28 : f32 to vector<1x256xf32>
    %59 = arith.maximumf %57, %58 : vector<1x256xf32>
    %cst_29 = arith.constant 5.000000e-01 : f32
    %60 = vector.broadcast %cst_29 : f32 to vector<1x256xf32>
    %61 = arith.mulf %59, %60 : vector<1x256xf32>
    %62 = arith.addf %51, %61 : vector<1x256xf32>
    %63 = arith.truncf %5 : vector<1x256xf32> to vector<1x256xbf16>
    %c0_30 = arith.constant 0 : index
    %c0_31 = arith.constant 0 : index
    %64 = vector.load %arg7[%c0_30, %c0_31] : memref<256x256xbf16, #tpu.memory_space<vmem>>, vector<256x256xbf16>
    %cst_32 = arith.constant dense<0.000000e+00> : vector<1x256xf32>
    %65 = tpu.matmul %63, %64, %cst_32 {dimension_numbers = #tpu.dot_dimension_numbers<[1], [0], [0], [1], [0, 0, 1, 1], [], []>} : vector<1x256xbf16>, vector<256x256xbf16>, vector<1x256xf32> -> vector<1x256xf32>
    %66 = arith.addf %62, %65 : vector<1x256xf32>
    %67 = arith.subf %66, %7 : vector<1x256xf32>
    %cst_33 = arith.constant 1.000000e-01 : f32
    %68 = vector.broadcast %cst_33 : f32 to vector<1x256xf32>
    %69 = arith.mulf %68, %6 : vector<1x256xf32>
    %70 = arith.subf %6, %67 : vector<1x256xf32>
    %cst_34 = arith.constant 0.36787945 : f32
    %71 = vector.broadcast %cst_34 : f32 to vector<1x256xf32>
    %72 = arith.mulf %70, %71 : vector<1x256xf32>
    %73 = arith.addf %67, %72 : vector<1x256xf32>
    %74 = arith.subf %7, %69 : vector<1x256xf32>
    %cst_35 = arith.constant 0.904837429 : f32
    %75 = vector.broadcast %cst_35 : f32 to vector<1x256xf32>
    %76 = arith.mulf %74, %75 : vector<1x256xf32>
    %77 = arith.addf %69, %76 : vector<1x256xf32>
    %cst_36 = arith.constant 0.000000e+00 : f32
    %78 = vector.broadcast %cst_36 : f32 to vector<1x256xf32>
    %79 = arith.maximumf %73, %78 : vector<1x256xf32>
    %80 = arith.mulf %79, %79 : vector<1x256xf32>
    %cst_37 = arith.constant dense<0.000000e+00> : vector<1xf32>
    %81 = vector.multi_reduction <add>, %80, %cst_37 [1] : vector<1x256xf32> to vector<1xf32>
    %82 = vector.shape_cast %81 : vector<1xf32> to vector<1x1xf32>
    %cst_38 = arith.constant 7.812500e-02 : f32
    %83 = vector.broadcast %cst_38 : f32 to vector<1x1xf32>
    %84 = arith.mulf %83, %82 : vector<1x1xf32>
    %cst_39 = arith.constant 1.000000e+00 : f32
    %85 = vector.broadcast %cst_39 : f32 to vector<1x1xf32>
    %86 = arith.addf %85, %84 : vector<1x1xf32>
    %87 = tpu.reciprocal %86 {approx = true} : vector<1x1xf32> -> vector<1x1xf32>
    %88 = vector.broadcast %87 : vector<1x1xf32> to vector<1x256xf32>
    %89 = arith.mulf %80, %88 : vector<1x256xf32>
    %c0_40 = arith.constant 0 : index
    %c0_41 = arith.constant 0 : index
    %90 = vector.load %arg10[%c0_40, %c0_41] : memref<8x256xf32, #tpu.memory_space<vmem>>, vector<1x256xf32>
    tpu.vector_store %arg10[%c0_40, %c0_41], %89 {strides = array<i32>} : memref<8x256xf32, #tpu.memory_space<vmem>>, vector<1x256xf32>,
    %c8_i32_42 = arith.constant 8 : i32
    %91 = arith.muli %arg0, %c8_i32_42 : i32
    %c1_i32_43 = arith.constant 1 : i32
    %92 = arith.addi %91, %c1_i32_43 : i32
    %c2_i32_44 = arith.constant 2 : i32
    %93 = arith.muli %c2_i32_44, %92 : i32
    %94 = arith.index_cast %93 : i32 to index
    %95 = memref.load %arg1[%94] : memref<16xf32, #tpu.memory_space<smem>>
    %c2_i32_45 = arith.constant 2 : i32
    %96 = arith.muli %c2_i32_45, %92 : i32
    %c1_i32_46 = arith.constant 1 : i32
    %97 = arith.addi %96, %c1_i32_46 : i32
    %98 = arith.index_cast %97 : i32 to index
    %99 = memref.load %arg1[%98] : memref<16xf32, #tpu.memory_space<smem>>
    %100 = vector.broadcast %95 : f32 to vector<1x256xf32>
    %101 = arith.subf %100, %3 : vector<1x256xf32>
    %cst_47 = arith.constant 3.14159274 : f32
    %102 = vector.broadcast %cst_47 : f32 to vector<1x256xf32>
    %103 = arith.addf %101, %102 : vector<1x256xf32>
    %cst_48 = arith.constant 6.28318548 : f32
    %104 = vector.broadcast %cst_48 : f32 to vector<1x256xf32>
    %105 = arith.divf %103, %104 : vector<1x256xf32>
    %106 = math.floor %105 : vector<1x256xf32>
    %cst_49 = arith.constant 6.28318548 : f32
    %107 = vector.broadcast %cst_49 : f32 to vector<1x256xf32>
    %108 = arith.mulf %107, %106 : vector<1x256xf32>
    %109 = arith.subf %101, %108 : vector<1x256xf32>
    %110 = vector.broadcast %99 : f32 to vector<1x256xf32>
    %111 = arith.subf %110, %4 : vector<1x256xf32>
    %cst_50 = arith.constant 3.14159274 : f32
    %112 = vector.broadcast %cst_50 : f32 to vector<1x256xf32>
    %113 = arith.addf %111, %112 : vector<1x256xf32>
    %cst_51 = arith.constant 6.28318548 : f32
    %114 = vector.broadcast %cst_51 : f32 to vector<1x256xf32>
    %115 = arith.divf %113, %114 : vector<1x256xf32>
    %116 = math.floor %115 : vector<1x256xf32>
    %cst_52 = arith.constant 6.28318548 : f32
    %117 = vector.broadcast %cst_52 : f32 to vector<1x256xf32>
    %118 = arith.mulf %117, %116 : vector<1x256xf32>
    %119 = arith.subf %111, %118 : vector<1x256xf32>
    %cst_53 = arith.constant 5.000000e-01 : f32
    %120 = vector.broadcast %cst_53 : f32 to vector<1x256xf32>
    %121 = arith.mulf %120, %119 : vector<1x256xf32>
    %122 = arith.addf %109, %121 : vector<1x256xf32>
    %cst_54 = arith.constant 0.866025388 : f32
    %123 = vector.broadcast %cst_54 : f32 to vector<1x256xf32>
    %124 = arith.mulf %119, %123 : vector<1x256xf32>
    %125 = arith.mulf %122, %122 : vector<1x256xf32>
    %126 = arith.mulf %124, %124 : vector<1x256xf32>
    %127 = arith.addf %125, %126 : vector<1x256xf32>
    %cst_55 = arith.constant -2.500000e-01 : f32
    %128 = vector.broadcast %cst_55 : f32 to vector<1x256xf32>
    %129 = arith.mulf %128, %127 : vector<1x256xf32>
    %cst_56 = arith.constant 0.405284733 : f32
    %130 = vector.broadcast %cst_56 : f32 to vector<1x256xf32>
    %131 = arith.mulf %129, %130 : vector<1x256xf32>
    %132 = math.exp %131 : vector<1x256xf32>
    %cst_57 = arith.constant 1.000000e+01 : f32
    %133 = vector.broadcast %cst_57 : f32 to vector<1x256xf32>
    %134 = arith.mulf %133, %132 : vector<1x256xf32>
    %c1 = arith.constant 1 : index
    %c0_58 = arith.constant 0 : index
    %135 = vector.load %arg8[%c1, %c0_58] : memref<8x128xf32, #tpu.memory_space<vmem>>, vector<1x128xf32>
    %136 = arith.truncf %135 : vector<1x128xf32> to vector<1x128xbf16>
    %c0_59 = arith.constant 0 : index
    %c0_60 = arith.constant 0 : index
    %137 = vector.load %arg9[%c0_59, %c0_60] : memref<128x256xbf16, #tpu.memory_space<vmem>>, vector<128x256xbf16>
    %cst_61 = arith.constant dense<0.000000e+00> : vector<1x256xf32>
    %138 = tpu.matmul %136, %137, %cst_61 {dimension_numbers = #tpu.dot_dimension_numbers<[1], [0], [0], [1], [0, 0, 1, 1], [], []>} : vector<1x128xbf16>, vector<128x256xbf16>, vector<1x256xf32> -> vector<1x256xf32>
    %cst_62 = arith.constant 1.000000e-01 : f32
    %139 = vector.broadcast %cst_62 : f32 to vector<1x256xf32>
    %140 = arith.subf %138, %139 : vector<1x256xf32>
    %cst_63 = arith.constant 0.000000e+00 : f32
    %141 = vector.broadcast %cst_63 : f32 to vector<1x256xf32>
    %142 = arith.maximumf %140, %141 : vector<1x256xf32>
    %cst_64 = arith.constant 5.000000e-01 : f32
    %143 = vector.broadcast %cst_64 : f32 to vector<1x256xf32>
    %144 = arith.mulf %142, %143 : vector<1x256xf32>
    %145 = arith.addf %134, %144 : vector<1x256xf32>
    %146 = arith.truncf %89 : vector<1x256xf32> to vector<1x256xbf16>
    %c0_65 = arith.constant 0 : index
    %c0_66 = arith.constant 0 : index
    %147 = vector.load %arg7[%c0_65, %c0_66] : memref<256x256xbf16, #tpu.memory_space<vmem>>, vector<256x256xbf16>
    %cst_67 = arith.constant dense<0.000000e+00> : vector<1x256xf32>
    %148 = tpu.matmul %146, %147, %cst_67 {dimension_numbers = #tpu.dot_dimension_numbers<[1], [0], [0], [1], [0, 0, 1, 1], [], []>} : vector<1x256xbf16>, vector<256x256xbf16>, vector<1x256xf32> -> vector<1x256xf32>
    %149 = arith.addf %145, %148 : vector<1x256xf32>
    %150 = arith.subf %149, %77 : vector<1x256xf32>
    %cst_68 = arith.constant 1.000000e-01 : f32
    %151 = vector.broadcast %cst_68 : f32 to vector<1x256xf32>
    %152 = arith.mulf %151, %79 : vector<1x256xf32>
    %153 = arith.subf %79, %150 : vector<1x256xf32>
    %cst_69 = arith.constant 0.36787945 : f32
    %154 = vector.broadcast %cst_69 : f32 to vector<1x256xf32>
    %155 = arith.mulf %153, %154 : vector<1x256xf32>
    %156 = arith.addf %150, %155 : vector<1x256xf32>
    %157 = arith.subf %77, %152 : vector<1x256xf32>
    %cst_70 = arith.constant 0.904837429 : f32
    %158 = vector.broadcast %cst_70 : f32 to vector<1x256xf32>
    %159 = arith.mulf %157, %158 : vector<1x256xf32>
    %160 = arith.addf %152, %159 : vector<1x256xf32>
    %cst_71 = arith.constant 0.000000e+00 : f32
    %161 = vector.broadcast %cst_71 : f32 to vector<1x256xf32>
    %162 = arith.maximumf %156, %161 : vector<1x256xf32>
    %163 = arith.mulf %162, %162 : vector<1x256xf32>
    %cst_72 = arith.constant dense<0.000000e+00> : vector<1xf32>
    %164 = vector.multi_reduction <add>, %163, %cst_72 [1] : vector<1x256xf32> to vector<1xf32>
    %165 = vector.shape_cast %164 : vector<1xf32> to vector<1x1xf32>
    %cst_73 = arith.constant 7.812500e-02 : f32
    %166 = vector.broadcast %cst_73 : f32 to vector<1x1xf32>
    %167 = arith.mulf %166, %165 : vector<1x1xf32>
    %cst_74 = arith.constant 1.000000e+00 : f32
    %168 = vector.broadcast %cst_74 : f32 to vector<1x1xf32>
    %169 = arith.addf %168, %167 : vector<1x1xf32>
    %170 = tpu.reciprocal %169 {approx = true} : vector<1x1xf32> -> vector<1x1xf32>
    %171 = vector.broadcast %170 : vector<1x1xf32> to vector<1x256xf32>
    %172 = arith.mulf %163, %171 : vector<1x256xf32>
    %c1_75 = arith.constant 1 : index
    %c0_76 = arith.constant 0 : index
    %173 = vector.load %arg10[%c1_75, %c0_76] : memref<8x256xf32, #tpu.memory_space<vmem>>, vector<1x256xf32>
    tpu.vector_store %arg10[%c1_75, %c0_76], %172 {strides = array<i32>} : memref<8x256xf32, #tpu.memory_space<vmem>>, vector<1x256xf32>,
    %c8_i32_77 = arith.constant 8 : i32
    %174 = arith.muli %arg0, %c8_i32_77 : i32
    %c2_i32_78 = arith.constant 2 : i32
    %175 = arith.addi %174, %c2_i32_78 : i32
    %c2_i32_79 = arith.constant 2 : i32
    %176 = arith.muli %c2_i32_79, %175 : i32
    %177 = arith.index_cast %176 : i32 to index
    %178 = memref.load %arg1[%177] : memref<16xf32, #tpu.memory_space<smem>>
    %c2_i32_80 = arith.constant 2 : i32
    %179 = arith.muli %c2_i32_80, %175 : i32
    %c1_i32_81 = arith.constant 1 : i32
    %180 = arith.addi %179, %c1_i32_81 : i32
    %181 = arith.index_cast %180 : i32 to index
    %182 = memref.load %arg1[%181] : memref<16xf32, #tpu.memory_space<smem>>
    %183 = vector.broadcast %178 : f32 to vector<1x256xf32>
    %184 = arith.subf %183, %3 : vector<1x256xf32>
    %cst_82 = arith.constant 3.14159274 : f32
    %185 = vector.broadcast %cst_82 : f32 to vector<1x256xf32>
    %186 = arith.addf %184, %185 : vector<1x256xf32>
    %cst_83 = arith.constant 6.28318548 : f32
    %187 = vector.broadcast %cst_83 : f32 to vector<1x256xf32>
    %188 = arith.divf %186, %187 : vector<1x256xf32>
    %189 = math.floor %188 : vector<1x256xf32>
    %cst_84 = arith.constant 6.28318548 : f32
    %190 = vector.broadcast %cst_84 : f32 to vector<1x256xf32>
    %191 = arith.mulf %190, %189 : vector<1x256xf32>
    %192 = arith.subf %184, %191 : vector<1x256xf32>
    %193 = vector.broadcast %182 : f32 to vector<1x256xf32>
    %194 = arith.subf %193, %4 : vector<1x256xf32>
    %cst_85 = arith.constant 3.14159274 : f32
    %195 = vector.broadcast %cst_85 : f32 to vector<1x256xf32>
    %196 = arith.addf %194, %195 : vector<1x256xf32>
    %cst_86 = arith.constant 6.28318548 : f32
    %197 = vector.broadcast %cst_86 : f32 to vector<1x256xf32>
    %198 = arith.divf %196, %197 : vector<1x256xf32>
    %199 = math.floor %198 : vector<1x256xf32>
    %cst_87 = arith.constant 6.28318548 : f32
    %200 = vector.broadcast %cst_87 : f32 to vector<1x256xf32>
    %201 = arith.mulf %200, %199 : vector<1x256xf32>
    %202 = arith.subf %194, %201 : vector<1x256xf32>
    %cst_88 = arith.constant 5.000000e-01 : f32
    %203 = vector.broadcast %cst_88 : f32 to vector<1x256xf32>
    %204 = arith.mulf %203, %202 : vector<1x256xf32>
    %205 = arith.addf %192, %204 : vector<1x256xf32>
    %cst_89 = arith.constant 0.866025388 : f32
    %206 = vector.broadcast %cst_89 : f32 to vector<1x256xf32>
    %207 = arith.mulf %202, %206 : vector<1x256xf32>
    %208 = arith.mulf %205, %205 : vector<1x256xf32>
    %209 = arith.mulf %207, %207 : vector<1x256xf32>
    %210 = arith.addf %208, %209 : vector<1x256xf32>
    %cst_90 = arith.constant -2.500000e-01 : f32
    %211 = vector.broadcast %cst_90 : f32 to vector<1x256xf32>
    %212 = arith.mulf %211, %210 : vector<1x256xf32>
    %cst_91 = arith.constant 0.405284733 : f32
    %213 = vector.broadcast %cst_91 : f32 to vector<1x256xf32>
    %214 = arith.mulf %212, %213 : vector<1x256xf32>
    %215 = math.exp %214 : vector<1x256xf32>
    %cst_92 = arith.constant 1.000000e+01 : f32
    %216 = vector.broadcast %cst_92 : f32 to vector<1x256xf32>
    %217 = arith.mulf %216, %215 : vector<1x256xf32>
    %c2 = arith.constant 2 : index
    %c0_93 = arith.constant 0 : index
    %218 = vector.load %arg8[%c2, %c0_93] : memref<8x128xf32, #tpu.memory_space<vmem>>, vector<1x128xf32>
    %219 = arith.truncf %218 : vector<1x128xf32> to vector<1x128xbf16>
    %c0_94 = arith.constant 0 : index
    %c0_95 = arith.constant 0 : index
    %220 = vector.load %arg9[%c0_94, %c0_95] : memref<128x256xbf16, #tpu.memory_space<vmem>>, vector<128x256xbf16>
    %cst_96 = arith.constant dense<0.000000e+00> : vector<1x256xf32>
    %221 = tpu.matmul %219, %220, %cst_96 {dimension_numbers = #tpu.dot_dimension_numbers<[1], [0], [0], [1], [0, 0, 1, 1], [], []>} : vector<1x128xbf16>, vector<128x256xbf16>, vector<1x256xf32> -> vector<1x256xf32>
    %cst_97 = arith.constant 1.000000e-01 : f32
    %222 = vector.broadcast %cst_97 : f32 to vector<1x256xf32>
    %223 = arith.subf %221, %222 : vector<1x256xf32>
    %cst_98 = arith.constant 0.000000e+00 : f32
    %224 = vector.broadcast %cst_98 : f32 to vector<1x256xf32>
    %225 = arith.maximumf %223, %224 : vector<1x256xf32>
    %cst_99 = arith.constant 5.000000e-01 : f32
    %226 = vector.broadcast %cst_99 : f32 to vector<1x256xf32>
    %227 = arith.mulf %225, %226 : vector<1x256xf32>
    %228 = arith.addf %217, %227 : vector<1x256xf32>
    %229 = arith.truncf %172 : vector<1x256xf32> to vector<1x256xbf16>
    %c0_100 = arith.constant 0 : index
    %c0_101 = arith.constant 0 : index
    %230 = vector.load %arg7[%c0_100, %c0_101] : memref<256x256xbf16, #tpu.memory_space<vmem>>, vector<256x256xbf16>
    %cst_102 = arith.constant dense<0.000000e+00> : vector<1x256xf32>
    %231 = tpu.matmul %229, %230, %cst_102 {dimension_numbers = #tpu.dot_dimension_numbers<[1], [0], [0], [1], [0, 0, 1, 1], [], []>} : vector<1x256xbf16>, vector<256x256xbf16>, vector<1x256xf32> -> vector<1x256xf32>
    %232 = arith.addf %228, %231 : vector<1x256xf32>
    %233 = arith.subf %232, %160 : vector<1x256xf32>
    %cst_103 = arith.constant 1.000000e-01 : f32
    %234 = vector.broadcast %cst_103 : f32 to vector<1x256xf32>
    %235 = arith.mulf %234, %162 : vector<1x256xf32>
    %236 = arith.subf %162, %233 : vector<1x256xf32>
    %cst_104 = arith.constant 0.36787945 : f32
    %237 = vector.broadcast %cst_104 : f32 to vector<1x256xf32>
    %238 = arith.mulf %236, %237 : vector<1x256xf32>
    %239 = arith.addf %233, %238 : vector<1x256xf32>
    %240 = arith.subf %160, %235 : vector<1x256xf32>
    %cst_105 = arith.constant 0.904837429 : f32
    %241 = vector.broadcast %cst_105 : f32 to vector<1x256xf32>
    %242 = arith.mulf %240, %241 : vector<1x256xf32>
    %243 = arith.addf %235, %242 : vector<1x256xf32>
    %cst_106 = arith.constant 0.000000e+00 : f32
    %244 = vector.broadcast %cst_106 : f32 to vector<1x256xf32>
    %245 = arith.maximumf %239, %244 : vector<1x256xf32>
    %246 = arith.mulf %245, %245 : vector<1x256xf32>
    %cst_107 = arith.constant dense<0.000000e+00> : vector<1xf32>
    %247 = vector.multi_reduction <add>, %246, %cst_107 [1] : vector<1x256xf32> to vector<1xf32>
    %248 = vector.shape_cast %247 : vector<1xf32> to vector<1x1xf32>
    %cst_108 = arith.constant 7.812500e-02 : f32
    %249 = vector.broadcast %cst_108 : f32 to vector<1x1xf32>
    %250 = arith.mulf %249, %248 : vector<1x1xf32>
    %cst_109 = arith.constant 1.000000e+00 : f32
    %251 = vector.broadcast %cst_109 : f32 to vector<1x1xf32>
    %252 = arith.addf %251, %250 : vector<1x1xf32>
    %253 = tpu.reciprocal %252 {approx = true} : vector<1x1xf32> -> vector<1x1xf32>
    %254 = vector.broadcast %253 : vector<1x1xf32> to vector<1x256xf32>
    %255 = arith.mulf %246, %254 : vector<1x256xf32>
    %c2_110 = arith.constant 2 : index
    %c0_111 = arith.constant 0 : index
    %256 = vector.load %arg10[%c2_110, %c0_111] : memref<8x256xf32, #tpu.memory_space<vmem>>, vector<1x256xf32>
    tpu.vector_store %arg10[%c2_110, %c0_111], %255 {strides = array<i32>} : memref<8x256xf32, #tpu.memory_space<vmem>>, vector<1x256xf32>,
    %c8_i32_112 = arith.constant 8 : i32
    %257 = arith.muli %arg0, %c8_i32_112 : i32
    %c3_i32 = arith.constant 3 : i32
    %258 = arith.addi %257, %c3_i32 : i32
    %c2_i32_113 = arith.constant 2 : i32
    %259 = arith.muli %c2_i32_113, %258 : i32
    %260 = arith.index_cast %259 : i32 to index
    %261 = memref.load %arg1[%260] : memref<16xf32, #tpu.memory_space<smem>>
    %c2_i32_114 = arith.constant 2 : i32
    %262 = arith.muli %c2_i32_114, %258 : i32
    %c1_i32_115 = arith.constant 1 : i32
    %263 = arith.addi %262, %c1_i32_115 : i32
    %264 = arith.index_cast %263 : i32 to index
    %265 = memref.load %arg1[%264] : memref<16xf32, #tpu.memory_space<smem>>
    %266 = vector.broadcast %261 : f32 to vector<1x256xf32>
    %267 = arith.subf %266, %3 : vector<1x256xf32>
    %cst_116 = arith.constant 3.14159274 : f32
    %268 = vector.broadcast %cst_116 : f32 to vector<1x256xf32>
    %269 = arith.addf %267, %268 : vector<1x256xf32>
    %cst_117 = arith.constant 6.28318548 : f32
    %270 = vector.broadcast %cst_117 : f32 to vector<1x256xf32>
    %271 = arith.divf %269, %270 : vector<1x256xf32>
    %272 = math.floor %271 : vector<1x256xf32>
    %cst_118 = arith.constant 6.28318548 : f32
    %273 = vector.broadcast %cst_118 : f32 to vector<1x256xf32>
    %274 = arith.mulf %273, %272 : vector<1x256xf32>
    %275 = arith.subf %267, %274 : vector<1x256xf32>
    %276 = vector.broadcast %265 : f32 to vector<1x256xf32>
    %277 = arith.subf %276, %4 : vector<1x256xf32>
    %cst_119 = arith.constant 3.14159274 : f32
    %278 = vector.broadcast %cst_119 : f32 to vector<1x256xf32>
    %279 = arith.addf %277, %278 : vector<1x256xf32>
    %cst_120 = arith.constant 6.28318548 : f32
    %280 = vector.broadcast %cst_120 : f32 to vector<1x256xf32>
    %281 = arith.divf %279, %280 : vector<1x256xf32>
    %282 = math.floor %281 : vector<1x256xf32>
    %cst_121 = arith.constant 6.28318548 : f32
    %283 = vector.broadcast %cst_121 : f32 to vector<1x256xf32>
    %284 = arith.mulf %283, %282 : vector<1x256xf32>
    %285 = arith.subf %277, %284 : vector<1x256xf32>
    %cst_122 = arith.constant 5.000000e-01 : f32
    %286 = vector.broadcast %cst_122 : f32 to vector<1x256xf32>
    %287 = arith.mulf %286, %285 : vector<1x256xf32>
    %288 = arith.addf %275, %287 : vector<1x256xf32>
    %cst_123 = arith.constant 0.866025388 : f32
    %289 = vector.broadcast %cst_123 : f32 to vector<1x256xf32>
    %290 = arith.mulf %285, %289 : vector<1x256xf32>
    %291 = arith.mulf %288, %288 : vector<1x256xf32>
    %292 = arith.mulf %290, %290 : vector<1x256xf32>
    %293 = arith.addf %291, %292 : vector<1x256xf32>
    %cst_124 = arith.constant -2.500000e-01 : f32
    %294 = vector.broadcast %cst_124 : f32 to vector<1x256xf32>
    %295 = arith.mulf %294, %293 : vector<1x256xf32>
    %cst_125 = arith.constant 0.405284733 : f32
    %296 = vector.broadcast %cst_125 : f32 to vector<1x256xf32>
    %297 = arith.mulf %295, %296 : vector<1x256xf32>
    %298 = math.exp %297 : vector<1x256xf32>
    %cst_126 = arith.constant 1.000000e+01 : f32
    %299 = vector.broadcast %cst_126 : f32 to vector<1x256xf32>
    %300 = arith.mulf %299, %298 : vector<1x256xf32>
    %c3 = arith.constant 3 : index
    %c0_127 = arith.constant 0 : index
    %301 = vector.load %arg8[%c3, %c0_127] : memref<8x128xf32, #tpu.memory_space<vmem>>, vector<1x128xf32>
    %302 = arith.truncf %301 : vector<1x128xf32> to vector<1x128xbf16>
    %c0_128 = arith.constant 0 : index
    %c0_129 = arith.constant 0 : index
    %303 = vector.load %arg9[%c0_128, %c0_129] : memref<128x256xbf16, #tpu.memory_space<vmem>>, vector<128x256xbf16>
    %cst_130 = arith.constant dense<0.000000e+00> : vector<1x256xf32>
    %304 = tpu.matmul %302, %303, %cst_130 {dimension_numbers = #tpu.dot_dimension_numbers<[1], [0], [0], [1], [0, 0, 1, 1], [], []>} : vector<1x128xbf16>, vector<128x256xbf16>, vector<1x256xf32> -> vector<1x256xf32>
    %cst_131 = arith.constant 1.000000e-01 : f32
    %305 = vector.broadcast %cst_131 : f32 to vector<1x256xf32>
    %306 = arith.subf %304, %305 : vector<1x256xf32>
    %cst_132 = arith.constant 0.000000e+00 : f32
    %307 = vector.broadcast %cst_132 : f32 to vector<1x256xf32>
    %308 = arith.maximumf %306, %307 : vector<1x256xf32>
    %cst_133 = arith.constant 5.000000e-01 : f32
    %309 = vector.broadcast %cst_133 : f32 to vector<1x256xf32>
    %310 = arith.mulf %308, %309 : vector<1x256xf32>
    %311 = arith.addf %300, %310 : vector<1x256xf32>
    %312 = arith.truncf %255 : vector<1x256xf32> to vector<1x256xbf16>
    %c0_134 = arith.constant 0 : index
    %c0_135 = arith.constant 0 : index
    %313 = vector.load %arg7[%c0_134, %c0_135] : memref<256x256xbf16, #tpu.memory_space<vmem>>, vector<256x256xbf16>
    %cst_136 = arith.constant dense<0.000000e+00> : vector<1x256xf32>
    %314 = tpu.matmul %312, %313, %cst_136 {dimension_numbers = #tpu.dot_dimension_numbers<[1], [0], [0], [1], [0, 0, 1, 1], [], []>} : vector<1x256xbf16>, vector<256x256xbf16>, vector<1x256xf32> -> vector<1x256xf32>
    %315 = arith.addf %311, %314 : vector<1x256xf32>
    %316 = arith.subf %315, %243 : vector<1x256xf32>
    %cst_137 = arith.constant 1.000000e-01 : f32
    %317 = vector.broadcast %cst_137 : f32 to vector<1x256xf32>
    %318 = arith.mulf %317, %245 : vector<1x256xf32>
    %319 = arith.subf %245, %316 : vector<1x256xf32>
    %cst_138 = arith.constant 0.36787945 : f32
    %320 = vector.broadcast %cst_138 : f32 to vector<1x256xf32>
    %321 = arith.mulf %319, %320 : vector<1x256xf32>
    %322 = arith.addf %316, %321 : vector<1x256xf32>
    %323 = arith.subf %243, %318 : vector<1x256xf32>
    %cst_139 = arith.constant 0.904837429 : f32
    %324 = vector.broadcast %cst_139 : f32 to vector<1x256xf32>
    %325 = arith.mulf %323, %324 : vector<1x256xf32>
    %326 = arith.addf %318, %325 : vector<1x256xf32>
    %cst_140 = arith.constant 0.000000e+00 : f32
    %327 = vector.broadcast %cst_140 : f32 to vector<1x256xf32>
    %328 = arith.maximumf %322, %327 : vector<1x256xf32>
    %329 = arith.mulf %328, %328 : vector<1x256xf32>
    %cst_141 = arith.constant dense<0.000000e+00> : vector<1xf32>
    %330 = vector.multi_reduction <add>, %329, %cst_141 [1] : vector<1x256xf32> to vector<1xf32>
    %331 = vector.shape_cast %330 : vector<1xf32> to vector<1x1xf32>
    %cst_142 = arith.constant 7.812500e-02 : f32
    %332 = vector.broadcast %cst_142 : f32 to vector<1x1xf32>
    %333 = arith.mulf %332, %331 : vector<1x1xf32>
    %cst_143 = arith.constant 1.000000e+00 : f32
    %334 = vector.broadcast %cst_143 : f32 to vector<1x1xf32>
    %335 = arith.addf %334, %333 : vector<1x1xf32>
    %336 = tpu.reciprocal %335 {approx = true} : vector<1x1xf32> -> vector<1x1xf32>
    %337 = vector.broadcast %336 : vector<1x1xf32> to vector<1x256xf32>
    %338 = arith.mulf %329, %337 : vector<1x256xf32>
    %c3_144 = arith.constant 3 : index
    %c0_145 = arith.constant 0 : index
    %339 = vector.load %arg10[%c3_144, %c0_145] : memref<8x256xf32, #tpu.memory_space<vmem>>, vector<1x256xf32>
    tpu.vector_store %arg10[%c3_144, %c0_145], %338 {strides = array<i32>} : memref<8x256xf32, #tpu.memory_space<vmem>>, vector<1x256xf32>,
    %c8_i32_146 = arith.constant 8 : i32
    %340 = arith.muli %arg0, %c8_i32_146 : i32
    %c4_i32 = arith.constant 4 : i32
    %341 = arith.addi %340, %c4_i32 : i32
    %c2_i32_147 = arith.constant 2 : i32
    %342 = arith.muli %c2_i32_147, %341 : i32
    %343 = arith.index_cast %342 : i32 to index
    %344 = memref.load %arg1[%343] : memref<16xf32, #tpu.memory_space<smem>>
    %c2_i32_148 = arith.constant 2 : i32
    %345 = arith.muli %c2_i32_148, %341 : i32
    %c1_i32_149 = arith.constant 1 : i32
    %346 = arith.addi %345, %c1_i32_149 : i32
    %347 = arith.index_cast %346 : i32 to index
    %348 = memref.load %arg1[%347] : memref<16xf32, #tpu.memory_space<smem>>
    %349 = vector.broadcast %344 : f32 to vector<1x256xf32>
    %350 = arith.subf %349, %3 : vector<1x256xf32>
    %cst_150 = arith.constant 3.14159274 : f32
    %351 = vector.broadcast %cst_150 : f32 to vector<1x256xf32>
    %352 = arith.addf %350, %351 : vector<1x256xf32>
    %cst_151 = arith.constant 6.28318548 : f32
    %353 = vector.broadcast %cst_151 : f32 to vector<1x256xf32>
    %354 = arith.divf %352, %353 : vector<1x256xf32>
    %355 = math.floor %354 : vector<1x256xf32>
    %cst_152 = arith.constant 6.28318548 : f32
    %356 = vector.broadcast %cst_152 : f32 to vector<1x256xf32>
    %357 = arith.mulf %356, %355 : vector<1x256xf32>
    %358 = arith.subf %350, %357 : vector<1x256xf32>
    %359 = vector.broadcast %348 : f32 to vector<1x256xf32>
    %360 = arith.subf %359, %4 : vector<1x256xf32>
    %cst_153 = arith.constant 3.14159274 : f32
    %361 = vector.broadcast %cst_153 : f32 to vector<1x256xf32>
    %362 = arith.addf %360, %361 : vector<1x256xf32>
    %cst_154 = arith.constant 6.28318548 : f32
    %363 = vector.broadcast %cst_154 : f32 to vector<1x256xf32>
    %364 = arith.divf %362, %363 : vector<1x256xf32>
    %365 = math.floor %364 : vector<1x256xf32>
    %cst_155 = arith.constant 6.28318548 : f32
    %366 = vector.broadcast %cst_155 : f32 to vector<1x256xf32>
    %367 = arith.mulf %366, %365 : vector<1x256xf32>
    %368 = arith.subf %360, %367 : vector<1x256xf32>
    %cst_156 = arith.constant 5.000000e-01 : f32
    %369 = vector.broadcast %cst_156 : f32 to vector<1x256xf32>
    %370 = arith.mulf %369, %368 : vector<1x256xf32>
    %371 = arith.addf %358, %370 : vector<1x256xf32>
    %cst_157 = arith.constant 0.866025388 : f32
    %372 = vector.broadcast %cst_157 : f32 to vector<1x256xf32>
    %373 = arith.mulf %368, %372 : vector<1x256xf32>
    %374 = arith.mulf %371, %371 : vector<1x256xf32>
    %375 = arith.mulf %373, %373 : vector<1x256xf32>
    %376 = arith.addf %374, %375 : vector<1x256xf32>
    %cst_158 = arith.constant -2.500000e-01 : f32
    %377 = vector.broadcast %cst_158 : f32 to vector<1x256xf32>
    %378 = arith.mulf %377, %376 : vector<1x256xf32>
    %cst_159 = arith.constant 0.405284733 : f32
    %379 = vector.broadcast %cst_159 : f32 to vector<1x256xf32>
    %380 = arith.mulf %378, %379 : vector<1x256xf32>
    %381 = math.exp %380 : vector<1x256xf32>
    %cst_160 = arith.constant 1.000000e+01 : f32
    %382 = vector.broadcast %cst_160 : f32 to vector<1x256xf32>
    %383 = arith.mulf %382, %381 : vector<1x256xf32>
    %c4 = arith.constant 4 : index
    %c0_161 = arith.constant 0 : index
    %384 = vector.load %arg8[%c4, %c0_161] : memref<8x128xf32, #tpu.memory_space<vmem>>, vector<1x128xf32>
    %385 = arith.truncf %384 : vector<1x128xf32> to vector<1x128xbf16>
    %c0_162 = arith.constant 0 : index
    %c0_163 = arith.constant 0 : index
    %386 = vector.load %arg9[%c0_162, %c0_163] : memref<128x256xbf16, #tpu.memory_space<vmem>>, vector<128x256xbf16>
    %cst_164 = arith.constant dense<0.000000e+00> : vector<1x256xf32>
    %387 = tpu.matmul %385, %386, %cst_164 {dimension_numbers = #tpu.dot_dimension_numbers<[1], [0], [0], [1], [0, 0, 1, 1], [], []>} : vector<1x128xbf16>, vector<128x256xbf16>, vector<1x256xf32> -> vector<1x256xf32>
    %cst_165 = arith.constant 1.000000e-01 : f32
    %388 = vector.broadcast %cst_165 : f32 to vector<1x256xf32>
    %389 = arith.subf %387, %388 : vector<1x256xf32>
    %cst_166 = arith.constant 0.000000e+00 : f32
    %390 = vector.broadcast %cst_166 : f32 to vector<1x256xf32>
    %391 = arith.maximumf %389, %390 : vector<1x256xf32>
    %cst_167 = arith.constant 5.000000e-01 : f32
    %392 = vector.broadcast %cst_167 : f32 to vector<1x256xf32>
    %393 = arith.mulf %391, %392 : vector<1x256xf32>
    %394 = arith.addf %383, %393 : vector<1x256xf32>
    %395 = arith.truncf %338 : vector<1x256xf32> to vector<1x256xbf16>
    %c0_168 = arith.constant 0 : index
    %c0_169 = arith.constant 0 : index
    %396 = vector.load %arg7[%c0_168, %c0_169] : memref<256x256xbf16, #tpu.memory_space<vmem>>, vector<256x256xbf16>
    %cst_170 = arith.constant dense<0.000000e+00> : vector<1x256xf32>
    %397 = tpu.matmul %395, %396, %cst_170 {dimension_numbers = #tpu.dot_dimension_numbers<[1], [0], [0], [1], [0, 0, 1, 1], [], []>} : vector<1x256xbf16>, vector<256x256xbf16>, vector<1x256xf32> -> vector<1x256xf32>
    %398 = arith.addf %394, %397 : vector<1x256xf32>
    %399 = arith.subf %398, %326 : vector<1x256xf32>
    %cst_171 = arith.constant 1.000000e-01 : f32
    %400 = vector.broadcast %cst_171 : f32 to vector<1x256xf32>
    %401 = arith.mulf %400, %328 : vector<1x256xf32>
    %402 = arith.subf %328, %399 : vector<1x256xf32>
    %cst_172 = arith.constant 0.36787945 : f32
    %403 = vector.broadcast %cst_172 : f32 to vector<1x256xf32>
    %404 = arith.mulf %402, %403 : vector<1x256xf32>
    %405 = arith.addf %399, %404 : vector<1x256xf32>
    %406 = arith.subf %326, %401 : vector<1x256xf32>
    %cst_173 = arith.constant 0.904837429 : f32
    %407 = vector.broadcast %cst_173 : f32 to vector<1x256xf32>
    %408 = arith.mulf %406, %407 : vector<1x256xf32>
    %409 = arith.addf %401, %408 : vector<1x256xf32>
    %cst_174 = arith.constant 0.000000e+00 : f32
    %410 = vector.broadcast %cst_174 : f32 to vector<1x256xf32>
    %411 = arith.maximumf %405, %410 : vector<1x256xf32>
    %412 = arith.mulf %411, %411 : vector<1x256xf32>
    %cst_175 = arith.constant dense<0.000000e+00> : vector<1xf32>
    %413 = vector.multi_reduction <add>, %412, %cst_175 [1] : vector<1x256xf32> to vector<1xf32>
    %414 = vector.shape_cast %413 : vector<1xf32> to vector<1x1xf32>
    %cst_176 = arith.constant 7.812500e-02 : f32
    %415 = vector.broadcast %cst_176 : f32 to vector<1x1xf32>
    %416 = arith.mulf %415, %414 : vector<1x1xf32>
    %cst_177 = arith.constant 1.000000e+00 : f32
    %417 = vector.broadcast %cst_177 : f32 to vector<1x1xf32>
    %418 = arith.addf %417, %416 : vector<1x1xf32>
    %419 = tpu.reciprocal %418 {approx = true} : vector<1x1xf32> -> vector<1x1xf32>
    %420 = vector.broadcast %419 : vector<1x1xf32> to vector<1x256xf32>
    %421 = arith.mulf %412, %420 : vector<1x256xf32>
    %c4_178 = arith.constant 4 : index
    %c0_179 = arith.constant 0 : index
    %422 = vector.load %arg10[%c4_178, %c0_179] : memref<8x256xf32, #tpu.memory_space<vmem>>, vector<1x256xf32>
    tpu.vector_store %arg10[%c4_178, %c0_179], %421 {strides = array<i32>} : memref<8x256xf32, #tpu.memory_space<vmem>>, vector<1x256xf32>,
    %c8_i32_180 = arith.constant 8 : i32
    %423 = arith.muli %arg0, %c8_i32_180 : i32
    %c5_i32 = arith.constant 5 : i32
    %424 = arith.addi %423, %c5_i32 : i32
    %c2_i32_181 = arith.constant 2 : i32
    %425 = arith.muli %c2_i32_181, %424 : i32
    %426 = arith.index_cast %425 : i32 to index
    %427 = memref.load %arg1[%426] : memref<16xf32, #tpu.memory_space<smem>>
    %c2_i32_182 = arith.constant 2 : i32
    %428 = arith.muli %c2_i32_182, %424 : i32
    %c1_i32_183 = arith.constant 1 : i32
    %429 = arith.addi %428, %c1_i32_183 : i32
    %430 = arith.index_cast %429 : i32 to index
    %431 = memref.load %arg1[%430] : memref<16xf32, #tpu.memory_space<smem>>
    %432 = vector.broadcast %427 : f32 to vector<1x256xf32>
    %433 = arith.subf %432, %3 : vector<1x256xf32>
    %cst_184 = arith.constant 3.14159274 : f32
    %434 = vector.broadcast %cst_184 : f32 to vector<1x256xf32>
    %435 = arith.addf %433, %434 : vector<1x256xf32>
    %cst_185 = arith.constant 6.28318548 : f32
    %436 = vector.broadcast %cst_185 : f32 to vector<1x256xf32>
    %437 = arith.divf %435, %436 : vector<1x256xf32>
    %438 = math.floor %437 : vector<1x256xf32>
    %cst_186 = arith.constant 6.28318548 : f32
    %439 = vector.broadcast %cst_186 : f32 to vector<1x256xf32>
    %440 = arith.mulf %439, %438 : vector<1x256xf32>
    %441 = arith.subf %433, %440 : vector<1x256xf32>
    %442 = vector.broadcast %431 : f32 to vector<1x256xf32>
    %443 = arith.subf %442, %4 : vector<1x256xf32>
    %cst_187 = arith.constant 3.14159274 : f32
    %444 = vector.broadcast %cst_187 : f32 to vector<1x256xf32>
    %445 = arith.addf %443, %444 : vector<1x256xf32>
    %cst_188 = arith.constant 6.28318548 : f32
    %446 = vector.broadcast %cst_188 : f32 to vector<1x256xf32>
    %447 = arith.divf %445, %446 : vector<1x256xf32>
    %448 = math.floor %447 : vector<1x256xf32>
    %cst_189 = arith.constant 6.28318548 : f32
    %449 = vector.broadcast %cst_189 : f32 to vector<1x256xf32>
    %450 = arith.mulf %449, %448 : vector<1x256xf32>
    %451 = arith.subf %443, %450 : vector<1x256xf32>
    %cst_190 = arith.constant 5.000000e-01 : f32
    %452 = vector.broadcast %cst_190 : f32 to vector<1x256xf32>
    %453 = arith.mulf %452, %451 : vector<1x256xf32>
    %454 = arith.addf %441, %453 : vector<1x256xf32>
    %cst_191 = arith.constant 0.866025388 : f32
    %455 = vector.broadcast %cst_191 : f32 to vector<1x256xf32>
    %456 = arith.mulf %451, %455 : vector<1x256xf32>
    %457 = arith.mulf %454, %454 : vector<1x256xf32>
    %458 = arith.mulf %456, %456 : vector<1x256xf32>
    %459 = arith.addf %457, %458 : vector<1x256xf32>
    %cst_192 = arith.constant -2.500000e-01 : f32
    %460 = vector.broadcast %cst_192 : f32 to vector<1x256xf32>
    %461 = arith.mulf %460, %459 : vector<1x256xf32>
    %cst_193 = arith.constant 0.405284733 : f32
    %462 = vector.broadcast %cst_193 : f32 to vector<1x256xf32>
    %463 = arith.mulf %461, %462 : vector<1x256xf32>
    %464 = math.exp %463 : vector<1x256xf32>
    %cst_194 = arith.constant 1.000000e+01 : f32
    %465 = vector.broadcast %cst_194 : f32 to vector<1x256xf32>
    %466 = arith.mulf %465, %464 : vector<1x256xf32>
    %c5 = arith.constant 5 : index
    %c0_195 = arith.constant 0 : index
    %467 = vector.load %arg8[%c5, %c0_195] : memref<8x128xf32, #tpu.memory_space<vmem>>, vector<1x128xf32>
    %468 = arith.truncf %467 : vector<1x128xf32> to vector<1x128xbf16>
    %c0_196 = arith.constant 0 : index
    %c0_197 = arith.constant 0 : index
    %469 = vector.load %arg9[%c0_196, %c0_197] : memref<128x256xbf16, #tpu.memory_space<vmem>>, vector<128x256xbf16>
    %cst_198 = arith.constant dense<0.000000e+00> : vector<1x256xf32>
    %470 = tpu.matmul %468, %469, %cst_198 {dimension_numbers = #tpu.dot_dimension_numbers<[1], [0], [0], [1], [0, 0, 1, 1], [], []>} : vector<1x128xbf16>, vector<128x256xbf16>, vector<1x256xf32> -> vector<1x256xf32>
    %cst_199 = arith.constant 1.000000e-01 : f32
    %471 = vector.broadcast %cst_199 : f32 to vector<1x256xf32>
    %472 = arith.subf %470, %471 : vector<1x256xf32>
    %cst_200 = arith.constant 0.000000e+00 : f32
    %473 = vector.broadcast %cst_200 : f32 to vector<1x256xf32>
    %474 = arith.maximumf %472, %473 : vector<1x256xf32>
    %cst_201 = arith.constant 5.000000e-01 : f32
    %475 = vector.broadcast %cst_201 : f32 to vector<1x256xf32>
    %476 = arith.mulf %474, %475 : vector<1x256xf32>
    %477 = arith.addf %466, %476 : vector<1x256xf32>
    %478 = arith.truncf %421 : vector<1x256xf32> to vector<1x256xbf16>
    %c0_202 = arith.constant 0 : index
    %c0_203 = arith.constant 0 : index
    %479 = vector.load %arg7[%c0_202, %c0_203] : memref<256x256xbf16, #tpu.memory_space<vmem>>, vector<256x256xbf16>
    %cst_204 = arith.constant dense<0.000000e+00> : vector<1x256xf32>
    %480 = tpu.matmul %478, %479, %cst_204 {dimension_numbers = #tpu.dot_dimension_numbers<[1], [0], [0], [1], [0, 0, 1, 1], [], []>} : vector<1x256xbf16>, vector<256x256xbf16>, vector<1x256xf32> -> vector<1x256xf32>
    %481 = arith.addf %477, %480 : vector<1x256xf32>
    %482 = arith.subf %481, %409 : vector<1x256xf32>
    %cst_205 = arith.constant 1.000000e-01 : f32
    %483 = vector.broadcast %cst_205 : f32 to vector<1x256xf32>
    %484 = arith.mulf %483, %411 : vector<1x256xf32>
    %485 = arith.subf %411, %482 : vector<1x256xf32>
    %cst_206 = arith.constant 0.36787945 : f32
    %486 = vector.broadcast %cst_206 : f32 to vector<1x256xf32>
    %487 = arith.mulf %485, %486 : vector<1x256xf32>
    %488 = arith.addf %482, %487 : vector<1x256xf32>
    %489 = arith.subf %409, %484 : vector<1x256xf32>
    %cst_207 = arith.constant 0.904837429 : f32
    %490 = vector.broadcast %cst_207 : f32 to vector<1x256xf32>
    %491 = arith.mulf %489, %490 : vector<1x256xf32>
    %492 = arith.addf %484, %491 : vector<1x256xf32>
    %cst_208 = arith.constant 0.000000e+00 : f32
    %493 = vector.broadcast %cst_208 : f32 to vector<1x256xf32>
    %494 = arith.maximumf %488, %493 : vector<1x256xf32>
    %495 = arith.mulf %494, %494 : vector<1x256xf32>
    %cst_209 = arith.constant dense<0.000000e+00> : vector<1xf32>
    %496 = vector.multi_reduction <add>, %495, %cst_209 [1] : vector<1x256xf32> to vector<1xf32>
    %497 = vector.shape_cast %496 : vector<1xf32> to vector<1x1xf32>
    %cst_210 = arith.constant 7.812500e-02 : f32
    %498 = vector.broadcast %cst_210 : f32 to vector<1x1xf32>
    %499 = arith.mulf %498, %497 : vector<1x1xf32>
    %cst_211 = arith.constant 1.000000e+00 : f32
    %500 = vector.broadcast %cst_211 : f32 to vector<1x1xf32>
    %501 = arith.addf %500, %499 : vector<1x1xf32>
    %502 = tpu.reciprocal %501 {approx = true} : vector<1x1xf32> -> vector<1x1xf32>
    %503 = vector.broadcast %502 : vector<1x1xf32> to vector<1x256xf32>
    %504 = arith.mulf %495, %503 : vector<1x256xf32>
    %c5_212 = arith.constant 5 : index
    %c0_213 = arith.constant 0 : index
    %505 = vector.load %arg10[%c5_212, %c0_213] : memref<8x256xf32, #tpu.memory_space<vmem>>, vector<1x256xf32>
    tpu.vector_store %arg10[%c5_212, %c0_213], %504 {strides = array<i32>} : memref<8x256xf32, #tpu.memory_space<vmem>>, vector<1x256xf32>,
    %c8_i32_214 = arith.constant 8 : i32
    %506 = arith.muli %arg0, %c8_i32_214 : i32
    %c6_i32 = arith.constant 6 : i32
    %507 = arith.addi %506, %c6_i32 : i32
    %c2_i32_215 = arith.constant 2 : i32
    %508 = arith.muli %c2_i32_215, %507 : i32
    %509 = arith.index_cast %508 : i32 to index
    %510 = memref.load %arg1[%509] : memref<16xf32, #tpu.memory_space<smem>>
    %c2_i32_216 = arith.constant 2 : i32
    %511 = arith.muli %c2_i32_216, %507 : i32
    %c1_i32_217 = arith.constant 1 : i32
    %512 = arith.addi %511, %c1_i32_217 : i32
    %513 = arith.index_cast %512 : i32 to index
    %514 = memref.load %arg1[%513] : memref<16xf32, #tpu.memory_space<smem>>
    %515 = vector.broadcast %510 : f32 to vector<1x256xf32>
    %516 = arith.subf %515, %3 : vector<1x256xf32>
    %cst_218 = arith.constant 3.14159274 : f32
    %517 = vector.broadcast %cst_218 : f32 to vector<1x256xf32>
    %518 = arith.addf %516, %517 : vector<1x256xf32>
    %cst_219 = arith.constant 6.28318548 : f32
    %519 = vector.broadcast %cst_219 : f32 to vector<1x256xf32>
    %520 = arith.divf %518, %519 : vector<1x256xf32>
    %521 = math.floor %520 : vector<1x256xf32>
    %cst_220 = arith.constant 6.28318548 : f32
    %522 = vector.broadcast %cst_220 : f32 to vector<1x256xf32>
    %523 = arith.mulf %522, %521 : vector<1x256xf32>
    %524 = arith.subf %516, %523 : vector<1x256xf32>
    %525 = vector.broadcast %514 : f32 to vector<1x256xf32>
    %526 = arith.subf %525, %4 : vector<1x256xf32>
    %cst_221 = arith.constant 3.14159274 : f32
    %527 = vector.broadcast %cst_221 : f32 to vector<1x256xf32>
    %528 = arith.addf %526, %527 : vector<1x256xf32>
    %cst_222 = arith.constant 6.28318548 : f32
    %529 = vector.broadcast %cst_222 : f32 to vector<1x256xf32>
    %530 = arith.divf %528, %529 : vector<1x256xf32>
    %531 = math.floor %530 : vector<1x256xf32>
    %cst_223 = arith.constant 6.28318548 : f32
    %532 = vector.broadcast %cst_223 : f32 to vector<1x256xf32>
    %533 = arith.mulf %532, %531 : vector<1x256xf32>
    %534 = arith.subf %526, %533 : vector<1x256xf32>
    %cst_224 = arith.constant 5.000000e-01 : f32
    %535 = vector.broadcast %cst_224 : f32 to vector<1x256xf32>
    %536 = arith.mulf %535, %534 : vector<1x256xf32>
    %537 = arith.addf %524, %536 : vector<1x256xf32>
    %cst_225 = arith.constant 0.866025388 : f32
    %538 = vector.broadcast %cst_225 : f32 to vector<1x256xf32>
    %539 = arith.mulf %534, %538 : vector<1x256xf32>
    %540 = arith.mulf %537, %537 : vector<1x256xf32>
    %541 = arith.mulf %539, %539 : vector<1x256xf32>
    %542 = arith.addf %540, %541 : vector<1x256xf32>
    %cst_226 = arith.constant -2.500000e-01 : f32
    %543 = vector.broadcast %cst_226 : f32 to vector<1x256xf32>
    %544 = arith.mulf %543, %542 : vector<1x256xf32>
    %cst_227 = arith.constant 0.405284733 : f32
    %545 = vector.broadcast %cst_227 : f32 to vector<1x256xf32>
    %546 = arith.mulf %544, %545 : vector<1x256xf32>
    %547 = math.exp %546 : vector<1x256xf32>
    %cst_228 = arith.constant 1.000000e+01 : f32
    %548 = vector.broadcast %cst_228 : f32 to vector<1x256xf32>
    %549 = arith.mulf %548, %547 : vector<1x256xf32>
    %c6 = arith.constant 6 : index
    %c0_229 = arith.constant 0 : index
    %550 = vector.load %arg8[%c6, %c0_229] : memref<8x128xf32, #tpu.memory_space<vmem>>, vector<1x128xf32>
    %551 = arith.truncf %550 : vector<1x128xf32> to vector<1x128xbf16>
    %c0_230 = arith.constant 0 : index
    %c0_231 = arith.constant 0 : index
    %552 = vector.load %arg9[%c0_230, %c0_231] : memref<128x256xbf16, #tpu.memory_space<vmem>>, vector<128x256xbf16>
    %cst_232 = arith.constant dense<0.000000e+00> : vector<1x256xf32>
    %553 = tpu.matmul %551, %552, %cst_232 {dimension_numbers = #tpu.dot_dimension_numbers<[1], [0], [0], [1], [0, 0, 1, 1], [], []>} : vector<1x128xbf16>, vector<128x256xbf16>, vector<1x256xf32> -> vector<1x256xf32>
    %cst_233 = arith.constant 1.000000e-01 : f32
    %554 = vector.broadcast %cst_233 : f32 to vector<1x256xf32>
    %555 = arith.subf %553, %554 : vector<1x256xf32>
    %cst_234 = arith.constant 0.000000e+00 : f32
    %556 = vector.broadcast %cst_234 : f32 to vector<1x256xf32>
    %557 = arith.maximumf %555, %556 : vector<1x256xf32>
    %cst_235 = arith.constant 5.000000e-01 : f32
    %558 = vector.broadcast %cst_235 : f32 to vector<1x256xf32>
    %559 = arith.mulf %557, %558 : vector<1x256xf32>
    %560 = arith.addf %549, %559 : vector<1x256xf32>
    %561 = arith.truncf %504 : vector<1x256xf32> to vector<1x256xbf16>
    %c0_236 = arith.constant 0 : index
    %c0_237 = arith.constant 0 : index
    %562 = vector.load %arg7[%c0_236, %c0_237] : memref<256x256xbf16, #tpu.memory_space<vmem>>, vector<256x256xbf16>
    %cst_238 = arith.constant dense<0.000000e+00> : vector<1x256xf32>
    %563 = tpu.matmul %561, %562, %cst_238 {dimension_numbers = #tpu.dot_dimension_numbers<[1], [0], [0], [1], [0, 0, 1, 1], [], []>} : vector<1x256xbf16>, vector<256x256xbf16>, vector<1x256xf32> -> vector<1x256xf32>
    %564 = arith.addf %560, %563 : vector<1x256xf32>
    %565 = arith.subf %564, %492 : vector<1x256xf32>
    %cst_239 = arith.constant 1.000000e-01 : f32
    %566 = vector.broadcast %cst_239 : f32 to vector<1x256xf32>
    %567 = arith.mulf %566, %494 : vector<1x256xf32>
    %568 = arith.subf %494, %565 : vector<1x256xf32>
    %cst_240 = arith.constant 0.36787945 : f32
    %569 = vector.broadcast %cst_240 : f32 to vector<1x256xf32>
    %570 = arith.mulf %568, %569 : vector<1x256xf32>
    %571 = arith.addf %565, %570 : vector<1x256xf32>
    %572 = arith.subf %492, %567 : vector<1x256xf32>
    %cst_241 = arith.constant 0.904837429 : f32
    %573 = vector.broadcast %cst_241 : f32 to vector<1x256xf32>
    %574 = arith.mulf %572, %573 : vector<1x256xf32>
    %575 = arith.addf %567, %574 : vector<1x256xf32>
    %cst_242 = arith.constant 0.000000e+00 : f32
    %576 = vector.broadcast %cst_242 : f32 to vector<1x256xf32>
    %577 = arith.maximumf %571, %576 : vector<1x256xf32>
    %578 = arith.mulf %577, %577 : vector<1x256xf32>
    %cst_243 = arith.constant dense<0.000000e+00> : vector<1xf32>
    %579 = vector.multi_reduction <add>, %578, %cst_243 [1] : vector<1x256xf32> to vector<1xf32>
    %580 = vector.shape_cast %579 : vector<1xf32> to vector<1x1xf32>
    %cst_244 = arith.constant 7.812500e-02 : f32
    %581 = vector.broadcast %cst_244 : f32 to vector<1x1xf32>
    %582 = arith.mulf %581, %580 : vector<1x1xf32>
    %cst_245 = arith.constant 1.000000e+00 : f32
    %583 = vector.broadcast %cst_245 : f32 to vector<1x1xf32>
    %584 = arith.addf %583, %582 : vector<1x1xf32>
    %585 = tpu.reciprocal %584 {approx = true} : vector<1x1xf32> -> vector<1x1xf32>
    %586 = vector.broadcast %585 : vector<1x1xf32> to vector<1x256xf32>
    %587 = arith.mulf %578, %586 : vector<1x256xf32>
    %c6_246 = arith.constant 6 : index
    %c0_247 = arith.constant 0 : index
    %588 = vector.load %arg10[%c6_246, %c0_247] : memref<8x256xf32, #tpu.memory_space<vmem>>, vector<1x256xf32>
    tpu.vector_store %arg10[%c6_246, %c0_247], %587 {strides = array<i32>} : memref<8x256xf32, #tpu.memory_space<vmem>>, vector<1x256xf32>,
    %c8_i32_248 = arith.constant 8 : i32
    %589 = arith.muli %arg0, %c8_i32_248 : i32
    %c7_i32 = arith.constant 7 : i32
    %590 = arith.addi %589, %c7_i32 : i32
    %c2_i32_249 = arith.constant 2 : i32
    %591 = arith.muli %c2_i32_249, %590 : i32
    %592 = arith.index_cast %591 : i32 to index
    %593 = memref.load %arg1[%592] : memref<16xf32, #tpu.memory_space<smem>>
    %c2_i32_250 = arith.constant 2 : i32
    %594 = arith.muli %c2_i32_250, %590 : i32
    %c1_i32_251 = arith.constant 1 : i32
    %595 = arith.addi %594, %c1_i32_251 : i32
    %596 = arith.index_cast %595 : i32 to index
    %597 = memref.load %arg1[%596] : memref<16xf32, #tpu.memory_space<smem>>
    %598 = vector.broadcast %593 : f32 to vector<1x256xf32>
    %599 = arith.subf %598, %3 : vector<1x256xf32>
    %cst_252 = arith.constant 3.14159274 : f32
    %600 = vector.broadcast %cst_252 : f32 to vector<1x256xf32>
    %601 = arith.addf %599, %600 : vector<1x256xf32>
    %cst_253 = arith.constant 6.28318548 : f32
    %602 = vector.broadcast %cst_253 : f32 to vector<1x256xf32>
    %603 = arith.divf %601, %602 : vector<1x256xf32>
    %604 = math.floor %603 : vector<1x256xf32>
    %cst_254 = arith.constant 6.28318548 : f32
    %605 = vector.broadcast %cst_254 : f32 to vector<1x256xf32>
    %606 = arith.mulf %605, %604 : vector<1x256xf32>
    %607 = arith.subf %599, %606 : vector<1x256xf32>
    %608 = vector.broadcast %597 : f32 to vector<1x256xf32>
    %609 = arith.subf %608, %4 : vector<1x256xf32>
    %cst_255 = arith.constant 3.14159274 : f32
    %610 = vector.broadcast %cst_255 : f32 to vector<1x256xf32>
    %611 = arith.addf %609, %610 : vector<1x256xf32>
    %cst_256 = arith.constant 6.28318548 : f32
    %612 = vector.broadcast %cst_256 : f32 to vector<1x256xf32>
    %613 = arith.divf %611, %612 : vector<1x256xf32>
    %614 = math.floor %613 : vector<1x256xf32>
    %cst_257 = arith.constant 6.28318548 : f32
    %615 = vector.broadcast %cst_257 : f32 to vector<1x256xf32>
    %616 = arith.mulf %615, %614 : vector<1x256xf32>
    %617 = arith.subf %609, %616 : vector<1x256xf32>
    %cst_258 = arith.constant 5.000000e-01 : f32
    %618 = vector.broadcast %cst_258 : f32 to vector<1x256xf32>
    %619 = arith.mulf %618, %617 : vector<1x256xf32>
    %620 = arith.addf %607, %619 : vector<1x256xf32>
    %cst_259 = arith.constant 0.866025388 : f32
    %621 = vector.broadcast %cst_259 : f32 to vector<1x256xf32>
    %622 = arith.mulf %617, %621 : vector<1x256xf32>
    %623 = arith.mulf %620, %620 : vector<1x256xf32>
    %624 = arith.mulf %622, %622 : vector<1x256xf32>
    %625 = arith.addf %623, %624 : vector<1x256xf32>
    %cst_260 = arith.constant -2.500000e-01 : f32
    %626 = vector.broadcast %cst_260 : f32 to vector<1x256xf32>
    %627 = arith.mulf %626, %625 : vector<1x256xf32>
    %cst_261 = arith.constant 0.405284733 : f32
    %628 = vector.broadcast %cst_261 : f32 to vector<1x256xf32>
    %629 = arith.mulf %627, %628 : vector<1x256xf32>
    %630 = math.exp %629 : vector<1x256xf32>
    %cst_262 = arith.constant 1.000000e+01 : f32
    %631 = vector.broadcast %cst_262 : f32 to vector<1x256xf32>
    %632 = arith.mulf %631, %630 : vector<1x256xf32>
    %c7 = arith.constant 7 : index
    %c0_263 = arith.constant 0 : index
    %633 = vector.load %arg8[%c7, %c0_263] : memref<8x128xf32, #tpu.memory_space<vmem>>, vector<1x128xf32>
    %634 = arith.truncf %633 : vector<1x128xf32> to vector<1x128xbf16>
    %c0_264 = arith.constant 0 : index
    %c0_265 = arith.constant 0 : index
    %635 = vector.load %arg9[%c0_264, %c0_265] : memref<128x256xbf16, #tpu.memory_space<vmem>>, vector<128x256xbf16>
    %cst_266 = arith.constant dense<0.000000e+00> : vector<1x256xf32>
    %636 = tpu.matmul %634, %635, %cst_266 {dimension_numbers = #tpu.dot_dimension_numbers<[1], [0], [0], [1], [0, 0, 1, 1], [], []>} : vector<1x128xbf16>, vector<128x256xbf16>, vector<1x256xf32> -> vector<1x256xf32>
    %cst_267 = arith.constant 1.000000e-01 : f32
    %637 = vector.broadcast %cst_267 : f32 to vector<1x256xf32>
    %638 = arith.subf %636, %637 : vector<1x256xf32>
    %cst_268 = arith.constant 0.000000e+00 : f32
    %639 = vector.broadcast %cst_268 : f32 to vector<1x256xf32>
    %640 = arith.maximumf %638, %639 : vector<1x256xf32>
    %cst_269 = arith.constant 5.000000e-01 : f32
    %641 = vector.broadcast %cst_269 : f32 to vector<1x256xf32>
    %642 = arith.mulf %640, %641 : vector<1x256xf32>
    %643 = arith.addf %632, %642 : vector<1x256xf32>
    %644 = arith.truncf %587 : vector<1x256xf32> to vector<1x256xbf16>
    %c0_270 = arith.constant 0 : index
    %c0_271 = arith.constant 0 : index
    %645 = vector.load %arg7[%c0_270, %c0_271] : memref<256x256xbf16, #tpu.memory_space<vmem>>, vector<256x256xbf16>
    %cst_272 = arith.constant dense<0.000000e+00> : vector<1x256xf32>
    %646 = tpu.matmul %644, %645, %cst_272 {dimension_numbers = #tpu.dot_dimension_numbers<[1], [0], [0], [1], [0, 0, 1, 1], [], []>} : vector<1x256xbf16>, vector<256x256xbf16>, vector<1x256xf32> -> vector<1x256xf32>
    %647 = arith.addf %643, %646 : vector<1x256xf32>
    %648 = arith.subf %647, %575 : vector<1x256xf32>
    %cst_273 = arith.constant 1.000000e-01 : f32
    %649 = vector.broadcast %cst_273 : f32 to vector<1x256xf32>
    %650 = arith.mulf %649, %577 : vector<1x256xf32>
    %651 = arith.subf %577, %648 : vector<1x256xf32>
    %cst_274 = arith.constant 0.36787945 : f32
    %652 = vector.broadcast %cst_274 : f32 to vector<1x256xf32>
    %653 = arith.mulf %651, %652 : vector<1x256xf32>
    %654 = arith.addf %648, %653 : vector<1x256xf32>
    %655 = arith.subf %575, %650 : vector<1x256xf32>
    %cst_275 = arith.constant 0.904837429 : f32
    %656 = vector.broadcast %cst_275 : f32 to vector<1x256xf32>
    %657 = arith.mulf %655, %656 : vector<1x256xf32>
    %658 = arith.addf %650, %657 : vector<1x256xf32>
    %cst_276 = arith.constant 0.000000e+00 : f32
    %659 = vector.broadcast %cst_276 : f32 to vector<1x256xf32>
    %660 = arith.maximumf %654, %659 : vector<1x256xf32>
    %661 = arith.mulf %660, %660 : vector<1x256xf32>
    %cst_277 = arith.constant dense<0.000000e+00> : vector<1xf32>
    %662 = vector.multi_reduction <add>, %661, %cst_277 [1] : vector<1x256xf32> to vector<1xf32>
    %663 = vector.shape_cast %662 : vector<1xf32> to vector<1x1xf32>
    %cst_278 = arith.constant 7.812500e-02 : f32
    %664 = vector.broadcast %cst_278 : f32 to vector<1x1xf32>
    %665 = arith.mulf %664, %663 : vector<1x1xf32>
    %cst_279 = arith.constant 1.000000e+00 : f32
    %666 = vector.broadcast %cst_279 : f32 to vector<1x1xf32>
    %667 = arith.addf %666, %665 : vector<1x1xf32>
    %668 = tpu.reciprocal %667 {approx = true} : vector<1x1xf32> -> vector<1x1xf32>
    %669 = vector.broadcast %668 : vector<1x1xf32> to vector<1x256xf32>
    %670 = arith.mulf %661, %669 : vector<1x256xf32>
    %c7_280 = arith.constant 7 : index
    %c0_281 = arith.constant 0 : index
    %671 = vector.load %arg10[%c7_280, %c0_281] : memref<8x256xf32, #tpu.memory_space<vmem>>, vector<1x256xf32>
    tpu.vector_store %arg10[%c7_280, %c0_281], %670 {strides = array<i32>} : memref<8x256xf32, #tpu.memory_space<vmem>>, vector<1x256xf32>,
    %c0_282 = arith.constant 0 : index
    %c0_283 = arith.constant 0 : index
    %672 = vector.load %arg11[%c0_282, %c0_283] : memref<1x256xf32, #tpu.memory_space<vmem>>, vector<1x256xf32>
    tpu.vector_store %arg11[%c0_282, %c0_283], %660 {strides = array<i32>} : memref<1x256xf32, #tpu.memory_space<vmem>>, vector<1x256xf32>,
    %c0_284 = arith.constant 0 : index
    %c0_285 = arith.constant 0 : index
    %673 = vector.load %arg12[%c0_284, %c0_285] : memref<1x256xf32, #tpu.memory_space<vmem>>, vector<1x256xf32>
    tpu.vector_store %arg12[%c0_284, %c0_285], %658 {strides = array<i32>} : memref<1x256xf32, #tpu.memory_space<vmem>>, vector<1x256xf32>,
    %c0_286 = arith.constant 0 : index
    %c0_287 = arith.constant 0 : index
    %674 = vector.load %arg13[%c0_286, %c0_287] : memref<1x256xf32, #tpu.memory_space<vmem>>, vector<1x256xf32>
    tpu.vector_store %arg13[%c0_286, %c0_287], %670 {strides = array<i32>} : memref<1x256xf32, #tpu.memory_space<vmem>>, vector<1x256xf32>,
    %c0_i32_288 = arith.constant 0 : i32
    %675 = arith.cmpi eq, %arg0, %c0_i32_288 : i32
    %676 = arith.extui %675 : i1 to i32
    %c0_i32_289 = arith.constant 0 : i32
    %677 = arith.cmpi ne, %676, %c0_i32_289 : i32
    scf.if %677 {
      %c0_290 = arith.constant 0 : index
      %c0_291 = arith.constant 0 : index
      %678 = vector.load %arg14[%c0_290, %c0_291] : memref<1x256xf32, #tpu.memory_space<vmem>>, vector<1x256xf32>
      tpu.vector_store %arg14[%c0_290, %c0_291], %643 {strides = array<i32>} : memref<1x256xf32, #tpu.memory_space<vmem>>, vector<1x256xf32>,
      %c0_292 = arith.constant 0 : index
      %c0_293 = arith.constant 0 : index
      %679 = vector.load %arg15[%c0_292, %c0_293] : memref<1x256xf32, #tpu.memory_space<vmem>>, vector<1x256xf32>
      tpu.vector_store %arg15[%c0_292, %c0_293], %647 {strides = array<i32>} : memref<1x256xf32, #tpu.memory_space<vmem>>, vector<1x256xf32>,
    } else {
    }
    return
  }
  func.func @transform_0(%arg0: i32) -> i32 {
    %c0_i32 = arith.constant 0 : i32
    %c0_i32_0 = arith.constant 0 : i32
    return %c0_i32 : i32
  }
  func.func @transform_1(%arg0: i32) -> (i32, i32) {
    %c0_i32 = arith.constant 0 : i32
    %c0_i32_0 = arith.constant 0 : i32
    %c0_i32_1 = arith.constant 0 : i32
    return %c0_i32, %c0_i32_0 : i32, i32
  }
  func.func @transform_2(%arg0: i32) -> (i32, i32) {
    %c0_i32 = arith.constant 0 : i32
    %c0_i32_0 = arith.constant 0 : i32
    %c0_i32_1 = arith.constant 0 : i32
    return %c0_i32, %c0_i32_0 : i32, i32
  }
  func.func @transform_3(%arg0: i32) -> (i32, i32) {
    %c0_i32 = arith.constant 0 : i32
    %c0_i32_0 = arith.constant 0 : i32
    %c0_i32_1 = arith.constant 0 : i32
    return %c0_i32, %c0_i32_0 : i32, i32
  }
  func.func @transform_4(%arg0: i32) -> (i32, i32) {
    %c0_i32 = arith.constant 0 : i32
    %c0_i32_0 = arith.constant 0 : i32
    %c0_i32_1 = arith.constant 0 : i32
    return %c0_i32, %c0_i32_0 : i32, i32
  }
  func.func @transform_5(%arg0: i32) -> (i32, i32) {
    %c0_i32 = arith.constant 0 : i32
    %c0_i32_0 = arith.constant 0 : i32
    %c0_i32_1 = arith.constant 0 : i32
    return %c0_i32, %c0_i32_0 : i32, i32
  }
  func.func @transform_6(%arg0: i32) -> (i32, i32) {
    %c0_i32 = arith.constant 0 : i32
    %c0_i32_0 = arith.constant 0 : i32
    %c0_i32_1 = arith.constant 0 : i32
    return %c0_i32, %c0_i32_0 : i32, i32
  }
  func.func @transform_7(%arg0: i32) -> (i32, i32) {
    %c0_i32 = arith.constant 0 : i32
    %c0_i32_0 = arith.constant 0 : i32
    return %arg0, %c0_i32 : i32, i32
  }
  func.func @transform_8(%arg0: i32) -> (i32, i32) {
    %c0_i32 = arith.constant 0 : i32
    %c0_i32_0 = arith.constant 0 : i32
    %c0_i32_1 = arith.constant 0 : i32
    return %c0_i32, %c0_i32_0 : i32, i32
  }
  func.func @transform_9(%arg0: i32) -> (i32, i32) {
    %c0_i32 = arith.constant 0 : i32
    %c0_i32_0 = arith.constant 0 : i32
    return %arg0, %c0_i32 : i32, i32
  }
  func.func @transform_10(%arg0: i32) -> (i32, i32) {
    %c0_i32 = arith.constant 0 : i32
    %c0_i32_0 = arith.constant 0 : i32
    %c0_i32_1 = arith.constant 0 : i32
    return %c0_i32, %c0_i32_0 : i32, i32
  }
  func.func @transform_11(%arg0: i32) -> (i32, i32) {
    %c0_i32 = arith.constant 0 : i32
    %c0_i32_0 = arith.constant 0 : i32
    %c0_i32_1 = arith.constant 0 : i32
    return %c0_i32, %c0_i32_0 : i32, i32
  }
  func.func @transform_12(%arg0: i32) -> (i32, i32) {
    %c0_i32 = arith.constant 0 : i32
    %c0_i32_0 = arith.constant 0 : i32
    %c0_i32_1 = arith.constant 0 : i32
    return %c0_i32, %c0_i32_0 : i32, i32
  }
  func.func @transform_13(%arg0: i32) -> (i32, i32) {
    %c0_i32 = arith.constant 0 : i32
    %c0_i32_0 = arith.constant 0 : i32
    %c0_i32_1 = arith.constant 0 : i32
    return %c0_i32, %c0_i32_0 : i32, i32
  }
  func.func @transform_14(%arg0: i32) -> (i32, i32) {
    %c0_i32 = arith.constant 0 : i32
    %c0_i32_0 = arith.constant 0 : i32
    %c0_i32_1 = arith.constant 0 : i32
    return %c0_i32, %c0_i32_0 : i32, i32
  }
}

</mosaic_0001>

<bundles_post_ra>
// kernel: grid_model_rollout.1
= control target key start
LH: loop header
LB: loop body
LE: loop exit
PB: predicated region body
PF: predicated region fallthrough
CT: control target
= control target key end

     0   :  { %20 = vsyncpa [#allocation5], 0  ;;  %s6101_s0 = inlined_call_operand.vmem [shape: f32[16], index: 0, kind: input, shape index: {}]   ;;  %s6102_s1 = inlined_call_operand.vmem [shape: f32[1,256], index: 1, kind: input, shape index: {}]   ;;  %s6103_s2 = inlined_call_operand.vmem [shape: f32[1,256], index: 2, kind: input, shape index: {}]   ;;  %s6104_s3 = inlined_call_operand.vmem [shape: f32[1,256], index: 3, kind: input, shape index: {}]   ;;  %s6105_s4 = inlined_call_operand.vmem [shape: f32[1,256], index: 4, kind: input, shape index: {}]   ;;  %s6106_s5 = inlined_call_operand.vmem [shape: f32[1,256], index: 5, kind: input, shape index: {}]   ;;  %s6107_s6 = inlined_call_operand.hbm [shape: bf16[256,256], index: 6, kind: input, shape index: {}]   ;;  %s6108_s7 = inlined_call_operand.vmem [shape: f32[8,128], index: 7, kind: input, shape index: {}]   ;;  %s6109_s8 = inlined_call_operand.hbm [shape: bf16[128,256], index: 8, kind: input, shape index: {}]   ;;  %s6110_s9 = inlined_call_operand.vmem [shape: f32[8,256], index: 9, kind: output, shape index: {0}]   ;;  %s6111_s10 = inlined_call_operand.hbm [shape: f32[1,256], index: 10, kind: output, shape index: {1}]   ;;  %s6112_s11 = inlined_call_operand.hbm [shape: f32[1,256], index: 11, kind: output, shape index: {2}]   ;;  %s6113_s12 = inlined_call_operand.hbm [shape: f32[1,256], index: 12, kind: output, shape index: {3}]   ;;  %s6114_s13 = inlined_call_operand.hbm [shape: f32[1,256], index: 13, kind: output, shape index: {4}]   ;;  %s6115_s14 = inlined_call_operand.hbm [shape: f32[1,256], index: 14, kind: output, shape index: {5}]  }
   0x1   :  { %21 = vsyncpa [#allocation3], 0 }
   0x2   :  { %22 = vsyncpa [#allocation8], 0 }
   0x3   :  { %23 = vsyncpa [#allocation4], 0 }
   0x4   :  { %24 = vsyncpa [#allocation11], 0 }
   0x5   :  { %25 = vsyncpa [#allocation14], 0  ;;  %s32_s15 = sshll.u32 %s6101_s0, 4  ;;  %s33_s15 = int_to_ptr.vmem [resolvable:$true] %s32_s15 }
   0x6   :  { %s4858_s16 = scalar_lea.vmem %s33_s15, 16  ;;  %p4863_p1 = scmp.lt.s32.totalorder %s33_s15, %s33_s15 }
   0x7   :  { %p4859_p0 = scmp.ne.s32.totalorder %s33_s15, %s4858_s16  ;;  %p4864_p2 = scmp.lt.s32.totalorder %s4858_s16, %s4858_s16 }
   0x9   :  { %p4865_p3 = por %p4864_p2, %p4863_p1 }
   0xb   :  { %p4866_p4 = pnand %p4865_p3, %p4859_p0 }
   0xd   :  { %4869 = shalt.err (!%p4866_p4)
}
   0xe   :  { %s5022_s17 = smov [#allocation2]   ;;  %s5023_s18 = smov [#allocation6]  }
   0xf   :  { %35 = dma.vmem_to_smem %s33_s15, 16, %s5022_s17, [#allocation5]  }
  0x10   :  { %s51_s19 = sshll.u32 %s5023_s18, 4  ;;  %s52_s19 = int_to_ptr.vmem [resolvable:$true] %s51_s19 }
  0x11   :  { %s4878_s20 = scalar_lea.vmem %s52_s19, 4096  ;;  %p4883_p6 = scmp.lt.s32.totalorder %s52_s19, %s52_s19 }
  0x12   :  { %p4879_p5 = scmp.ne.s32.totalorder %s52_s19, %s4878_s20  ;;  %p4884_p7 = scmp.lt.s32.totalorder %s4878_s20, %s4878_s20 }
  0x14   :  { %p4885_p8 = por %p4884_p7, %p4883_p6 }
  0x16   :  { %p4886_p9 = pnand %p4885_p8, %p4879_p5 }
  0x18   :  { %4889 = shalt.err (!%p4886_p9)
}
  0x19   :  { %s5024_s0 = smov 128   ;;  %s5025_s21 = smov 8  }
  0x1a   :  { %57 = dma.hbm_to_vmem [thread:$0]  %s6107_s6, 4096, %s52_s19, [#allocation3], %s5024_s0, %s5024_s0, %s5025_s21  }
  0x1b   :  { %s5026_s24 = smov [#allocation7]  }
  0x1c   :  { %s65_s25 = sshll.u32 %s5026_s24, 4  ;;  %s66_s25 = int_to_ptr.vmem [resolvable:$true] %s65_s25 }
  0x1d   :  { %s4898_s26 = scalar_lea.vmem %s66_s25, 2048  ;;  %p4903_p11 = scmp.lt.s32.totalorder %s66_s25, %s66_s25 }
  0x1e   :  { %p4899_p10 = scmp.ne.s32.totalorder %s66_s25, %s4898_s26  ;;  %p4904_p12 = scmp.lt.s32.totalorder %s4898_s26, %s4898_s26 }
  0x20   :  { %p4905_p13 = por %p4904_p12, %p4903_p11 }
  0x22   :  { %p4906_p0 = pnand %p4905_p13, %p4899_p10 }
  0x24   :  { %4909 = shalt.err (!%p4906_p0)
}
  0x25   :  { %71 = dma.hbm_to_vmem [thread:$0]  %s6109_s8, 2048, %s66_s25, [#allocation8], %s5024_s0, %s5024_s0, %s5025_s21  }
  0x26   :  { %5010 = dma.done.wait [#allocation5], 16  }
  0x27   :  { %5011 = vsyncadd [#allocation5], 4294967280 }
  0x28   :  { %5012 = dma.done.wait [#allocation3], 4096  }
  0x29   :  { %5013 = vsyncadd [#allocation3], 4294963200 }
  0x2a   :  { %5014 = dma.done.wait [#allocation8], 2048  }
  0x2b   :  { %5015 = vsyncadd [#allocation8], 4294965248 }
  0x2c   :  { %81 = sfence }
  0x2d   :  { %v5118_v0 = vld [vmem:[#allocation7 + $0x74] ss:$8 sps:$4 sm:$0xff]   ;;  %v5120_v1 = vld [vmem:[#allocation7 + $0x70] ss:$8 sps:$4 sm:$0xff]   ;;  %v6116_v2 = vmov 0   ;;  %v88_v17 = vlaneseq  ;;  %vm582_vm1 = vcmask 1040384  }
  0x2e   :  { %262 = vmatprep.mubr.bf16.mxu1 %v6116_v2  ;;  %765 = vmatprep.mubr.bf16.mxu0 %v6116_v2  ;;  %v5125_v3 = vld [vmem:[#allocation7 + $0x64] ss:$8 sps:$4 sm:$0xff]   ;;  %v5129_v4 = vld [vmem:[#allocation7 + $0x60] ss:$8 sps:$4 sm:$0xff]   ;;  %v5133_v5 = vld [vmem:[#allocation7 + $0x54] ss:$8 sps:$4 sm:$0xff]  }
  0x2f   :  { %230 = vmatprep.subr.bf16.mxu1 %v5118_v0  ;;  %733 = vmatprep.subr.bf16.mxu0 %v5118_v0  ;;  %v5137_v6 = vld [vmem:[#allocation7 + $0x50] ss:$8 sps:$4 sm:$0xff]   ;;  %v5141_v7 = vld [vmem:[#allocation7 + $0x44] ss:$8 sps:$4 sm:$0xff]   ;;  %v5145_v8 = vld [vmem:[#allocation7 + $0x40] ss:$8 sps:$4 sm:$0xff]  }
  0x30   :  { %231 = vmatpush1.bf16.msra.mxu1 %v5120_v1  ;;  %734 = vmatpush1.bf16.msra.mxu0 %v5120_v1  ;;  %v5149_v9 = vld [vmem:[#allocation7 + $0x34] ss:$8 sps:$4 sm:$0xff]   ;;  %v5153_v10 = vld [vmem:[#allocation7 + $0x30] ss:$8 sps:$4 sm:$0xff]   ;;  %v5157_v11 = vld [vmem:[#allocation7 + $0x24] ss:$8 sps:$4 sm:$0xff]  }
  0x31   :  { %232 = vmatprep.subr.bf16.mxu1 %v5125_v3  ;;  %735 = vmatprep.subr.bf16.mxu0 %v5125_v3  ;;  %v5161_v12 = vld [vmem:[#allocation7 + $0x20] ss:$8 sps:$4 sm:$0xff]   ;;  %v5165_v13 = vld [vmem:[#allocation7 + $0x14] ss:$8 sps:$4 sm:$0xff]   ;;  %v5169_v14 = vld [vmem:[#allocation7 + $0x10] ss:$8 sps:$4 sm:$0xff]  }
  0x32   :  { %v5173_v15 = vld [vmem:[#allocation7 + $0x4] ss:$8 sps:$4 sm:$0xff]   ;;  %v5176_v16 = vld [vmem:[#allocation7] ss:$8 sps:$4 sm:$0xff]   ;;  %v5184_v19 = vld [vmem:[#allocation6 + $0x74] ss:$8 sps:$4 sm:$0xff]  }
  0x33   :  { %v132_v18 = vld [vmem:[%s6108_s7] sm:$0x1]  ;;  %vm5187_vm0 = vcmp.lt.s32.totalorder %v88_v17, 256  ;;  %v5192_v22 = vld [vmem:[#allocation6 + $0x70] ss:$8 sps:$4 sm:$0xff]   ;;  %v5206_v26 = vshrl.u32 %v88_v17, 7 }
  0x34   :  { %233 = vmatpush1.bf16.msra.mxu1 %v5129_v4  ;;  %736 = vmatpush1.bf16.msra.mxu0 %v5129_v4  ;;  %v133_v20 = vpack.c.bf16 %v132_v18, %v132_v18  ;;  %v5196_v23 = vld [vmem:[#allocation6 + $0x64] ss:$8 sps:$4 sm:$0xff]   ;;  %v87_v24 = vld [vmem:[%s6104_s3] sm:$0x3]  ;;  %v5208_v27 = vld [vmem:[#allocation6 + $0x54] ss:$8 sps:$4 sm:$0xff]  }
  0x35   :  { %234 = vmatprep.subr.bf16.mxu1 %v5133_v5  ;;  %737 = vmatprep.subr.bf16.mxu0 %v5133_v5  ;;  %v5202_v25 = vld [vmem:[#allocation6 + $0x60] ss:$8 sps:$4 sm:$0xff]   ;;  %92 = vst.msk [vmem:[#allocation12] sm:$0x3] %vm5187_vm0, %v87_v24  ;;  %v5212_v28 = vld [vmem:[#allocation6 + $0x50] ss:$8 sps:$4 sm:$0xff]  }
  0x36   :  { %v5215_v29 = vsub.s32 1, %v5206_v26  ;;  %v5217_v30 = vld [vmem:[#allocation6 + $0x44] ss:$8 sps:$4 sm:$0xff]   ;;  %v5221_v32 = vld [vmem:[#allocation6 + $0x40] ss:$8 sps:$4 sm:$0xff]   ;;  %v5289_v56 = vsub.s32 0, %v5206_v26 }
  0x37   :  { %v5224_v34 = vld [vmem:[#allocation6 + $0x34] ss:$8 sps:$4 sm:$0xff]   ;;  %v5228_v36 = vld [vmem:[#allocation6 + $0x30] ss:$8 sps:$4 sm:$0xff]   ;;  %v5230_v37 = vld [vmem:[#allocation6 + $0x24] ss:$8 sps:$4 sm:$0xff]  }
  0x38   :  { %235 = vmatpush1.bf16.msra.mxu1 %v5137_v6  ;;  %738 = vmatpush1.bf16.msra.mxu0 %v5137_v6  ;;  %v5234_v38 = vld [vmem:[#allocation6 + $0x20] ss:$8 sps:$4 sm:$0xff]   ;;  %v5236_v39 = vld [vmem:[#allocation6 + $0x14] ss:$8 sps:$4 sm:$0xff]   ;;  %v5240_v40 = vld [vmem:[#allocation6 + $0x10] ss:$8 sps:$4 sm:$0xff]  }
  0x39   :  { %236 = vmatprep.subr.bf16.mxu1 %v5141_v7  ;;  %739 = vmatprep.subr.bf16.mxu0 %v5141_v7  ;;  %v5242_v41 = vld [vmem:[#allocation6 + $0x4] ss:$8 sps:$4 sm:$0xff]   ;;  %v5246_v42 = vld [vmem:[#allocation6] ss:$8 sps:$4 sm:$0xff]   ;;  %v5248_v43 = vld [vmem:[#allocation6 + $0xf4] ss:$8 sps:$4 sm:$0xff]  }
  0x3a   :  { %v5252_v44 = vld [vmem:[#allocation6 + $0xf0] ss:$8 sps:$4 sm:$0xff]   ;;  %v5254_v45 = vld [vmem:[#allocation6 + $0xe4] ss:$8 sps:$4 sm:$0xff]   ;;  %v5259_v46 = vld [vmem:[#allocation6 + $0xe0] ss:$8 sps:$4 sm:$0xff]  }
  0x3b   :  { %v5262_v47 = vld [vmem:[#allocation6 + $0xd4] ss:$8 sps:$4 sm:$0xff]   ;;  %v5265_v48 = vld [vmem:[#allocation6 + $0xd0] ss:$8 sps:$4 sm:$0xff]   ;;  %v5268_v49 = vld [vmem:[#allocation6 + $0xc4] ss:$8 sps:$4 sm:$0xff]  }
  0x3c   :  { %237 = vmatpush1.bf16.msra.mxu1 %v5145_v8  ;;  %740 = vmatpush1.bf16.msra.mxu0 %v5145_v8  ;;  %v99_v31 = vld [vmem:[#allocation12] sm:$0x3]  ;;  %v5271_v50 = vld [vmem:[#allocation6 + $0xc0] ss:$8 sps:$4 sm:$0xff]   ;;  %v5274_v51 = vld [vmem:[#allocation6 + $0xb4] ss:$8 sps:$4 sm:$0xff]  }
  0x3d   :  { %238 = vmatprep.subr.bf16.mxu1 %v5149_v9  ;;  %741 = vmatprep.subr.bf16.mxu0 %v5149_v9  ;;  %v304_v33 = vrot.slane %v99_v31, %v5215_v29  ;;  %v5277_v52 = vld [vmem:[#allocation6 + $0xb0] ss:$8 sps:$4 sm:$0xff]   ;;  %v5280_v53 = vld [vmem:[#allocation6 + $0xa4] ss:$8 sps:$4 sm:$0xff]   ;;  %v5283_v54 = vld [vmem:[#allocation6 + $0xa0] ss:$8 sps:$4 sm:$0xff]   ;;  %v300_v59 = vrot.slane %v99_v31, %v5289_v56 }
  0x3e   :  { %v5286_v55 = vld [vmem:[#allocation6 + $0x94] ss:$8 sps:$4 sm:$0xff]   ;;  %v5292_v57 = vld [vmem:[#allocation6 + $0x90] ss:$8 sps:$4 sm:$0xff]   ;;  %v5295_v58 = vld [vmem:[#allocation6 + $0x84] ss:$8 sps:$4 sm:$0xff]  }
  0x3f   :  { %v308_v35 = vpack.c.bf16 %v304_v33, %v304_v33  ;;  %v5299_v60 = vld [vmem:[#allocation6 + $0x80] ss:$8 sps:$4 sm:$0xff]   ;;  %v307_v61 = vpack.c.bf16 %v300_v59, %v300_v59  ;;  %s4226_s27 = sld [smem:[#allocation2 + $0x3]]  ;;  %s5029_s0 = smov [#allocation10]  }
  0x40   :  { %239 = vmatpush1.bf16.msra.mxu1 %v5153_v10  ;;  %742 = vmatpush1.bf16.msra.mxu0 %v5153_v10  ;;  %v93_v62 = vld [vmem:[%s6105_s4] sm:$0x3]  ;;  %s4174_s4 = sld [smem:[#allocation2 + $0x1]]  ;;  %s4117_s21 = sshll.u32 %s5029_s0, 4  ;;  %s4118_s21 = int_to_ptr.vmem [resolvable:$true] %s4117_s21 }
  0x41   :  { %240 = vmatprep.subr.bf16.mxu1 %v5157_v11  ;;  %743 = vmatprep.subr.bf16.mxu0 %v5157_v11  ;;  %v95_v63 = vld [vmem:[%s6106_s5] sm:$0x3]  ;;  %94 = vst.msk [vmem:[#allocation9] sm:$0x3] %vm5187_vm0, %v93_v62  ;;  %s103_s5 = sld [smem:[#allocation2]]  ;;  %s5030_s22 = smov [#allocation13]  }
  0x42   :  { %96 = vst.msk [vmem:[#allocation10] sm:$0x3] %vm5187_vm0, %v95_v63  ;;  %s4225_s28 = sld [smem:[#allocation2 + $0x2]]  ;;  %p4915_p2 = scmp.lt.s32.totalorder %s4118_s21, %s4118_s21 }
  0x43   :  { %s4279_s29 = sld [smem:[#allocation2 + $0x5]] }
  0x44   :  { %241 = vmatpush1.bf16.msra.mxu1 %v5161_v12  ;;  %744 = vmatpush1.bf16.msra.mxu0 %v5161_v12  ;;  %s4278_s15 = sld [smem:[#allocation2 + $0x4]] }
  0x45   :  { %242 = vmatprep.subr.bf16.mxu1 %v5165_v13  ;;  %745 = vmatprep.subr.bf16.mxu0 %v5165_v13  ;;  %s4385_s23 = sld [smem:[#allocation2 + $0x9]] }
  0x46   :  { %s4384_s24 = sld [smem:[#allocation2 + $0x8]] }
  0x47   :  { %s4438_s6 = sld [smem:[#allocation2 + $0xb]] }
  0x48   :  { %243 = vmatpush1.bf16.msra.mxu1 %v5169_v14  ;;  %746 = vmatpush1.bf16.msra.mxu0 %v5169_v14  ;;  %s4437_s30 = sld [smem:[#allocation2 + $0xa]] }
  0x49   :  { %244 = vmatprep.subr.bf16.mxu1 %v5173_v15  ;;  %747 = vmatprep.subr.bf16.mxu0 %v5173_v15  ;;  %s4490_s18 = sld [smem:[#allocation2 + $0xc]] }
  0x4a   :  { %s4544_s19 = sld [smem:[#allocation2 + $0xf]] }
  0x4c   :  { %245 = vmatpush1.bf16.msra.mxu1 %v5176_v16  ;;  %748 = vmatpush1.bf16.msra.mxu0 %v5176_v16 }
  0x4d   :  { %501 = vmatprep.subr.bf16.mxu1 %v5184_v19  ;;  %1004 = vmatprep.subr.bf16.mxu0 %v5184_v19 }
  0x4f   :  { %263 = vmatmul.mubr.bf16.vlgmr.msra.gmra.mxu1 %v133_v20 }
  0x50   :  { %502 = vmatpush1.bf16.msra.mxu1 %v5192_v22  ;;  %533 = vmatprep.mubr.bf16.mxu1 %v308_v35 }
  0x51   :  { %503 = vmatprep.subr.bf16.mxu1 %v5196_v23 }
  0x54   :  { %504 = vmatpush1.bf16.msra.mxu1 %v5202_v25 }
  0x55   :  { %505 = vmatprep.subr.bf16.mxu1 %v5208_v27 }
  0x58   :  { %506 = vmatpush1.bf16.msra.mxu1 %v5212_v28 }
  0x59   :  { %507 = vmatprep.subr.bf16.mxu1 %v5217_v30 }
  0x5c   :  { %508 = vmatpush1.bf16.msra.mxu1 %v5221_v32 }
  0x5d   :  { %509 = vmatprep.subr.bf16.mxu1 %v5224_v34 }
  0x60   :  { %510 = vmatpush1.bf16.msra.mxu1 %v5228_v36 }
  0x61   :  { %511 = vmatprep.subr.bf16.mxu1 %v5230_v37 }
  0x64   :  { %512 = vmatpush1.bf16.msra.mxu1 %v5234_v38 }
  0x65   :  { %513 = vmatprep.subr.bf16.mxu1 %v5236_v39 }
  0x68   :  { %514 = vmatpush1.bf16.msra.mxu1 %v5240_v40 }
  0x69   :  { %515 = vmatprep.subr.bf16.mxu1 %v5242_v41 }
  0x6c   :  { %516 = vmatpush1.bf16.msra.mxu1 %v5246_v42 }
  0x6d   :  { %517 = vmatprep.subr.bf16.mxu1 %v5248_v43 }
  0x70   :  { %518 = vmatpush2.bf16.msra.mxu1 %v5252_v44 }
  0x71   :  { %519 = vmatprep.subr.bf16.mxu1 %v5254_v45 }
  0x74   :  { %520 = vmatpush2.bf16.msra.mxu1 %v5259_v46 }
  0x75   :  { %521 = vmatprep.subr.bf16.mxu1 %v5262_v47 }
  0x78   :  { %522 = vmatpush2.bf16.msra.mxu1 %v5265_v48 }
  0x79   :  { %523 = vmatprep.subr.bf16.mxu1 %v5268_v49 }
  0x7c   :  { %524 = vmatpush2.bf16.msra.mxu1 %v5271_v50 }
  0x7d   :  { %525 = vmatprep.subr.bf16.mxu1 %v5274_v51 }
  0x80   :  { %526 = vmatpush2.bf16.msra.mxu1 %v5277_v52 }
  0x81   :  { %527 = vmatprep.subr.bf16.mxu1 %v5280_v53 }
  0x84   :  { %528 = vmatpush2.bf16.msra.mxu1 %v5283_v54 }
  0x85   :  { %529 = vmatprep.subr.bf16.mxu1 %v5286_v55 }
  0x88   :  { %530 = vmatpush2.bf16.msra.mxu1 %v5292_v57 }
  0x89   :  { %531 = vmatprep.subr.bf16.mxu1 %v5295_v58 }
  0x8c   :  { %532 = vmatpush2.bf16.msra.mxu1 %v5299_v60 }
  0x8d   :  { %1231 = vmatprep.subr.bf16.mxu1 %v5118_v0  ;;  %v635_v0 = vld [vmem:[%s6108_s7 + $0x1] sm:$0x1] }
  0x8f   :  { %534 = vmatmul.mubr.bf16.vlgmr.msra.gmra.mxu1 %v307_v61 }
  0x90   :  { %1232 = vmatpush1.bf16.msra.mxu1 %v5120_v1  ;;  %1263 = vmatprep.mubr.bf16.mxu1 %v6116_v2  ;;  %v636_v1 = vpack.c.bf16 %v635_v0, %v635_v0 }
  0x91   :  { %1233 = vmatprep.subr.bf16.mxu1 %v5125_v3  ;;  %v5351_v3 = vld [vmem:[%s6103_s2] sm:$0x3] }
  0x92   :  { %766 = vmatmul.mubr.bf16.vlgmr.msra.gmra.mxu0 %v636_v1 }
  0x93   :  { %1005 = vmatpush1.bf16.msra.mxu0 %v5192_v22 }
  0x94   :  { %1234 = vmatpush1.bf16.msra.mxu1 %v5129_v4  ;;  %1006 = vmatprep.subr.bf16.mxu0 %v5196_v23  ;;  %v114_v4 = vstv %s4174_s4  ;;  %s4332_s4 = sld [smem:[#allocation2 + $0x7]] }
  0x95   :  { %1235 = vmatprep.subr.bf16.mxu1 %v5133_v5  ;;  %v115_v5 = vsub.f32 %v114_v4, %v5351_v3 }
  0x97   :  { %1007 = vmatpush1.bf16.msra.mxu0 %v5202_v25 }
  0x98   :  { %1236 = vmatpush1.bf16.msra.mxu1 %v5137_v6  ;;  %1008 = vmatprep.subr.bf16.mxu0 %v5208_v27 }
  0x99   :  { %1237 = vmatprep.subr.bf16.mxu1 %v5141_v7  ;;  %v5359_v7 = vld [vmem:[%s6102_s1] sm:$0x3] }
  0x9b   :  { %1009 = vmatpush1.bf16.msra.mxu0 %v5212_v28 }
  0x9c   :  { %1238 = vmatpush1.bf16.msra.mxu1 %v5145_v8  ;;  %1010 = vmatprep.subr.bf16.mxu0 %v5217_v30  ;;  %v106_v8 = vstv %s103_s5  ;;  %s4331_s5 = sld [smem:[#allocation2 + $0x6]] }
  0x9d   :  { %1239 = vmatprep.subr.bf16.mxu1 %v5149_v9 }
  0x9f   :  { %1011 = vmatpush1.bf16.msra.mxu0 %v5221_v32 }
  0xa0   :  { %1240 = vmatpush1.bf16.msra.mxu1 %v5153_v10  ;;  %1012 = vmatprep.subr.bf16.mxu0 %v5224_v34  ;;  %v107_v10 = vsub.f32 %v106_v8, %v5359_v7 }
  0xa1   :  { %1241 = vmatprep.subr.bf16.mxu1 %v5157_v11  ;;  %v116_v11 = vadd.f32 3.1415927, %v115_v5 }
  0xa3   :  { %1013 = vmatpush1.bf16.msra.mxu0 %v5228_v36 }
  0xa4   :  { %1242 = vmatpush1.bf16.msra.mxu1 %v5161_v12  ;;  %1014 = vmatprep.subr.bf16.mxu0 %v5230_v37 }
  0xa5   :  { %1243 = vmatprep.subr.bf16.mxu1 %v5165_v13 }
  0xa7   :  { %1015 = vmatpush1.bf16.msra.mxu0 %v5234_v38 }
  0xa8   :  { %1244 = vmatpush1.bf16.msra.mxu1 %v5169_v14  ;;  %1016 = vmatprep.subr.bf16.mxu0 %v5236_v39  ;;  %v108_v14 = vadd.f32 3.1415927, %v107_v10 }
  0xa9   :  { %1245 = vmatprep.subr.bf16.mxu1 %v5173_v15  ;;  %v117_v15 = vmul.f32 0.15915494, %v116_v11  ;;  %v5028_v11 = vmov 1966171168  }
  0xab   :  { %1017 = vmatpush1.bf16.msra.mxu0 %v5240_v40  ;;  %v118_v17 = vfloor.f32 %v117_v15 }
  0xac   :  { %1246 = vmatpush1.bf16.msra.mxu1 %v5176_v16  ;;  %1018 = vmatprep.subr.bf16.mxu0 %v5242_v41  ;;  %v110_v16 = vmul.f32 0.15915494, %v108_v14 }
  0xad   :  { %1502 = vmatprep.subr.bf16.mxu1 %v5184_v19  ;;  %v119_v19 = vmul.f32 6.2831855, %v118_v17 }
  0xae   :  { %v111_v18 = vfloor.f32 %v110_v16 }
  0xaf   :  { %1019 = vmatpush1.bf16.msra.mxu0 %v5246_v42  ;;  %v120_v24 = vsub.f32 %v115_v5, %v119_v19 }
  0xb0   :  { %1020 = vmatprep.subr.bf16.mxu0 %v5248_v43  ;;  %v112_v20 = vmul.f32 6.2831855, %v111_v18 }
  0xb1   :  { %v121_v33 = vmul.f32 0.5, %v120_v24  ;;  %v123_v59 = vmul.f32 0.8660254, %v120_v24 }
  0xb2   :  { %v113_v31 = vsub.f32 %v107_v10, %v112_v20 }
  0xb3   :  { %1021 = vmatpush2.bf16.msra.mxu0 %v5252_v44  ;;  %v125_v62 = vmul.f32 %v123_v59, %v123_v59 }
  0xb4   :  { %1022 = vmatprep.subr.bf16.mxu0 %v5254_v45  ;;  %v122_v35 = vadd.f32 %v121_v33, %v113_v31 }
  0xb6   :  { %v124_v61 = vmul.f32 %v122_v35, %v122_v35 }
  0xb7   :  { %1023 = vmatpush2.bf16.msra.mxu0 %v5259_v46 }
  0xb8   :  { %1024 = vmatprep.subr.bf16.mxu0 %v5262_v47  ;;  %v126_v63 = vadd.f32 %v125_v62, %v124_v61 }
  0xba   :  { %v127_v0 = vmul.f32 -0.25, %v126_v63 }
  0xbb   :  { %1025 = vmatpush2.bf16.msra.mxu0 %v5265_v48 }
  0xbc   :  { %1026 = vmatprep.subr.bf16.mxu0 %v5268_v49  ;;  %v128_v1 = vmul.f32 0.40528473, %v127_v0  ;;  %v5384_v0 = vld [vmem:[#allocation10] sm:$0x3] }
  0xbe   :  { %v129_v8 = vmul.f32 1.442695, %v128_v1  ;;  %v5386_v1 = vld [vmem:[#allocation9] sm:$0x3] }
  0xbf   :  { %1027 = vmatpush2.bf16.msra.mxu0 %v5271_v50 }
  0xc0   :  { %1028 = vmatprep.subr.bf16.mxu0 %v5274_v51  ;;  %4824 = vpow2.f32 %v129_v8 }
  0xc3   :  { %1029 = vmatpush2.bf16.msra.mxu0 %v5277_v52 }
  0xc4   :  { %1030 = vmatprep.subr.bf16.mxu0 %v5280_v53 }
  0xc7   :  { %1031 = vmatpush2.bf16.msra.mxu0 %v5283_v54 }
  0xc8   :  { %1032 = vmatprep.subr.bf16.mxu0 %v5286_v55 }
  0xcb   :  { %1033 = vmatpush2.bf16.msra.mxu0 %v5292_v57 }
  0xcc   :  { %1034 = vmatprep.subr.bf16.mxu0 %v5295_v58 }
  0xcd   :  { %v4825_v20 = vpop.eup %4824 }
  0xcf   :  { %1035 = vmatpush2.bf16.msra.mxu0 %v5299_v60 }
 0x10f   :  { %v264_v6 = vpop.f32.mrf.mxu1 }
 0x110   :  { %v4191_v4 = vadd.f32 -0.1, %v264_v6 }
 0x111   :  { %v266_v9 = vpop.f32.mrf.mxu1 }
 0x112   :  { %v4192_v5 = vadd.f32 -0.1, %v266_v9  ;;  %v273_v10 = vmax.f32 %v4191_v4, 0.0  ;;  %v131_v9 = vmul.f32 10.0, %v4825_v20 }
 0x113   :  { %v268_v12 = vpop.f32.mrf.mxu1 }
 0x114   :  { %v281_v12 = vunpack.c.l.s4 %v5028_v11  ;;  %v275_v15 = vmul.f32 0.5, %v273_v10 }
 0x115   :  { %v269_v13 = vpop.f32.mrf.mxu1 }
 0x116   :  { %v274_v13 = vmax.f32 %v4192_v5, 0.0  ;;  %v282_v14 = vunpack.c.0.s8 %v281_v12 }
 0x118   :  { %v276_v16 = vmul.f32 0.5, %v274_v13  ;;  %v5378_v17 = vsub.s32 %v282_v14, %v5206_v26 }
 0x11a   :  { %6136 = vst [vmem:[#allocation22_spill] sm:$0xff] %v5378_v17  ;;  %v279_v18 = vcombine.low %v275_v15, %v276_v16 }
 0x11c   :  { %v286_v19 = vrot.slane %v279_v18, %v5378_v17 }
 0x11e   :  { %v293_v6 = vrot.slane %v286_v19, %v5378_v17 }
 0x120   :  { %v295_v62 = vadd.f32 %v293_v6, %v131_v9 }
 0x14f   :  { %v535_v24 = vpop.f32.mrf.mxu1 }
 0x151   :  { %v537_v31 = vpop.f32.mrf.mxu1 }
 0x152   :  { %v544_v33 = vcombine.low %v535_v24, %v537_v31  ;;  %v767_v19 = vpop.f32.mrf.mxu0 }
 0x153   :  { %v539_v35 = vpop.f32.mrf.mxu1  ;;  %v4243_v20 = vadd.f32 -0.1, %v767_v19 }
 0x154   :  { %v551_v59 = vrot.slane %v544_v33, %v5378_v17  ;;  %v769_v24 = vpop.f32.mrf.mxu0 }
 0x155   :  { %v540_v61 = vpop.f32.mrf.mxu1  ;;  %v776_v31 = vmax.f32 %v4243_v20, 0.0  ;;  %v4244_v6 = vadd.f32 -0.1, %v769_v24 }
 0x156   :  { %v558_v63 = vrot.slane %v551_v59, %v5378_v17  ;;  %v771_v9 = vpop.f32.mrf.mxu0 }
 0x157   :  { %v5398_v33 = vmul.f32 0.5, %v776_v31  ;;  %v777_v35 = vmax.f32 %v4244_v6, 0.0 }
 0x158   :  { %v560_v26 = vadd.f32 %v558_v63, %v295_v62  ;;  %v772_v59 = vpop.f32.mrf.mxu0 }
 0x159   :  { %v5400_v61 = vmul.f32 0.5, %v777_v35 }
 0x15a   :  { %v561_v4 = vsub.f32 %v560_v26, %v5384_v0 }
 0x15b   :  { %v782_v62 = vcombine.low %v5398_v33, %v5400_v61 }
 0x15c   :  { %v563_v5 = vsub.f32 %v5386_v1, %v561_v4 }
 0x15e   :  { %v564_v8 = vmul.f32 0.36787945, %v563_v5 }
 0x160   :  { %v565_v11 = vadd.f32 %v564_v8, %v561_v4 }
 0x162   :  { %v5390_v12 = vmax.f32 %v565_v11, 0.0 }
 0x164   :  { %v570_v10 = vmul.f32 %v5390_v12, %v5390_v12 }
 0x166   :  { %v575_v13 = vrot.slane %v570_v10, %v5289_v56  ;;  %v579_v14 = vrot.slane %v570_v10, %v5215_v29 }
 0x168   :  { %v583_v15 = vsel %vm582_vm1, %v575_v13, 0.0  ;;  %v584_v16 = vsel %vm582_vm1, %v579_v14, 0.0 }
 0x169   :  { %v585_v18 = vadd.f32 %v584_v16, %v583_v15 }
 0x16b   :  { %586 = vadd.xlane.f32.xlu0 %v585_v18 }
 0x1f4   :  { %v587_v63 = vpop.xlane.xlu0 %586 }
 0x1f5   :  { %v588_v26 = vmul.f32 0.078125, %v587_v63 }
 0x1f7   :  { %v589_v4 = vadd.f32 1.0, %v588_v26 }
 0x1f9   :  { %4826 = vrcp.f32 %v589_v4 }
 0x206   :  { %v4827_v5 = vpop.eup %4826 }
 0x207   :  { %v595_v8 = vrot.slane %v4827_v5, %v5289_v56 }
 0x209   :  { %v597_v11 = vmul.f32 %v595_v8, %v570_v10  ;;  %v1133_v10 = vld [vmem:[%s6108_s7 + $0x2] sm:$0x1] }
 0x20a   :  { %v1134_v18 = vpack.c.bf16 %v1133_v10, %v1133_v10 }
 0x20b   :  { %602 = vst.msk [vmem:[%s6110_s9] ss:$8 sm:$0x3] %vm5187_vm0, %v597_v11  ;;  %v807_v13 = vrot.slane %v597_v11, %v5215_v29  ;;  %v803_v14 = vrot.slane %v597_v11, %v5289_v56 }
 0x20c   :  { %1264 = vmatmul.mubr.bf16.vlgmr.msra.gmra.mxu1 %v1134_v18 }
 0x20d   :  { %v811_v15 = vpack.c.bf16 %v807_v13, %v807_v13  ;;  %v810_v16 = vpack.c.bf16 %v803_v14, %v803_v14  ;;  %1503 = vmatpush1.bf16.msra.mxu1 %v5192_v22  ;;  %v617_v22 = vstv %s4226_s27 }
 0x20e   :  { %1504 = vmatprep.subr.bf16.mxu1 %v5196_v23  ;;  %v618_v23 = vsub.f32 %v617_v22, %v5351_v3 }
 0x20f   :  { %1036 = vmatprep.mubr.bf16.mxu0 %v811_v15 }
 0x210   :  { %1037 = vmatmul.mubr.bf16.vlgmr.msra.gmra.mxu0 %v810_v16 }
 0x211   :  { %1761 = vmatprep.mubr.bf16.mxu0 %v6116_v2  ;;  %1505 = vmatpush1.bf16.msra.mxu1 %v5202_v25  ;;  %v610_v25 = vstv %s4225_s28 }
 0x212   :  { %1506 = vmatprep.subr.bf16.mxu1 %v5208_v27  ;;  %v611_v27 = vsub.f32 %v610_v25, %v5359_v7 }
 0x215   :  { %1507 = vmatpush1.bf16.msra.mxu1 %v5212_v28  ;;  %v619_v28 = vadd.f32 3.1415927, %v618_v23 }
 0x216   :  { %1508 = vmatprep.subr.bf16.mxu1 %v5217_v30  ;;  %v612_v30 = vadd.f32 3.1415927, %v611_v27 }
 0x219   :  { %1509 = vmatpush1.bf16.msra.mxu1 %v5221_v32  ;;  %v620_v32 = vmul.f32 0.15915494, %v619_v28 }
 0x21a   :  { %1510 = vmatprep.subr.bf16.mxu1 %v5224_v34  ;;  %v613_v34 = vmul.f32 0.15915494, %v612_v30 }
 0x21d   :  { %1511 = vmatpush1.bf16.msra.mxu1 %v5228_v36  ;;  %v621_v36 = vfloor.f32 %v620_v32 }
 0x21e   :  { %1512 = vmatprep.subr.bf16.mxu1 %v5230_v37  ;;  %v614_v37 = vfloor.f32 %v613_v34 }
 0x221   :  { %1513 = vmatpush1.bf16.msra.mxu1 %v5234_v38  ;;  %v622_v38 = vmul.f32 6.2831855, %v621_v36 }
 0x222   :  { %1514 = vmatprep.subr.bf16.mxu1 %v5236_v39  ;;  %v615_v39 = vmul.f32 6.2831855, %v614_v37 }
 0x225   :  { %1515 = vmatpush1.bf16.msra.mxu1 %v5240_v40  ;;  %v623_v40 = vsub.f32 %v618_v23, %v622_v38 }
 0x226   :  { %1516 = vmatprep.subr.bf16.mxu1 %v5242_v41  ;;  %v616_v41 = vsub.f32 %v611_v27, %v615_v39 }
 0x229   :  { %1517 = vmatpush1.bf16.msra.mxu1 %v5246_v42  ;;  %v624_v42 = vmul.f32 0.5, %v623_v40 }
 0x22a   :  { %1518 = vmatprep.subr.bf16.mxu1 %v5248_v43 }
 0x22b   :  { %v625_v43 = vadd.f32 %v624_v42, %v616_v41 }
 0x22d   :  { %1519 = vmatpush2.bf16.msra.mxu1 %v5252_v44  ;;  %v626_v44 = vmul.f32 0.8660254, %v623_v40 }
 0x22e   :  { %1520 = vmatprep.subr.bf16.mxu1 %v5254_v45  ;;  %v627_v45 = vmul.f32 %v625_v43, %v625_v43 }
 0x231   :  { %1521 = vmatpush2.bf16.msra.mxu1 %v5259_v46  ;;  %v628_v46 = vmul.f32 %v626_v44, %v626_v44  ;;  %v5485_v44 = vld [vmem:[#allocation7 + $0x70] ss:$8 sps:$4 sm:$0xff]  }
 0x232   :  { %1522 = vmatprep.subr.bf16.mxu1 %v5262_v47 }
 0x233   :  { %v629_v47 = vadd.f32 %v628_v46, %v627_v45  ;;  %v5487_v45 = vld [vmem:[#allocation7 + $0x74] ss:$8 sps:$4 sm:$0xff]   ;;  %v5489_v46 = vld [vmem:[#allocation7 + $0x64] ss:$8 sps:$4 sm:$0xff]  }
 0x234   :  { %1729 = vmatprep.subr.bf16.mxu0 %v5487_v45 }
 0x235   :  { %1523 = vmatpush2.bf16.msra.mxu1 %v5265_v48  ;;  %v630_v48 = vmul.f32 -0.25, %v629_v47  ;;  %1730 = vmatpush1.bf16.msra.mxu0 %v5485_v44  ;;  %v5494_v47 = vld [vmem:[#allocation7 + $0x60] ss:$8 sps:$4 sm:$0xff]  }
 0x236   :  { %1524 = vmatprep.subr.bf16.mxu1 %v5268_v49  ;;  %1731 = vmatprep.subr.bf16.mxu0 %v5489_v46 }
 0x237   :  { %v631_v49 = vmul.f32 0.40528473, %v630_v48  ;;  %v5498_v48 = vld [vmem:[#allocation7 + $0x54] ss:$8 sps:$4 sm:$0xff]  }
 0x239   :  { %1525 = vmatpush2.bf16.msra.mxu1 %v5271_v50  ;;  %v632_v50 = vmul.f32 1.442695, %v631_v49  ;;  %1732 = vmatpush1.bf16.msra.mxu0 %v5494_v47  ;;  %v5502_v49 = vld [vmem:[#allocation7 + $0x50] ss:$8 sps:$4 sm:$0xff]  }
 0x23a   :  { %1526 = vmatprep.subr.bf16.mxu1 %v5274_v51  ;;  %v562_v51 = vmul.f32 0.1, %v5386_v1  ;;  %1733 = vmatprep.subr.bf16.mxu0 %v5498_v48 }
 0x23b   :  { %4828 = vpow2.f32 %v632_v50  ;;  %v5506_v50 = vld [vmem:[#allocation7 + $0x44] ss:$8 sps:$4 sm:$0xff]  }
 0x23d   :  { %1527 = vmatpush2.bf16.msra.mxu1 %v5277_v52  ;;  %v789_v52 = vrot.slane %v782_v62, %v5378_v17  ;;  %1734 = vmatpush1.bf16.msra.mxu0 %v5502_v49 }
 0x23e   :  { %1528 = vmatprep.subr.bf16.mxu1 %v5280_v53  ;;  %1735 = vmatprep.subr.bf16.mxu0 %v5506_v50 }
 0x241   :  { %1529 = vmatpush2.bf16.msra.mxu1 %v5283_v54 }
 0x242   :  { %1530 = vmatprep.subr.bf16.mxu1 %v5286_v55  ;;  %v566_v55 = vsub.f32 %v5384_v0, %v562_v51 }
 0x244   :  { %v567_v24 = vmul.f32 0.9048374, %v566_v55  ;;  %v5526_v55 = vld [vmem:[#allocation7 + $0x20] ss:$8 sps:$4 sm:$0xff]  }
 0x245   :  { %1531 = vmatpush2.bf16.msra.mxu1 %v5292_v57 }
 0x246   :  { %1532 = vmatprep.subr.bf16.mxu1 %v5295_v58  ;;  %v796_v58 = vrot.slane %v789_v52, %v5378_v17  ;;  %v5458_v35 = vadd.f32 %v567_v24, %v562_v51  ;;  %v5510_v51 = vld [vmem:[#allocation7 + $0x40] ss:$8 sps:$4 sm:$0xff]   ;;  %v5514_v52 = vld [vmem:[#allocation7 + $0x34] ss:$8 sps:$4 sm:$0xff]  }
 0x247   :  { %1736 = vmatpush1.bf16.msra.mxu0 %v5510_v51  ;;  %v5549_v24 = vld [vmem:[#allocation6 + $0x74] ss:$8 sps:$4 sm:$0xff]  }
 0x248   :  { %v4829_v53 = vpop.eup %4828  ;;  %1737 = vmatprep.subr.bf16.mxu0 %v5514_v52 }
 0x249   :  { %1533 = vmatpush2.bf16.msra.mxu1 %v5299_v60  ;;  %v634_v60 = vmul.f32 10.0, %v4829_v53  ;;  %v5518_v53 = vld [vmem:[#allocation7 + $0x30] ss:$8 sps:$4 sm:$0xff]  }
 0x24a   :  { %2227 = vmatprep.subr.bf16.mxu1 %v5487_v45 }
 0x24b   :  { %v798_v1 = vadd.f32 %v796_v58, %v634_v60  ;;  %1738 = vmatpush1.bf16.msra.mxu0 %v5518_v53  ;;  %v5534_v58 = vld [vmem:[#allocation7 + $0x10] ss:$8 sps:$4 sm:$0xff]   ;;  %v5538_v60 = vld [vmem:[#allocation7 + $0x4] ss:$8 sps:$4 sm:$0xff]  }
 0x2cc   :  { %v1265_v14 = vpop.f32.mrf.mxu1 }
 0x2cd   :  { %v4296_v15 = vadd.f32 -0.1, %v1265_v14  ;;  %v5578_v14 = vld [vmem:[#allocation6 + $0x34] ss:$8 sps:$4 sm:$0xff]  }
 0x2ce   :  { %v1267_v16 = vpop.f32.mrf.mxu1 }
 0x2cf   :  { %v1274_v10 = vmax.f32 %v4296_v15, 0.0  ;;  %v4297_v18 = vadd.f32 -0.1, %v1267_v16 }
 0x2d0   :  { %v1038_v54 = vpop.f32.mrf.mxu0  ;;  %v1269_v22 = vpop.f32.mrf.mxu1 }
 0x2d1   :  { %v5470_v23 = vmul.f32 0.5, %v1274_v10  ;;  %v1275_v25 = vmax.f32 %v4297_v18, 0.0  ;;  %v5581_v10 = vld [vmem:[#allocation6 + $0x30] ss:$8 sps:$4 sm:$0xff]   ;;  %v5584_v18 = vld [vmem:[#allocation6 + $0x24] ss:$8 sps:$4 sm:$0xff]  }
 0x2d2   :  { %v1040_v57 = vpop.f32.mrf.mxu0  ;;  %v1270_v27 = vpop.f32.mrf.mxu1 }
 0x2d3   :  { %v1047_v19 = vcombine.low %v1038_v54, %v1040_v57  ;;  %v5472_v28 = vmul.f32 0.5, %v1275_v25  ;;  %v5522_v54 = vld [vmem:[#allocation7 + $0x24] ss:$8 sps:$4 sm:$0xff]   ;;  %v5530_v57 = vld [vmem:[#allocation7 + $0x14] ss:$8 sps:$4 sm:$0xff]  }
 0x2d4   :  { %v1042_v20 = vpop.f32.mrf.mxu0  ;;  %1739 = vmatprep.subr.bf16.mxu0 %v5522_v54  ;;  %v5587_v27 = vld [vmem:[#allocation6 + $0x20] ss:$8 sps:$4 sm:$0xff]  }
 0x2d5   :  { %v1054_v31 = vrot.slane %v1047_v19, %v5378_v17  ;;  %v1280_v30 = vcombine.low %v5470_v23, %v5472_v28  ;;  %1740 = vmatpush1.bf16.msra.mxu0 %v5526_v55  ;;  %v5542_v19 = vld [vmem:[#allocation7] ss:$8 sps:$4 sm:$0xff]  }
 0x2d6   :  { %v1043_v6 = vpop.f32.mrf.mxu0  ;;  %1741 = vmatprep.subr.bf16.mxu0 %v5530_v57  ;;  %v1631_v20 = vld [vmem:[%s6108_s7 + $0x3] sm:$0x1] }
 0x2d7   :  { %v1061_v9 = vrot.slane %v1054_v31, %v5378_v17  ;;  %v1632_v31 = vpack.c.bf16 %v1631_v20, %v1631_v20  ;;  %v5553_v6 = vld [vmem:[#allocation6 + $0x70] ss:$8 sps:$4 sm:$0xff]  }
 0x2d9   :  { %v1063_v33 = vadd.f32 %v1061_v9, %v798_v1  ;;  %1742 = vmatpush1.bf16.msra.mxu0 %v5534_v58  ;;  %v1115_v1 = vstv %s4279_s29  ;;  %v5557_v9 = vld [vmem:[#allocation6 + $0x64] ss:$8 sps:$4 sm:$0xff]  }
 0x2da   :  { %1743 = vmatprep.subr.bf16.mxu0 %v5538_v60 }
 0x2db   :  { %v1064_v59 = vsub.f32 %v1063_v33, %v5458_v35  ;;  %v1116_v33 = vsub.f32 %v1115_v1, %v5351_v3  ;;  %v5608_v1 = vld [vmem:[#allocation6 + $0xe4] ss:$8 sps:$4 sm:$0xff]  }
 0x2dd   :  { %v1066_v0 = vsub.f32 %v5390_v12, %v1064_v59  ;;  %1744 = vmatpush1.bf16.msra.mxu0 %v5542_v19 }
 0x2de   :  { %2000 = vmatprep.subr.bf16.mxu0 %v5549_v24 }
 0x2df   :  { %v1067_v61 = vmul.f32 0.36787945, %v1066_v0  ;;  %v1108_v0 = vstv %s4278_s15 }
 0x2e0   :  { %1762 = vmatmul.mubr.bf16.vlgmr.msra.gmra.mxu0 %v1632_v31  ;;  %v5605_v31 = vld [vmem:[#allocation6 + $0xf0] ss:$8 sps:$4 sm:$0xff]  }
 0x2e1   :  { %v1068_v62 = vadd.f32 %v1067_v61, %v1064_v59  ;;  %2001 = vmatpush1.bf16.msra.mxu0 %v5553_v6  ;;  %v5562_v59 = vld [vmem:[#allocation6 + $0x60] ss:$8 sps:$4 sm:$0xff]   ;;  %v5565_v61 = vld [vmem:[#allocation6 + $0x54] ss:$8 sps:$4 sm:$0xff]  }
 0x2e2   :  { %2002 = vmatprep.subr.bf16.mxu0 %v5557_v9 }
 0x2e3   :  { %v5462_v63 = vmax.f32 %v1068_v62, 0.0  ;;  %v1109_v62 = vsub.f32 %v1108_v0, %v5359_v7 }
 0x2e5   :  { %6137 = vst [vmem:[#allocation23_spill] sm:$0xff] %v5462_v63  ;;  %v1073_v26 = vmul.f32 %v5462_v63, %v5462_v63  ;;  %2003 = vmatpush1.bf16.msra.mxu0 %v5562_v59 }
 0x2e6   :  { %2004 = vmatprep.subr.bf16.mxu0 %v5565_v61 }
 0x2e7   :  { %v1078_v4 = vrot.slane %v1073_v26, %v5289_v56  ;;  %v1082_v5 = vrot.slane %v1073_v26, %v5215_v29 }
 0x2e9   :  { %v1085_v8 = vsel %vm582_vm1, %v1078_v4, 0.0  ;;  %v1086_v11 = vsel %vm582_vm1, %v1082_v5, 0.0  ;;  %v5569_v4 = vld [vmem:[#allocation6 + $0x50] ss:$8 sps:$4 sm:$0xff]   ;;  %v5572_v5 = vld [vmem:[#allocation6 + $0x44] ss:$8 sps:$4 sm:$0xff]  }
 0x2ea   :  { %v1087_v13 = vadd.f32 %v1086_v11, %v1085_v8  ;;  %v1110_v8 = vadd.f32 3.1415927, %v1109_v62  ;;  %2005 = vmatpush1.bf16.msra.mxu0 %v5569_v4 }
 0x2eb   :  { %2006 = vmatprep.subr.bf16.mxu0 %v5572_v5 }
 0x2ec   :  { %1088 = vadd.xlane.f32.xlu0 %v1087_v13  ;;  %v5575_v13 = vld [vmem:[#allocation6 + $0x40] ss:$8 sps:$4 sm:$0xff]   ;;  %v1111_v15 = vmul.f32 0.15915494, %v1110_v8 }
 0x2ee   :  { %2007 = vmatpush1.bf16.msra.mxu0 %v5575_v13  ;;  %v1112_v22 = vfloor.f32 %v1111_v15 }
 0x2ef   :  { %2008 = vmatprep.subr.bf16.mxu0 %v5578_v14 }
 0x2f2   :  { %2009 = vmatpush1.bf16.msra.mxu0 %v5581_v10 }
 0x2f3   :  { %2010 = vmatprep.subr.bf16.mxu0 %v5584_v18 }
 0x2f6   :  { %2011 = vmatpush1.bf16.msra.mxu0 %v5587_v27 }
 0x375   :  { %v1089_v32 = vpop.xlane.xlu0 %1088 }
 0x376   :  { %v1090_v34 = vmul.f32 0.078125, %v1089_v32  ;;  %v5590_v32 = vld [vmem:[#allocation6 + $0x14] ss:$8 sps:$4 sm:$0xff]  }
 0x377   :  { %2012 = vmatprep.subr.bf16.mxu0 %v5590_v32 }
 0x378   :  { %v1091_v36 = vadd.f32 1.0, %v1090_v34  ;;  %v1113_v34 = vmul.f32 6.2831855, %v1112_v22  ;;  %v1287_v22 = vrot.slane %v1280_v30, %v5378_v17 }
 0x37a   :  { %4830 = vrcp.f32 %v1091_v36 }
 0x387   :  { %v4831_v37 = vpop.eup %4830 }
 0x388   :  { %v1097_v38 = vrot.slane %v4831_v37, %v5289_v56  ;;  %v5593_v37 = vld [vmem:[#allocation6 + $0x10] ss:$8 sps:$4 sm:$0xff]  }
 0x389   :  { %2013 = vmatpush1.bf16.msra.mxu0 %v5593_v37 }
 0x38a   :  { %v1099_v39 = vmul.f32 %v1097_v38, %v1073_v26  ;;  %v1117_v26 = vadd.f32 3.1415927, %v1116_v33  ;;  %v5596_v38 = vld [vmem:[#allocation6 + $0x4] ss:$8 sps:$4 sm:$0xff]  }
 0x38b   :  { %2014 = vmatprep.subr.bf16.mxu0 %v5596_v38 }
 0x38c   :  { %4277 = vst.msk [vmem:[%s6110_s9 + $0x1] ss:$8 sm:$0x3] %vm5187_vm0, %v1099_v39  ;;  %v1305_v40 = vrot.slane %v1099_v39, %v5215_v29  ;;  %v1301_v41 = vrot.slane %v1099_v39, %v5289_v56  ;;  %v1118_v11 = vmul.f32 0.15915494, %v1117_v26  ;;  %v1114_v39 = vsub.f32 %v1109_v62, %v1113_v34 }
 0x38d   :  { %v5611_v62 = vld [vmem:[#allocation6 + $0xe0] ss:$8 sps:$4 sm:$0xff]  }
 0x38e   :  { %v1309_v42 = vpack.c.bf16 %v1305_v40, %v1305_v40  ;;  %v1308_v43 = vpack.c.bf16 %v1301_v41, %v1301_v41  ;;  %v1119_v16 = vfloor.f32 %v1118_v11  ;;  %v5599_v41 = vld [vmem:[#allocation6] ss:$8 sps:$4 sm:$0xff]  }
 0x38f   :  { %2015 = vmatpush1.bf16.msra.mxu0 %v5599_v41 }
 0x390   :  { %1534 = vmatprep.mubr.bf16.mxu1 %v1309_v42  ;;  %v1120_v25 = vmul.f32 6.2831855, %v1119_v16  ;;  %v5602_v42 = vld [vmem:[#allocation6 + $0xf4] ss:$8 sps:$4 sm:$0xff]   ;;  %v1065_v16 = vmul.f32 0.1, %v5390_v12 }
 0x391   :  { %1535 = vmatmul.mubr.bf16.vlgmr.msra.gmra.mxu1 %v1308_v43  ;;  %2016 = vmatprep.subr.bf16.mxu0 %v5602_v42 }
 0x392   :  { %2259 = vmatprep.mubr.bf16.mxu1 %v6116_v2  ;;  %2228 = vmatpush1.bf16.msra.mxu1 %v5485_v44  ;;  %v1121_v36 = vsub.f32 %v1116_v33, %v1120_v25 }
 0x393   :  { %2229 = vmatprep.subr.bf16.mxu1 %v5489_v46  ;;  %2017 = vmatpush2.bf16.msra.mxu0 %v5605_v31 }
 0x394   :  { %v1122_v40 = vmul.f32 0.5, %v1121_v36  ;;  %v1124_v20 = vmul.f32 0.8660254, %v1121_v36  ;;  %2018 = vmatprep.subr.bf16.mxu0 %v5608_v1  ;;  %v1069_v36 = vsub.f32 %v5458_v35, %v1065_v16 }
 0x396   :  { %2230 = vmatpush1.bf16.msra.mxu1 %v5494_v47  ;;  %v1123_v43 = vadd.f32 %v1122_v40, %v1114_v39  ;;  %v1126_v0 = vmul.f32 %v1124_v20, %v1124_v20  ;;  %v1294_v40 = vrot.slane %v1287_v22, %v5378_v17 }
 0x397   :  { %2231 = vmatprep.subr.bf16.mxu1 %v5498_v48  ;;  %2019 = vmatpush2.bf16.msra.mxu0 %v5611_v62 }
 0x398   :  { %v1125_v33 = vmul.f32 %v1123_v43, %v1123_v43 }
 0x39a   :  { %2232 = vmatpush1.bf16.msra.mxu1 %v5502_v49  ;;  %v1127_v26 = vadd.f32 %v1126_v0, %v1125_v33  ;;  %v1070_v0 = vmul.f32 0.9048374, %v1069_v36 }
 0x39b   :  { %2233 = vmatprep.subr.bf16.mxu1 %v5506_v50 }
 0x39c   :  { %v1128_v8 = vmul.f32 -0.25, %v1127_v26 }
 0x39e   :  { %2234 = vmatpush1.bf16.msra.mxu1 %v5510_v51  ;;  %v1129_v11 = vmul.f32 0.40528473, %v1128_v8 }
 0x39f   :  { %2235 = vmatprep.subr.bf16.mxu1 %v5514_v52 }
 0x3a0   :  { %v1130_v15 = vmul.f32 1.442695, %v1129_v11 }
 0x3a2   :  { %2236 = vmatpush1.bf16.msra.mxu1 %v5518_v53  ;;  %4832 = vpow2.f32 %v1130_v15  ;;  %v5624_v15 = vadd.f32 %v1070_v0, %v1065_v16  ;;  %v5646_v0 = vld [vmem:[#allocation6 + $0xb4] ss:$8 sps:$4 sm:$0xff]  }
 0x3a3   :  { %2237 = vmatprep.subr.bf16.mxu1 %v5522_v54 }
 0x3a4   :  { %6138 = vst [vmem:[#allocation24_spill] sm:$0xff] %v5624_v15 }
 0x3a6   :  { %2238 = vmatpush1.bf16.msra.mxu1 %v5526_v55 }
 0x3a7   :  { %2239 = vmatprep.subr.bf16.mxu1 %v5530_v57 }
 0x3aa   :  { %2240 = vmatpush1.bf16.msra.mxu1 %v5534_v58 }
 0x3ab   :  { %2241 = vmatprep.subr.bf16.mxu1 %v5538_v60 }
 0x3ae   :  { %2242 = vmatpush1.bf16.msra.mxu1 %v5542_v19 }
 0x3af   :  { %2498 = vmatprep.subr.bf16.mxu1 %v5549_v24  ;;  %v4833_v25 = vpop.eup %4832 }
 0x3b0   :  { %v1132_v43 = vmul.f32 10.0, %v4833_v25 }
 0x3b2   :  { %v1296_v12 = vadd.f32 %v1294_v40, %v1132_v43  ;;  %v5636_v43 = vld [vmem:[#allocation6 + $0xd4] ss:$8 sps:$4 sm:$0xff]  }
 0x3b3   :  { %2020 = vmatprep.subr.bf16.mxu0 %v5636_v43 }
 0x451   :  { %v1536_v34 = vpop.f32.mrf.mxu1 }
 0x453   :  { %v1538_v39 = vpop.f32.mrf.mxu1 }
 0x454   :  { %v1545_v20 = vcombine.low %v1536_v34, %v1538_v39 }
 0x455   :  { %v1540_v33 = vpop.f32.mrf.mxu1 }
 0x456   :  { %v1552_v26 = vrot.slane %v1545_v20, %v5378_v17  ;;  %v5638_v20 = vld [vmem:[#allocation6 + $0xd0] ss:$8 sps:$4 sm:$0xff]   ;;  %v5644_v33 = vld [vmem:[#allocation6 + $0xc4] ss:$8 sps:$4 sm:$0xff]  }
 0x457   :  { %v1541_v8 = vpop.f32.mrf.mxu1  ;;  %2021 = vmatpush2.bf16.msra.mxu0 %v5638_v20 }
 0x458   :  { %v1559_v11 = vrot.slane %v1552_v26, %v5378_v17  ;;  %2022 = vmatprep.subr.bf16.mxu0 %v5644_v33  ;;  %v5650_v26 = vld [vmem:[#allocation6 + $0xb0] ss:$8 sps:$4 sm:$0xff]   ;;  %v5653_v8 = vld [vmem:[#allocation6 + $0xa4] ss:$8 sps:$4 sm:$0xff]  }
 0x45a   :  { %v1561_v23 = vadd.f32 %v1559_v11, %v1296_v12  ;;  %v5656_v12 = vld [vmem:[#allocation6 + $0xa0] ss:$8 sps:$4 sm:$0xff]   ;;  %v5659_v11 = vld [vmem:[#allocation6 + $0x94] ss:$8 sps:$4 sm:$0xff]  }
 0x45b   :  { %6140 = vst [vmem:[#allocation26_spill] sm:$0xff] %v5656_v12  ;;  %6141 = vst [vmem:[#allocation27_spill] sm:$0xff] %v5659_v11 }
 0x45c   :  { %v1562_v28 = vsub.f32 %v1561_v23, %v5624_v15  ;;  %v5662_v23 = vld [vmem:[#allocation6 + $0x90] ss:$8 sps:$4 sm:$0xff]  }
 0x45d   :  { %6142 = vst [vmem:[#allocation28_spill] sm:$0xff] %v5662_v23 }
 0x45e   :  { %v1564_v35 = vsub.f32 %v5462_v63, %v1562_v28 }
 0x460   :  { %v1565_v30 = vmul.f32 0.36787945, %v1564_v35  ;;  %v5668_v35 = vld [vmem:[#allocation6 + $0x80] ss:$8 sps:$4 sm:$0xff]  }
 0x461   :  { %6144 = vst [vmem:[#allocation30_spill] sm:$0xff] %v5668_v35 }
 0x462   :  { %v1566_v2 = vadd.f32 %v1565_v30, %v1562_v28  ;;  %v5665_v28 = vld [vmem:[#allocation6 + $0x84] ss:$8 sps:$4 sm:$0xff]   ;;  %v1763_v30 = vpop.f32.mrf.mxu0 }
 0x463   :  { %6143 = vst [vmem:[#allocation29_spill] sm:$0xff] %v5665_v28 }
 0x464   :  { %v5628_v22 = vmax.f32 %v1566_v2, 0.0  ;;  %v5642_v2 = vld [vmem:[#allocation6 + $0xc0] ss:$8 sps:$4 sm:$0xff]  }
 0x465   :  { %2023 = vmatpush2.bf16.msra.mxu0 %v5642_v2 }
 0x466   :  { %6139 = vst [vmem:[#allocation25_spill] sm:$0xff] %v5628_v22  ;;  %v1571_v25 = vmul.f32 %v5628_v22, %v5628_v22  ;;  %2024 = vmatprep.subr.bf16.mxu0 %v5646_v0 }
 0x468   :  { %v1576_v34 = vrot.slane %v1571_v25, %v5289_v56  ;;  %v1580_v36 = vrot.slane %v1571_v25, %v5215_v29 }
 0x469   :  { %2025 = vmatpush2.bf16.msra.mxu0 %v5650_v26 }
 0x46a   :  { %v1583_v39 = vsel %vm582_vm1, %v1576_v34, 0.0  ;;  %v1584_v16 = vsel %vm582_vm1, %v1580_v36, 0.0  ;;  %2026 = vmatprep.subr.bf16.mxu0 %v5653_v8  ;;  %v4349_v34 = vadd.f32 -0.1, %v1763_v30  ;;  %v1765_v36 = vpop.f32.mrf.mxu0 }
 0x46b   :  { %v1585_v40 = vadd.f32 %v1584_v16, %v1583_v39  ;;  %v4350_v16 = vadd.f32 -0.1, %v1765_v36 }
 0x46c   :  { %v1772_v39 = vmax.f32 %v4349_v34, 0.0 }
 0x46d   :  { %1586 = vadd.xlane.f32.xlu1 %v1585_v40  ;;  %2027 = vmatpush2.bf16.msra.mxu0 %v5656_v12  ;;  %v1767_v40 = vpop.f32.mrf.mxu0  ;;  %v1773_v15 = vmax.f32 %v4350_v16, 0.0  ;;  %v6150_v16 = vld [vmem:[#allocation30_spill] sm:$0xff] }
 0x46e   :  { %2028 = vmatprep.subr.bf16.mxu0 %v5659_v11  ;;  %v5673_v22 = vmul.f32 0.5, %v1772_v39 }
 0x46f   :  { %v1768_v17 = vpop.f32.mrf.mxu0  ;;  %v5675_v63 = vmul.f32 0.5, %v1773_v15 }
 0x471   :  { %2029 = vmatpush2.bf16.msra.mxu0 %v5662_v23  ;;  %v1778_v23 = vcombine.low %v5673_v22, %v5675_v63 }
 0x472   :  { %2030 = vmatprep.subr.bf16.mxu0 %v5665_v28 }
 0x475   :  { %2031 = vmatpush2.bf16.msra.mxu0 %v5668_v35 }
 0x476   :  { %2725 = vmatprep.subr.bf16.mxu0 %v5487_v45 }
 0x4f6   :  { %v1587_v28 = vpop.xlane.xlu1 %1586 }
 0x4f7   :  { %v1588_v11 = vmul.f32 0.078125, %v1587_v28  ;;  %v6149_v28 = vld [vmem:[#allocation29_spill] sm:$0xff] }
 0x4f9   :  { %v1589_v35 = vadd.f32 1.0, %v1588_v11  ;;  %v6145_v11 = vmov 0  }
 0x4fb   :  { %4834 = vrcp.f32 %v1589_v35 }
 0x508   :  { %v4835_v45 = vpop.eup %4834 }
 0x509   :  { %v1595_v30 = vrot.slane %v4835_v45, %v5289_v56 }
 0x50b   :  { %v1597_v12 = vmul.f32 %v1595_v30, %v1571_v25 }
 0x50d   :  { %4330 = vst.msk [vmem:[%s6110_s9 + $0x2] ss:$8 sm:$0x3] %vm5187_vm0, %v1597_v12  ;;  %v1803_v17 = vrot.slane %v1597_v12, %v5215_v29  ;;  %v1799_v15 = vrot.slane %v1597_v12, %v5289_v56  ;;  %v6148_v12 = vld [vmem:[#allocation28_spill] sm:$0xff] }
 0x50f   :  { %v1807_v34 = vpack.c.bf16 %v1803_v17, %v1803_v17  ;;  %v1806_v36 = vpack.c.bf16 %v1799_v15, %v1799_v15 }
 0x511   :  { %2032 = vmatprep.mubr.bf16.mxu0 %v1807_v34 }
 0x512   :  { %2033 = vmatmul.mubr.bf16.vlgmr.msra.gmra.mxu0 %v1806_v36  ;;  %v6151_v36 = vld [vmem:[#allocation23_spill] sm:$0xff] }
 0x513   :  { %2726 = vmatpush1.bf16.msra.mxu0 %v5485_v44  ;;  %2757 = vmatprep.mubr.bf16.mxu0 %v6145_v11  ;;  %v2129_v44 = vld [vmem:[%s6108_s7 + $0x4] sm:$0x1] }
 0x514   :  { %2727 = vmatprep.subr.bf16.mxu0 %v5489_v46  ;;  %v2130_v46 = vpack.c.bf16 %v2129_v44, %v2129_v44  ;;  %v1563_v44 = vmul.f32 0.1, %v6151_v36 }
 0x516   :  { %2260 = vmatmul.mubr.bf16.vlgmr.msra.gmra.mxu1 %v2130_v46  ;;  %v6152_v46 = vld [vmem:[#allocation22_spill] sm:$0xff] }
 0x517   :  { %2728 = vmatpush1.bf16.msra.mxu0 %v5494_v47  ;;  %2499 = vmatpush1.bf16.msra.mxu1 %v5553_v6  ;;  %v1613_v47 = vstv %s4332_s4  ;;  %s4543_s4 = sld [smem:[#allocation2 + $0xe]] }
 0x518   :  { %2729 = vmatprep.subr.bf16.mxu0 %v5498_v48  ;;  %2500 = vmatprep.subr.bf16.mxu1 %v5557_v9  ;;  %v1614_v48 = vsub.f32 %v1613_v47, %v5351_v3  ;;  %v1785_v47 = vrot.slane %v1778_v23, %v6152_v46  ;;  %v6154_v23 = vld [vmem:[#allocation25_spill] sm:$0xff] }
 0x51b   :  { %2730 = vmatpush1.bf16.msra.mxu0 %v5502_v49  ;;  %2501 = vmatpush1.bf16.msra.mxu1 %v5562_v59  ;;  %v1606_v49 = vstv %s4331_s5 }
 0x51c   :  { %2731 = vmatprep.subr.bf16.mxu0 %v5506_v50  ;;  %2502 = vmatprep.subr.bf16.mxu1 %v5565_v61  ;;  %v1607_v50 = vsub.f32 %v1606_v49, %v5359_v7 }
 0x51f   :  { %2732 = vmatpush1.bf16.msra.mxu0 %v5510_v51  ;;  %2503 = vmatpush1.bf16.msra.mxu1 %v5569_v4  ;;  %v1615_v51 = vadd.f32 3.1415927, %v1614_v48 }
 0x520   :  { %2733 = vmatprep.subr.bf16.mxu0 %v5514_v52  ;;  %2504 = vmatprep.subr.bf16.mxu1 %v5572_v5  ;;  %v1608_v52 = vadd.f32 3.1415927, %v1607_v50 }
 0x523   :  { %2734 = vmatpush1.bf16.msra.mxu0 %v5518_v53  ;;  %2505 = vmatpush1.bf16.msra.mxu1 %v5575_v13  ;;  %v1616_v53 = vmul.f32 0.15915494, %v1615_v51 }
 0x524   :  { %2735 = vmatprep.subr.bf16.mxu0 %v5522_v54  ;;  %2506 = vmatprep.subr.bf16.mxu1 %v5578_v14  ;;  %v1609_v54 = vmul.f32 0.15915494, %v1608_v52 }
 0x525   :  { %v1617_v3 = vfloor.f32 %v1616_v53  ;;  %v1792_v53 = vrot.slane %v1785_v47, %v6152_v46 }
 0x527   :  { %2736 = vmatpush1.bf16.msra.mxu0 %v5526_v55  ;;  %2507 = vmatpush1.bf16.msra.mxu1 %v5581_v10  ;;  %v1610_v55 = vfloor.f32 %v1609_v54 }
 0x528   :  { %2737 = vmatprep.subr.bf16.mxu0 %v5530_v57  ;;  %2508 = vmatprep.subr.bf16.mxu1 %v5584_v18  ;;  %v1618_v57 = vmul.f32 6.2831855, %v1617_v3 }
 0x529   :  { %v1611_v7 = vmul.f32 6.2831855, %v1610_v55 }
 0x52b   :  { %2738 = vmatpush1.bf16.msra.mxu0 %v5534_v58  ;;  %2509 = vmatpush1.bf16.msra.mxu1 %v5587_v27  ;;  %v1619_v58 = vsub.f32 %v1614_v48, %v1618_v57 }
 0x52c   :  { %2739 = vmatprep.subr.bf16.mxu0 %v5538_v60  ;;  %2510 = vmatprep.subr.bf16.mxu1 %v5590_v32  ;;  %v6146_v60 = vld [vmem:[#allocation26_spill] sm:$0xff] }
 0x52d   :  { %v1620_v25 = vmul.f32 0.5, %v1619_v58  ;;  %v1622_v39 = vmul.f32 0.8660254, %v1619_v58 }
 0x52f   :  { %2740 = vmatpush1.bf16.msra.mxu0 %v5542_v19  ;;  %2511 = vmatpush1.bf16.msra.mxu1 %v5593_v37  ;;  %v6147_v19 = vld [vmem:[#allocation27_spill] sm:$0xff]  ;;  %v1624_v45 = vmul.f32 %v1622_v39, %v1622_v39 }
 0x530   :  { %2996 = vmatprep.subr.bf16.mxu0 %v5549_v24  ;;  %2512 = vmatprep.subr.bf16.mxu1 %v5596_v38  ;;  %v1612_v24 = vsub.f32 %v1607_v50, %v1611_v7  ;;  %v6153_v50 = vld [vmem:[#allocation24_spill] sm:$0xff] }
 0x531   :  { %v1567_v51 = vsub.f32 %v6153_v50, %v1563_v44 }
 0x532   :  { %v1621_v35 = vadd.f32 %v1620_v25, %v1612_v24 }
 0x533   :  { %2513 = vmatpush1.bf16.msra.mxu1 %v5599_v41  ;;  %v1568_v57 = vmul.f32 0.9048374, %v1567_v51 }
 0x534   :  { %2514 = vmatprep.subr.bf16.mxu1 %v5602_v42  ;;  %v1623_v40 = vmul.f32 %v1621_v35, %v1621_v35 }
 0x535   :  { %v5749_v35 = vadd.f32 %v1568_v57, %v1563_v44 }
 0x536   :  { %v1625_v30 = vadd.f32 %v1624_v45, %v1623_v40 }
 0x537   :  { %2515 = vmatpush2.bf16.msra.mxu1 %v5605_v31 }
 0x538   :  { %2516 = vmatprep.subr.bf16.mxu1 %v5608_v1  ;;  %v1626_v17 = vmul.f32 -0.25, %v1625_v30 }
 0x53a   :  { %v1627_v15 = vmul.f32 0.40528473, %v1626_v17 }
 0x53b   :  { %2517 = vmatpush2.bf16.msra.mxu1 %v5611_v62 }
 0x53c   :  { %2518 = vmatprep.subr.bf16.mxu1 %v5636_v43  ;;  %v1628_v34 = vmul.f32 1.442695, %v1627_v15 }
 0x53e   :  { %4836 = vpow2.f32 %v1628_v34 }
 0x53f   :  { %2519 = vmatpush2.bf16.msra.mxu1 %v5638_v20 }
 0x540   :  { %2520 = vmatprep.subr.bf16.mxu1 %v5644_v33 }
 0x543   :  { %2521 = vmatpush2.bf16.msra.mxu1 %v5642_v2 }
 0x544   :  { %2522 = vmatprep.subr.bf16.mxu1 %v5646_v0 }
 0x547   :  { %2523 = vmatpush2.bf16.msra.mxu1 %v5650_v26 }
 0x548   :  { %2524 = vmatprep.subr.bf16.mxu1 %v5653_v8 }
 0x54b   :  { %2525 = vmatpush2.bf16.msra.mxu1 %v6146_v60  ;;  %v4837_v48 = vpop.eup %4836 }
 0x54c   :  { %2526 = vmatprep.subr.bf16.mxu1 %v6147_v19  ;;  %v1630_v54 = vmul.f32 10.0, %v4837_v48 }
 0x54e   :  { %v1794_v24 = vadd.f32 %v1792_v53, %v1630_v54 }
 0x54f   :  { %2527 = vmatpush2.bf16.msra.mxu1 %v6148_v12 }
 0x550   :  { %2528 = vmatprep.subr.bf16.mxu1 %v6149_v28 }
 0x553   :  { %2529 = vmatpush2.bf16.msra.mxu1 %v6150_v16 }
 0x5d2   :  { %v2034_v49 = vpop.f32.mrf.mxu0 }
 0x5d4   :  { %v2036_v52 = vpop.f32.mrf.mxu0 }
 0x5d5   :  { %v2043_v3 = vcombine.low %v2034_v49, %v2036_v52 }
 0x5d6   :  { %v2038_v55 = vpop.f32.mrf.mxu0  ;;  %v2261_v48 = vpop.f32.mrf.mxu1 }
 0x5d7   :  { %v2050_v7 = vrot.slane %v2043_v3, %v6152_v46  ;;  %v4402_v49 = vadd.f32 -0.1, %v2261_v48 }
 0x5d8   :  { %v2039_v58 = vpop.f32.mrf.mxu0  ;;  %v2263_v50 = vpop.f32.mrf.mxu1 }
 0x5d9   :  { %v2057_v25 = vrot.slane %v2050_v7, %v6152_v46  ;;  %v2270_v51 = vmax.f32 %v4402_v49, 0.0  ;;  %v4403_v52 = vadd.f32 -0.1, %v2263_v50 }
 0x5da   :  { %v2265_v53 = vpop.f32.mrf.mxu1 }
 0x5db   :  { %v2059_v63 = vadd.f32 %v2057_v25, %v1794_v24  ;;  %v5761_v54 = vmul.f32 0.5, %v2270_v51  ;;  %v2271_v3 = vmax.f32 %v4403_v52, 0.0 }
 0x5dc   :  { %v2266_v55 = vpop.f32.mrf.mxu1 }
 0x5dd   :  { %v2060_v22 = vsub.f32 %v2059_v63, %v5749_v35  ;;  %v5763_v57 = vmul.f32 0.5, %v2271_v3 }
 0x5df   :  { %v2062_v39 = vsub.f32 %v6154_v23, %v2060_v22  ;;  %v2276_v7 = vcombine.low %v5761_v54, %v5763_v57 }
 0x5e1   :  { %v2063_v40 = vmul.f32 0.36787945, %v2062_v39 }
 0x5e3   :  { %v2064_v45 = vadd.f32 %v2063_v40, %v2060_v22 }
 0x5e5   :  { %v5753_v30 = vmax.f32 %v2064_v45, 0.0 }
 0x5e7   :  { %v2069_v17 = vmul.f32 %v5753_v30, %v5753_v30 }
 0x5e9   :  { %v2074_v15 = vrot.slane %v2069_v17, %v5289_v56  ;;  %v2078_v34 = vrot.slane %v2069_v17, %v5215_v29 }
 0x5eb   :  { %v2081_v36 = vsel %vm582_vm1, %v2074_v15, 0.0  ;;  %v2082_v44 = vsel %vm582_vm1, %v2078_v34, 0.0 }
 0x5ec   :  { %v2083_v47 = vadd.f32 %v2082_v44, %v2081_v36 }
 0x5ee   :  { %2084 = vadd.xlane.f32.xlu1 %v2083_v47 }
 0x677   :  { %v2085_v58 = vpop.xlane.xlu1 %2084 }
 0x678   :  { %v2086_v24 = vmul.f32 0.078125, %v2085_v58 }
 0x67a   :  { %v2087_v25 = vadd.f32 1.0, %v2086_v24 }
 0x67c   :  { %4838 = vrcp.f32 %v2087_v25 }
 0x689   :  { %v4839_v63 = vpop.eup %4838 }
 0x68a   :  { %v2093_v22 = vrot.slane %v4839_v63, %v5289_v56 }
 0x68c   :  { %v2095_v39 = vmul.f32 %v2093_v22, %v2069_v17  ;;  %v2627_v17 = vld [vmem:[%s6108_s7 + $0x5] sm:$0x1] }
 0x68d   :  { %v2628_v36 = vpack.c.bf16 %v2627_v17, %v2627_v17 }
 0x68e   :  { %4383 = vst.msk [vmem:[%s6110_s9 + $0x3] ss:$8 sm:$0x3] %vm5187_vm0, %v2095_v39  ;;  %v2301_v40 = vrot.slane %v2095_v39, %v5215_v29  ;;  %v2297_v45 = vrot.slane %v2095_v39, %v5289_v56 }
 0x68f   :  { %2758 = vmatmul.mubr.bf16.vlgmr.msra.gmra.mxu0 %v2628_v36 }
 0x690   :  { %v2305_v15 = vpack.c.bf16 %v2301_v40, %v2301_v40  ;;  %v2304_v34 = vpack.c.bf16 %v2297_v45, %v2297_v45  ;;  %2997 = vmatpush1.bf16.msra.mxu0 %v5553_v6  ;;  %v2111_v6 = vstv %s4385_s23  ;;  %s4137_s23 = sshll.u32 %s5030_s22, 4  ;;  %s4138_s23 = int_to_ptr.vmem [resolvable:$true] %s4137_s23 }
 0x691   :  { %2998 = vmatprep.subr.bf16.mxu0 %v5557_v9  ;;  %v5798_v9 = vld [vmem:[%s6103_s2] sm:$0x3] }
 0x692   :  { %2530 = vmatprep.mubr.bf16.mxu1 %v2305_v15 }
 0x693   :  { %2531 = vmatmul.mubr.bf16.vlgmr.msra.gmra.mxu1 %v2304_v34 }
 0x694   :  { %3255 = vmatprep.mubr.bf16.mxu1 %v6145_v11  ;;  %2999 = vmatpush1.bf16.msra.mxu0 %v5562_v59  ;;  %v2112_v59 = vsub.f32 %v2111_v6, %v5798_v9 }
 0x695   :  { %3000 = vmatprep.subr.bf16.mxu0 %v5565_v61  ;;  %v2104_v61 = vstv %s4384_s24  ;;  %s4910_s24 = scalar_lea.vmem %s4118_s21, 32 }
 0x696   :  { %p4911_p1 = scmp.ne.s32.totalorder %s4118_s21, %s4910_s24  ;;  %p4916_p3 = scmp.lt.s32.totalorder %s4910_s24, %s4910_s24 }
 0x698   :  { %3001 = vmatpush1.bf16.msra.mxu0 %v5569_v4  ;;  %v5806_v4 = vld [vmem:[%s6102_s1] sm:$0x3]  ;;  %p4917_p4 = por %p4916_p3, %p4915_p2 }
 0x699   :  { %3002 = vmatprep.subr.bf16.mxu0 %v5572_v5  ;;  %v2105_v5 = vsub.f32 %v2104_v61, %v5806_v4 }
 0x69a   :  { %p4918_p5 = pnand %p4917_p4, %p4911_p1 }
 0x69c   :  { %3003 = vmatpush1.bf16.msra.mxu0 %v5575_v13  ;;  %v2113_v13 = vadd.f32 3.1415927, %v2112_v59 }
 0x69d   :  { %3004 = vmatprep.subr.bf16.mxu0 %v5578_v14  ;;  %v2106_v14 = vadd.f32 3.1415927, %v2105_v5 }
 0x6a0   :  { %3005 = vmatpush1.bf16.msra.mxu0 %v5581_v10  ;;  %v2114_v10 = vmul.f32 0.15915494, %v2113_v13 }
 0x6a1   :  { %3006 = vmatprep.subr.bf16.mxu0 %v5584_v18  ;;  %v2107_v18 = vmul.f32 0.15915494, %v2106_v14 }
 0x6a4   :  { %3007 = vmatpush1.bf16.msra.mxu0 %v5587_v27  ;;  %v2115_v27 = vfloor.f32 %v2114_v10 }
 0x6a5   :  { %3008 = vmatprep.subr.bf16.mxu0 %v5590_v32  ;;  %v2108_v32 = vfloor.f32 %v2107_v18 }
 0x6a8   :  { %3009 = vmatpush1.bf16.msra.mxu0 %v5593_v37  ;;  %v2116_v37 = vmul.f32 6.2831855, %v2115_v27 }
 0x6a9   :  { %3010 = vmatprep.subr.bf16.mxu0 %v5596_v38  ;;  %v2109_v38 = vmul.f32 6.2831855, %v2108_v32 }
 0x6ac   :  { %3011 = vmatpush1.bf16.msra.mxu0 %v5599_v41  ;;  %v2117_v41 = vsub.f32 %v2112_v59, %v2116_v37 }
 0x6ad   :  { %3012 = vmatprep.subr.bf16.mxu0 %v5602_v42  ;;  %v2110_v42 = vsub.f32 %v2105_v5, %v2109_v38 }
 0x6b0   :  { %3013 = vmatpush2.bf16.msra.mxu0 %v5605_v31  ;;  %v2118_v31 = vmul.f32 0.5, %v2117_v41 }
 0x6b1   :  { %3014 = vmatprep.subr.bf16.mxu0 %v5608_v1 }
 0x6b2   :  { %v2119_v1 = vadd.f32 %v2118_v31, %v2110_v42 }
 0x6b4   :  { %3015 = vmatpush2.bf16.msra.mxu0 %v5611_v62  ;;  %v2120_v62 = vmul.f32 0.8660254, %v2117_v41 }
 0x6b5   :  { %3016 = vmatprep.subr.bf16.mxu0 %v5636_v43  ;;  %v2121_v43 = vmul.f32 %v2119_v1, %v2119_v1 }
 0x6b8   :  { %3017 = vmatpush2.bf16.msra.mxu0 %v5638_v20  ;;  %v2122_v20 = vmul.f32 %v2120_v62, %v2120_v62  ;;  %v4752_v62 = vld [vmem:[#allocation7 + $0x70] ss:$8 sps:$4 sm:$0xff]  }
 0x6b9   :  { %3018 = vmatprep.subr.bf16.mxu0 %v5644_v33 }
 0x6bc   :  { %3019 = vmatpush2.bf16.msra.mxu0 %v5642_v2  ;;  %v2123_v2 = vadd.f32 %v2122_v20, %v2121_v43  ;;  %v4754_v43 = vld [vmem:[#allocation7 + $0x74] ss:$8 sps:$4 sm:$0xff]   ;;  %v4757_v20 = vld [vmem:[#allocation7 + $0x64] ss:$8 sps:$4 sm:$0xff]  }
 0x6bd   :  { %3020 = vmatprep.subr.bf16.mxu0 %v5646_v0  ;;  %3223 = vmatprep.subr.bf16.mxu1 %v4754_v43 }
 0x6be   :  { %v2124_v33 = vmul.f32 -0.25, %v2123_v2  ;;  %3224 = vmatpush1.bf16.msra.mxu1 %v4752_v62  ;;  %v4755_v2 = vld [vmem:[#allocation7 + $0x60] ss:$8 sps:$4 sm:$0xff]  }
 0x6bf   :  { %3225 = vmatprep.subr.bf16.mxu1 %v4757_v20 }
 0x6c0   :  { %3021 = vmatpush2.bf16.msra.mxu0 %v5650_v26  ;;  %v2125_v0 = vmul.f32 0.40528473, %v2124_v33  ;;  %v4760_v33 = vld [vmem:[#allocation7 + $0x54] ss:$8 sps:$4 sm:$0xff]  }
 0x6c1   :  { %3022 = vmatprep.subr.bf16.mxu0 %v5653_v8  ;;  %v2061_v8 = vmul.f32 0.1, %v6154_v23 }
 0x6c2   :  { %v2126_v26 = vmul.f32 1.442695, %v2125_v0  ;;  %3226 = vmatpush1.bf16.msra.mxu1 %v4755_v2  ;;  %v4758_v0 = vld [vmem:[#allocation7 + $0x50] ss:$8 sps:$4 sm:$0xff]  }
 0x6c3   :  { %3227 = vmatprep.subr.bf16.mxu1 %v4760_v33 }
 0x6c4   :  { %3023 = vmatpush2.bf16.msra.mxu0 %v6146_v60  ;;  %4840 = vpow2.f32 %v2126_v26  ;;  %v2283_v60 = vrot.slane %v2276_v7, %v6152_v46  ;;  %v4763_v26 = vld [vmem:[#allocation7 + $0x44] ss:$8 sps:$4 sm:$0xff]  }
 0x6c5   :  { %3024 = vmatprep.subr.bf16.mxu0 %v6147_v19 }
 0x6c6   :  { %3228 = vmatpush1.bf16.msra.mxu1 %v4758_v0 }
 0x6c7   :  { %3229 = vmatprep.subr.bf16.mxu1 %v4763_v26 }
 0x6c8   :  { %3025 = vmatpush2.bf16.msra.mxu0 %v6148_v12 }
 0x6c9   :  { %3026 = vmatprep.subr.bf16.mxu0 %v6149_v28  ;;  %v2065_v28 = vsub.f32 %v5749_v35, %v2061_v8 }
 0x6cb   :  { %v2066_v50 = vmul.f32 0.9048374, %v2065_v28  ;;  %v4772_v28 = vld [vmem:[#allocation7 + $0x14] ss:$8 sps:$4 sm:$0xff]  }
 0x6cc   :  { %3027 = vmatpush2.bf16.msra.mxu0 %v6150_v16  ;;  %v2290_v16 = vrot.slane %v2283_v60, %v6152_v46  ;;  %v4764_v60 = vld [vmem:[#allocation7 + $0x30] ss:$8 sps:$4 sm:$0xff]  }
 0x6cd   :  { %v5831_v3 = vadd.f32 %v2066_v50, %v2061_v8  ;;  %3721 = vmatprep.subr.bf16.mxu0 %v4754_v43  ;;  %v4761_v8 = vld [vmem:[#allocation7 + $0x40] ss:$8 sps:$4 sm:$0xff]   ;;  %v5913_v43 = vld [vmem:[#allocation6 + $0xe4] ss:$8 sps:$4 sm:$0xff]  }
 0x6ce   :  { %3230 = vmatpush1.bf16.msra.mxu1 %v4761_v8 }
 0x6d1   :  { %v4841_v19 = vpop.eup %4840 }
 0x6d2   :  { %v2128_v47 = vmul.f32 10.0, %v4841_v19  ;;  %v4769_v19 = vld [vmem:[#allocation7 + $0x24] ss:$8 sps:$4 sm:$0xff]  }
 0x6d4   :  { %v2292_v23 = vadd.f32 %v2290_v16, %v2128_v47  ;;  %v4775_v16 = vld [vmem:[#allocation7 + $0x4] ss:$8 sps:$4 sm:$0xff]   ;;  %v4773_v47 = vld [vmem:[#allocation7] ss:$8 sps:$4 sm:$0xff]  }
 0x74f   :  { %v2759_v45 = vpop.f32.mrf.mxu0 }
 0x750   :  { %v4455_v15 = vadd.f32 -0.1, %v2759_v45 }
 0x751   :  { %v2761_v34 = vpop.f32.mrf.mxu0 }
 0x752   :  { %v2768_v17 = vmax.f32 %v4455_v15, 0.0  ;;  %v4456_v36 = vadd.f32 -0.1, %v2761_v34  ;;  %v5886_v34 = vld [vmem:[#allocation6 + $0x30] ss:$8 sps:$4 sm:$0xff]  }
 0x753   :  { %v2532_v12 = vpop.f32.mrf.mxu1  ;;  %v2763_v6 = vpop.f32.mrf.mxu0 }
 0x754   :  { %v5843_v59 = vmul.f32 0.5, %v2768_v17  ;;  %v2769_v61 = vmax.f32 %v4456_v36, 0.0  ;;  %v5889_v17 = vld [vmem:[#allocation6 + $0x24] ss:$8 sps:$4 sm:$0xff]  }
 0x755   :  { %v2534_v44 = vpop.f32.mrf.mxu1  ;;  %v2764_v5 = vpop.f32.mrf.mxu0 }
 0x756   :  { %v2541_v48 = vcombine.low %v2532_v12, %v2534_v44  ;;  %v5845_v13 = vmul.f32 0.5, %v2769_v61  ;;  %v4767_v12 = vld [vmem:[#allocation7 + $0x20] ss:$8 sps:$4 sm:$0xff]   ;;  %v4770_v44 = vld [vmem:[#allocation7 + $0x10] ss:$8 sps:$4 sm:$0xff]  }
 0x757   :  { %v2536_v49 = vpop.f32.mrf.mxu1  ;;  %v5892_v61 = vld [vmem:[#allocation6 + $0x20] ss:$8 sps:$4 sm:$0xff]   ;;  %v5895_v5 = vld [vmem:[#allocation6 + $0x14] ss:$8 sps:$4 sm:$0xff]  }
 0x758   :  { %v2548_v51 = vrot.slane %v2541_v48, %v6152_v46  ;;  %v2774_v14 = vcombine.low %v5843_v59, %v5845_v13  ;;  %v3125_v48 = vld [vmem:[%s6108_s7 + $0x6] sm:$0x1]  ;;  %v4778_v49 = vld [vmem:[#allocation6 + $0x74] ss:$8 sps:$4 sm:$0xff]  }
 0x759   :  { %v2537_v52 = vpop.f32.mrf.mxu1  ;;  %v3126_v50 = vpack.c.bf16 %v3125_v48, %v3125_v48 }
 0x75a   :  { %v2555_v53 = vrot.slane %v2548_v51, %v6152_v46  ;;  %v5861_v51 = vld [vmem:[#allocation6 + $0x70] ss:$8 sps:$4 sm:$0xff]   ;;  %v2609_v52 = vstv %s4438_s6 }
 0x75c   :  { %v2557_v54 = vadd.f32 %v2555_v53, %v2292_v23  ;;  %v5863_v23 = vld [vmem:[#allocation6 + $0x64] ss:$8 sps:$4 sm:$0xff]   ;;  %v2610_v53 = vsub.f32 %v2609_v52, %v5798_v9 }
 0x75e   :  { %v2558_v55 = vsub.f32 %v2557_v54, %v5831_v3  ;;  %v5867_v54 = vld [vmem:[#allocation6 + $0x60] ss:$8 sps:$4 sm:$0xff]  }
 0x760   :  { %v2560_v35 = vsub.f32 %v5753_v30, %v2558_v55 }
 0x762   :  { %v2561_v57 = vmul.f32 0.36787945, %v2560_v35  ;;  %v5870_v35 = vld [vmem:[#allocation6 + $0x54] ss:$8 sps:$4 sm:$0xff]  }
 0x764   :  { %v2562_v7 = vadd.f32 %v2561_v57, %v2558_v55  ;;  %v2602_v55 = vstv %s4437_s30 }
 0x765   :  { %v2603_v57 = vsub.f32 %v2602_v55, %v5806_v4 }
 0x766   :  { %v5835_v58 = vmax.f32 %v2562_v7, 0.0  ;;  %v2611_v7 = vadd.f32 3.1415927, %v2610_v53 }
 0x768   :  { %v2567_v24 = vmul.f32 %v5835_v58, %v5835_v58 }
 0x76a   :  { %v2572_v25 = vrot.slane %v2567_v24, %v5289_v56  ;;  %v2576_v63 = vrot.slane %v2567_v24, %v5215_v29 }
 0x76c   :  { %v2579_v22 = vsel %vm582_vm1, %v2572_v25, 0.0  ;;  %v2580_v39 = vsel %vm582_vm1, %v2576_v63, 0.0  ;;  %v5877_v25 = vld [vmem:[#allocation6 + $0x44] ss:$8 sps:$4 sm:$0xff]   ;;  %v2604_v63 = vadd.f32 3.1415927, %v2603_v57 }
 0x76d   :  { %v2581_v40 = vadd.f32 %v2580_v39, %v2579_v22  ;;  %v2612_v22 = vmul.f32 0.15915494, %v2611_v7  ;;  %v5880_v39 = vld [vmem:[#allocation6 + $0x40] ss:$8 sps:$4 sm:$0xff]  }
 0x76e   :  { %v2605_v45 = vmul.f32 0.15915494, %v2604_v63 }
 0x76f   :  { %2582 = vadd.xlane.f32.xlu0 %v2581_v40  ;;  %v5883_v40 = vld [vmem:[#allocation6 + $0x34] ss:$8 sps:$4 sm:$0xff]   ;;  %v2613_v15 = vfloor.f32 %v2612_v22 }
 0x770   :  { %v2606_v36 = vfloor.f32 %v2605_v45 }
 0x771   :  { %v2614_v6 = vmul.f32 6.2831855, %v2613_v15 }
 0x7f8   :  { %v2583_v10 = vpop.xlane.xlu0 %2582 }
 0x7f9   :  { %v2584_v18 = vmul.f32 0.078125, %v2583_v10  ;;  %v2607_v10 = vmul.f32 6.2831855, %v2606_v36 }
 0x7fb   :  { %v2585_v27 = vadd.f32 1.0, %v2584_v18  ;;  %v2615_v18 = vsub.f32 %v2610_v53, %v2614_v6 }
 0x7fd   :  { %4842 = vrcp.f32 %v2585_v27  ;;  %v5898_v27 = vld [vmem:[#allocation6 + $0x10] ss:$8 sps:$4 sm:$0xff]  }
 0x80a   :  { %v4843_v32 = vpop.eup %4842 }
 0x80b   :  { %v2591_v37 = vrot.slane %v4843_v32, %v5289_v56  ;;  %v5901_v32 = vld [vmem:[#allocation6 + $0x4] ss:$8 sps:$4 sm:$0xff]  }
 0x80d   :  { %v2593_v38 = vmul.f32 %v2591_v37, %v2567_v24  ;;  %v5874_v24 = vld [vmem:[#allocation6 + $0x50] ss:$8 sps:$4 sm:$0xff]   ;;  %v2608_v37 = vsub.f32 %v2603_v57, %v2607_v10 }
 0x80f   :  { %4436 = vst.msk [vmem:[%s6110_s9 + $0x4] ss:$8 sm:$0x3] %vm5187_vm0, %v2593_v38  ;;  %v2799_v41 = vrot.slane %v2593_v38, %v5215_v29  ;;  %v2795_v42 = vrot.slane %v2593_v38, %v5289_v56  ;;  %v2616_v38 = vmul.f32 0.5, %v2615_v18 }
 0x811   :  { %v2803_v31 = vpack.c.bf16 %v2799_v41, %v2799_v41  ;;  %v2802_v1 = vpack.c.bf16 %v2795_v42, %v2795_v42  ;;  %v5904_v41 = vld [vmem:[#allocation6] ss:$8 sps:$4 sm:$0xff]   ;;  %v5907_v42 = vld [vmem:[#allocation6 + $0xf4] ss:$8 sps:$4 sm:$0xff]  }
 0x813   :  { %3028 = vmatprep.mubr.bf16.mxu0 %v2803_v31  ;;  %v2617_v31 = vadd.f32 %v2616_v38, %v2608_v37  ;;  %v5941_v37 = vld [vmem:[#allocation6 + $0xd4] ss:$8 sps:$4 sm:$0xff]   ;;  %v5943_v38 = vld [vmem:[#allocation6 + $0xd0] ss:$8 sps:$4 sm:$0xff]  }
 0x814   :  { %3029 = vmatmul.mubr.bf16.vlgmr.msra.gmra.mxu0 %v2802_v1  ;;  %v2618_v1 = vmul.f32 0.8660254, %v2615_v18 }
 0x815   :  { %3753 = vmatprep.mubr.bf16.mxu0 %v6145_v11  ;;  %3722 = vmatpush1.bf16.msra.mxu0 %v4752_v62  ;;  %v4766_v11 = vld [vmem:[#allocation7 + $0x34] ss:$8 sps:$4 sm:$0xff]   ;;  %v5910_v62 = vld [vmem:[#allocation6 + $0xf0] ss:$8 sps:$4 sm:$0xff]  }
 0x816   :  { %3723 = vmatprep.subr.bf16.mxu0 %v4757_v20  ;;  %3231 = vmatprep.subr.bf16.mxu1 %v4766_v11  ;;  %v2619_v20 = vmul.f32 %v2617_v31, %v2617_v31  ;;  %v5947_v31 = vld [vmem:[#allocation6 + $0xc0] ss:$8 sps:$4 sm:$0xff]  }
 0x817   :  { %3232 = vmatpush1.bf16.msra.mxu1 %v4764_v60 }
 0x818   :  { %3233 = vmatprep.subr.bf16.mxu1 %v4769_v19 }
 0x819   :  { %3724 = vmatpush1.bf16.msra.mxu0 %v4755_v2  ;;  %v2620_v2 = vmul.f32 %v2618_v1, %v2618_v1  ;;  %v5949_v1 = vld [vmem:[#allocation6 + $0xc4] ss:$8 sps:$4 sm:$0xff]  }
 0x81a   :  { %3725 = vmatprep.subr.bf16.mxu0 %v4760_v33  ;;  %v5916_v33 = vld [vmem:[#allocation6 + $0xe0] ss:$8 sps:$4 sm:$0xff]  }
 0x81b   :  { %3234 = vmatpush1.bf16.msra.mxu1 %v4767_v12 }
 0x81c   :  { %3235 = vmatprep.subr.bf16.mxu1 %v4772_v28 }
 0x81d   :  { %3726 = vmatpush1.bf16.msra.mxu0 %v4758_v0  ;;  %v2621_v0 = vadd.f32 %v2620_v2, %v2619_v20  ;;  %v5951_v20 = vld [vmem:[#allocation6 + $0xb4] ss:$8 sps:$4 sm:$0xff]   ;;  %v5955_v2 = vld [vmem:[#allocation6 + $0xb0] ss:$8 sps:$4 sm:$0xff]  }
 0x81e   :  { %3727 = vmatprep.subr.bf16.mxu0 %v4763_v26 }
 0x81f   :  { %3236 = vmatpush1.bf16.msra.mxu1 %v4770_v44  ;;  %v2622_v26 = vmul.f32 -0.25, %v2621_v0  ;;  %v5958_v0 = vld [vmem:[#allocation6 + $0xa4] ss:$8 sps:$4 sm:$0xff]  }
 0x820   :  { %3237 = vmatprep.subr.bf16.mxu1 %v4775_v16 }
 0x821   :  { %3728 = vmatpush1.bf16.msra.mxu0 %v4761_v8  ;;  %v2623_v8 = vmul.f32 0.40528473, %v2622_v26  ;;  %v5961_v26 = vld [vmem:[#allocation6 + $0xa0] ss:$8 sps:$4 sm:$0xff]  }
 0x822   :  { %3729 = vmatprep.subr.bf16.mxu0 %v4766_v11 }
 0x823   :  { %3238 = vmatpush1.bf16.msra.mxu1 %v4773_v47  ;;  %v2624_v11 = vmul.f32 1.442695, %v2623_v8  ;;  %v5964_v8 = vld [vmem:[#allocation6 + $0x94] ss:$8 sps:$4 sm:$0xff]  }
 0x824   :  { %3494 = vmatprep.subr.bf16.mxu1 %v4778_v49 }
 0x825   :  { %3730 = vmatpush1.bf16.msra.mxu0 %v4764_v60  ;;  %4844 = vpow2.f32 %v2624_v11  ;;  %v2559_v60 = vmul.f32 0.1, %v5753_v30  ;;  %v5967_v11 = vld [vmem:[#allocation6 + $0x90] ss:$8 sps:$4 sm:$0xff]  }
 0x826   :  { %3731 = vmatprep.subr.bf16.mxu0 %v4769_v19  ;;  %3256 = vmatmul.mubr.bf16.vlgmr.msra.gmra.mxu1 %v3126_v50  ;;  %v2781_v19 = vrot.slane %v2774_v14, %v6152_v46 }
 0x827   :  { %3495 = vmatpush1.bf16.msra.mxu1 %v5861_v51 }
 0x828   :  { %3496 = vmatprep.subr.bf16.mxu1 %v5863_v23 }
 0x829   :  { %3732 = vmatpush1.bf16.msra.mxu0 %v4767_v12 }
 0x82a   :  { %3733 = vmatprep.subr.bf16.mxu0 %v4772_v28 }
 0x82b   :  { %3497 = vmatpush1.bf16.msra.mxu1 %v5867_v54 }
 0x82c   :  { %3498 = vmatprep.subr.bf16.mxu1 %v5870_v35 }
 0x82d   :  { %3734 = vmatpush1.bf16.msra.mxu0 %v4770_v44  ;;  %v2563_v44 = vsub.f32 %v5831_v3, %v2559_v60 }
 0x82e   :  { %3735 = vmatprep.subr.bf16.mxu0 %v4775_v16 }
 0x82f   :  { %3499 = vmatpush1.bf16.msra.mxu1 %v5874_v24  ;;  %v2564_v52 = vmul.f32 0.9048374, %v2563_v44 }
 0x830   :  { %3500 = vmatprep.subr.bf16.mxu1 %v5877_v25 }
 0x831   :  { %3736 = vmatpush1.bf16.msra.mxu0 %v4773_v47  ;;  %v2788_v47 = vrot.slane %v2781_v19, %v6152_v46  ;;  %v5929_v7 = vadd.f32 %v2564_v52, %v2559_v60  ;;  %v5970_v60 = vld [vmem:[#allocation6 + $0x84] ss:$8 sps:$4 sm:$0xff]   ;;  %v5973_v19 = vld [vmem:[#allocation6 + $0x80] ss:$8 sps:$4 sm:$0xff]  }
 0x832   :  { %3992 = vmatprep.subr.bf16.mxu0 %v4778_v49  ;;  %v4845_v12 = vpop.eup %4844 }
 0x833   :  { %3501 = vmatpush1.bf16.msra.mxu1 %v5880_v39  ;;  %v2626_v48 = vmul.f32 10.0, %v4845_v12 }
 0x834   :  { %3502 = vmatprep.subr.bf16.mxu1 %v5883_v40 }
 0x835   :  { %v2790_v30 = vadd.f32 %v2788_v47, %v2626_v48 }
 0x837   :  { %3503 = vmatpush1.bf16.msra.mxu1 %v5886_v34 }
 0x838   :  { %3504 = vmatprep.subr.bf16.mxu1 %v5889_v17 }
 0x83b   :  { %3505 = vmatpush1.bf16.msra.mxu1 %v5892_v61 }
 0x83c   :  { %3506 = vmatprep.subr.bf16.mxu1 %v5895_v5 }
 0x83f   :  { %3507 = vmatpush1.bf16.msra.mxu1 %v5898_v27 }
 0x840   :  { %3508 = vmatprep.subr.bf16.mxu1 %v5901_v32 }
 0x843   :  { %3509 = vmatpush1.bf16.msra.mxu1 %v5904_v41 }
 0x844   :  { %3510 = vmatprep.subr.bf16.mxu1 %v5907_v42 }
 0x847   :  { %3511 = vmatpush2.bf16.msra.mxu1 %v5910_v62 }
 0x848   :  { %3512 = vmatprep.subr.bf16.mxu1 %v5913_v43 }
 0x84b   :  { %3513 = vmatpush2.bf16.msra.mxu1 %v5916_v33 }
 0x84c   :  { %3514 = vmatprep.subr.bf16.mxu1 %v5941_v37 }
 0x84f   :  { %3515 = vmatpush2.bf16.msra.mxu1 %v5943_v38 }
 0x850   :  { %3516 = vmatprep.subr.bf16.mxu1 %v5949_v1 }
 0x853   :  { %3517 = vmatpush2.bf16.msra.mxu1 %v5947_v31 }
 0x854   :  { %3518 = vmatprep.subr.bf16.mxu1 %v5951_v20 }
 0x857   :  { %3519 = vmatpush2.bf16.msra.mxu1 %v5955_v2 }
 0x858   :  { %3520 = vmatprep.subr.bf16.mxu1 %v5958_v0 }
 0x85b   :  { %3521 = vmatpush2.bf16.msra.mxu1 %v5961_v26 }
 0x85c   :  { %3522 = vmatprep.subr.bf16.mxu1 %v5964_v8 }
 0x85f   :  { %3523 = vmatpush2.bf16.msra.mxu1 %v5967_v11 }
 0x860   :  { %3524 = vmatprep.subr.bf16.mxu1 %v5970_v60 }
 0x863   :  { %3525 = vmatpush2.bf16.msra.mxu1 %v5973_v19 }
 0x8d4   :  { %v3030_v28 = vpop.f32.mrf.mxu0 }
 0x8d6   :  { %v3032_v16 = vpop.f32.mrf.mxu0 }
 0x8d7   :  { %v3039_v49 = vcombine.low %v3030_v28, %v3032_v16 }
 0x8d8   :  { %v3034_v50 = vpop.f32.mrf.mxu0 }
 0x8d9   :  { %v3046_v53 = vrot.slane %v3039_v49, %v6152_v46 }
 0x8da   :  { %v3035_v55 = vpop.f32.mrf.mxu0 }
 0x8db   :  { %v3053_v57 = vrot.slane %v3046_v53, %v6152_v46 }
 0x8dd   :  { %v3055_v59 = vadd.f32 %v3053_v57, %v2790_v30 }
 0x8df   :  { %v3056_v13 = vsub.f32 %v3055_v59, %v5929_v7 }
 0x8e1   :  { %v3058_v3 = vsub.f32 %v5835_v58, %v3056_v13 }
 0x8e3   :  { %v3059_v14 = vmul.f32 0.36787945, %v3058_v3 }
 0x8e5   :  { %v3060_v63 = vadd.f32 %v3059_v14, %v3056_v13 }
 0x8e6   :  { %v3257_v12 = vpop.f32.mrf.mxu1 }
 0x8e7   :  { %v5933_v22 = vmax.f32 %v3060_v63, 0.0  ;;  %v4508_v28 = vadd.f32 -0.1, %v3257_v12 }
 0x8e8   :  { %v3259_v44 = vpop.f32.mrf.mxu1 }
 0x8e9   :  { %v3065_v45 = vmul.f32 %v5933_v22, %v5933_v22  ;;  %v3266_v16 = vmax.f32 %v4508_v28, 0.0  ;;  %v4509_v47 = vadd.f32 -0.1, %v3259_v44 }
 0x8ea   :  { %v3261_v48 = vpop.f32.mrf.mxu1 }
 0x8eb   :  { %v3070_v15 = vrot.slane %v3065_v45, %v5289_v56  ;;  %v3074_v36 = vrot.slane %v3065_v45, %v5215_v29  ;;  %v5977_v49 = vmul.f32 0.5, %v3266_v16  ;;  %v3267_v50 = vmax.f32 %v4509_v47, 0.0 }
 0x8ec   :  { %v3262_v52 = vpop.f32.mrf.mxu1 }
 0x8ed   :  { %v3077_v6 = vsel %vm582_vm1, %v3070_v15, 0.0  ;;  %v3078_v10 = vsel %vm582_vm1, %v3074_v36, 0.0  ;;  %v5979_v53 = vmul.f32 0.5, %v3267_v50  ;;  %v3555_v50 = vmul.f32 0.1, %v5933_v22 }
 0x8ee   :  { %v3079_v18 = vadd.f32 %v3078_v10, %v3077_v6  ;;  %v3623_v10 = vld [vmem:[%s6108_s7 + $0x7] sm:$0x1]  ;;  %s4491_s7 = sld [smem:[#allocation2 + $0xd]] }
 0x8ef   :  { %v3272_v55 = vcombine.low %v5977_v49, %v5979_v53 }
 0x8f0   :  { %3080 = vadd.xlane.f32.xlu1 %v3079_v18  ;;  %v3624_v18 = vpack.c.bf16 %v3623_v10, %v3623_v10 }
 0x8f2   :  { %3754 = vmatmul.mubr.bf16.vlgmr.msra.gmra.mxu0 %v3624_v18 }
 0x8f3   :  { %3993 = vmatpush1.bf16.msra.mxu0 %v5861_v51 }
 0x8f4   :  { %3994 = vmatprep.subr.bf16.mxu0 %v5863_v23  ;;  %v3107_v51 = vstv %s4491_s7 }
 0x8f5   :  { %v3108_v23 = vsub.f32 %v3107_v51, %v5798_v9 }
 0x8f7   :  { %3995 = vmatpush1.bf16.msra.mxu0 %v5867_v54  ;;  %v3100_v54 = vstv %s4490_s18 }
 0x8f8   :  { %3996 = vmatprep.subr.bf16.mxu0 %v5870_v35  ;;  %v3101_v35 = vsub.f32 %v3100_v54, %v5806_v4 }
 0x8fb   :  { %3997 = vmatpush1.bf16.msra.mxu0 %v5874_v24  ;;  %v3109_v24 = vadd.f32 3.1415927, %v3108_v23 }
 0x8fc   :  { %3998 = vmatprep.subr.bf16.mxu0 %v5877_v25  ;;  %v3102_v25 = vadd.f32 3.1415927, %v3101_v35 }
 0x8ff   :  { %3999 = vmatpush1.bf16.msra.mxu0 %v5880_v39  ;;  %v3110_v39 = vmul.f32 0.15915494, %v3109_v24 }
 0x900   :  { %4000 = vmatprep.subr.bf16.mxu0 %v5883_v40  ;;  %v3103_v40 = vmul.f32 0.15915494, %v3102_v25 }
 0x903   :  { %4001 = vmatpush1.bf16.msra.mxu0 %v5886_v34  ;;  %v3111_v34 = vfloor.f32 %v3110_v39 }
 0x904   :  { %4002 = vmatprep.subr.bf16.mxu0 %v5889_v17  ;;  %v3104_v17 = vfloor.f32 %v3103_v40 }
 0x907   :  { %4003 = vmatpush1.bf16.msra.mxu0 %v5892_v61  ;;  %v3112_v61 = vmul.f32 6.2831855, %v3111_v34 }
 0x908   :  { %4004 = vmatprep.subr.bf16.mxu0 %v5895_v5  ;;  %v3105_v5 = vmul.f32 6.2831855, %v3104_v17 }
 0x90b   :  { %4005 = vmatpush1.bf16.msra.mxu0 %v5898_v27  ;;  %v3113_v27 = vsub.f32 %v3108_v23, %v3112_v61 }
 0x90c   :  { %4006 = vmatprep.subr.bf16.mxu0 %v5901_v32  ;;  %v3106_v32 = vsub.f32 %v3101_v35, %v3105_v5 }
 0x90f   :  { %4007 = vmatpush1.bf16.msra.mxu0 %v5904_v41  ;;  %v3114_v41 = vmul.f32 0.5, %v3113_v27 }
 0x910   :  { %4008 = vmatprep.subr.bf16.mxu0 %v5907_v42 }
 0x911   :  { %v3115_v42 = vadd.f32 %v3114_v41, %v3106_v32 }
 0x913   :  { %4009 = vmatpush2.bf16.msra.mxu0 %v5910_v62  ;;  %v3116_v62 = vmul.f32 0.8660254, %v3113_v27  ;;  %v3605_v27 = vstv %s4544_s19 }
 0x914   :  { %4010 = vmatprep.subr.bf16.mxu0 %v5913_v43  ;;  %v3117_v43 = vmul.f32 %v3115_v42, %v3115_v42  ;;  %v3606_v41 = vsub.f32 %v3605_v27, %v5798_v9 }
 0x917   :  { %4011 = vmatpush2.bf16.msra.mxu0 %v5916_v33  ;;  %v3118_v33 = vmul.f32 %v3116_v62, %v3116_v62  ;;  %v3598_v62 = vstv %s4543_s4 }
 0x918   :  { %4012 = vmatprep.subr.bf16.mxu0 %v5941_v37 }
 0x91b   :  { %4013 = vmatpush2.bf16.msra.mxu0 %v5943_v38 }
 0x91c   :  { %4014 = vmatprep.subr.bf16.mxu0 %v5949_v1  ;;  %v3057_v1 = vmul.f32 0.1, %v5835_v58 }
 0x91f   :  { %4015 = vmatpush2.bf16.msra.mxu0 %v5947_v31 }
 0x920   :  { %4016 = vmatprep.subr.bf16.mxu0 %v5951_v20  ;;  %v3279_v20 = vrot.slane %v3272_v55, %v6152_v46 }
 0x923   :  { %4017 = vmatpush2.bf16.msra.mxu0 %v5955_v2 }
 0x924   :  { %4018 = vmatprep.subr.bf16.mxu0 %v5958_v0 }
 0x927   :  { %4019 = vmatpush2.bf16.msra.mxu0 %v5961_v26  ;;  %v3061_v26 = vsub.f32 %v5929_v7, %v3057_v1 }
 0x928   :  { %4020 = vmatprep.subr.bf16.mxu0 %v5964_v8 }
 0x929   :  { %v3062_v28 = vmul.f32 0.9048374, %v3061_v26 }
 0x92b   :  { %4021 = vmatpush2.bf16.msra.mxu0 %v5967_v11  ;;  %v3286_v11 = vrot.slane %v3279_v20, %v6152_v46  ;;  %v3063_v48 = vadd.f32 %v3062_v28, %v3057_v1 }
 0x92c   :  { %4022 = vmatprep.subr.bf16.mxu0 %v5970_v60 }
 0x92d   :  { %v3559_v53 = vsub.f32 %v3063_v48, %v3555_v50 }
 0x92f   :  { %4023 = vmatpush2.bf16.msra.mxu0 %v5973_v19 }
 0x979   :  { %v3081_v30 = vpop.xlane.xlu1 %3080 }
 0x97a   :  { %v3082_v57 = vmul.f32 0.078125, %v3081_v30 }
 0x97c   :  { %v3083_v59 = vadd.f32 1.0, %v3082_v57  ;;  %v3560_v57 = vmul.f32 0.9048374, %v3559_v53 }
 0x97e   :  { %4846 = vrcp.f32 %v3083_v59 }
 0x98b   :  { %v4847_v13 = vpop.eup %4846 }
 0x98c   :  { %v3089_v3 = vrot.slane %v4847_v13, %v5289_v56 }
 0x98e   :  { %v3091_v14 = vmul.f32 %v3089_v3, %v3065_v45  ;;  %v3119_v45 = vadd.f32 %v3118_v33, %v3117_v43  ;;  %v6042_v3 = vadd.f32 %v3560_v57, %v3555_v50  ;;  %v3599_v43 = vsub.f32 %v3598_v62, %v5806_v4 }
 0x98f   :  { %v3607_v33 = vadd.f32 3.1415927, %v3606_v41 }
 0x990   :  { %4489 = vst.msk [vmem:[%s6110_s9 + $0x5] ss:$8 sm:$0x3] %vm5187_vm0, %v3091_v14  ;;  %v3297_v63 = vrot.slane %v3091_v14, %v5215_v29  ;;  %v3293_v15 = vrot.slane %v3091_v14, %v5289_v56  ;;  %v3120_v37 = vmul.f32 -0.25, %v3119_v45 }
 0x992   :  { %v3301_v36 = vpack.c.bf16 %v3297_v63, %v3297_v63  ;;  %v3300_v6 = vpack.c.bf16 %v3293_v15, %v3293_v15  ;;  %v3121_v38 = vmul.f32 0.40528473, %v3120_v37  ;;  %v3600_v37 = vadd.f32 3.1415927, %v3599_v43 }
 0x994   :  { %3526 = vmatprep.mubr.bf16.mxu1 %v3301_v36  ;;  %v3122_v31 = vmul.f32 1.442695, %v3121_v38  ;;  %v3608_v38 = vmul.f32 0.15915494, %v3607_v33 }
 0x995   :  { %3527 = vmatmul.mubr.bf16.vlgmr.msra.gmra.mxu1 %v3300_v6 }
 0x996   :  { %4848 = vpow2.f32 %v3122_v31  ;;  %v3601_v31 = vmul.f32 0.15915494, %v3600_v37  ;;  %v3609_v1 = vfloor.f32 %v3608_v38 }
 0x998   :  { %v3602_v20 = vfloor.f32 %v3601_v31 }
 0x9a3   :  { %v4849_v2 = vpop.eup %4848 }
 0x9a4   :  { %v3124_v60 = vmul.f32 10.0, %v4849_v2  ;;  %v3610_v2 = vmul.f32 6.2831855, %v3609_v1 }
 0x9a6   :  { %v3288_v58 = vadd.f32 %v3286_v11, %v3124_v60  ;;  %v3611_v26 = vsub.f32 %v3606_v41, %v3610_v2 }
 0x9a8   :  { %v3612_v11 = vmul.f32 0.5, %v3611_v26 }
 0x9b2   :  { %v3755_v23 = vpop.f32.mrf.mxu0 }
 0x9b3   :  { %v4561_v54 = vadd.f32 -0.1, %v3755_v23 }
 0x9b4   :  { %v3757_v35 = vpop.f32.mrf.mxu0 }
 0x9b5   :  { %v3764_v24 = vmax.f32 %v4561_v54, 0.0  ;;  %v4562_v25 = vadd.f32 -0.1, %v3757_v35 }
 0x9b6   :  { %v3759_v39 = vpop.f32.mrf.mxu0 }
 0x9b7   :  { %v3766_v40 = vmul.f32 0.5, %v3764_v24  ;;  %v3765_v34 = vmax.f32 %v4562_v25, 0.0 }
 0x9b8   :  { %v3760_v17 = vpop.f32.mrf.mxu0 }
 0x9b9   :  { %v3767_v61 = vmul.f32 0.5, %v3765_v34 }
 0x9bb   :  { %v3770_v5 = vcombine.low %v3766_v40, %v3767_v61 }
 0x9bd   :  { %v3777_v53 = vrot.slane %v3770_v5, %v6152_v46 }
 0xa55   :  { %v3528_v0 = vpop.f32.mrf.mxu1 }
 0xa57   :  { %v3530_v8 = vpop.f32.mrf.mxu1 }
 0xa58   :  { %v3537_v19 = vcombine.low %v3528_v0, %v3530_v8  ;;  %v3603_v0 = vmul.f32 6.2831855, %v3602_v20 }
 0xa59   :  { %v3532_v12 = vpop.f32.mrf.mxu1 }
 0xa5a   :  { %v3544_v44 = vrot.slane %v3537_v19, %v6152_v46  ;;  %v3604_v8 = vsub.f32 %v3599_v43, %v3603_v0  ;;  %v3614_v19 = vmul.f32 0.8660254, %v3611_v26 }
 0xa5b   :  { %v3533_v16 = vpop.f32.mrf.mxu1 }
 0xa5c   :  { %v3551_v47 = vrot.slane %v3544_v44, %v6152_v46  ;;  %v3613_v60 = vadd.f32 %v3612_v11, %v3604_v8  ;;  %v3616_v12 = vmul.f32 %v3614_v19, %v3614_v19 }
 0xa5e   :  { %v3553_v49 = vadd.f32 %v3551_v47, %v3288_v58  ;;  %v3615_v9 = vmul.f32 %v3613_v60, %v3613_v60 }
 0xa60   :  { %v3554_v52 = vsub.f32 %v3553_v49, %v3063_v48  ;;  %v3617_v44 = vadd.f32 %v3616_v12, %v3615_v9 }
 0xa62   :  { %v3556_v7 = vsub.f32 %v5933_v22, %v3554_v52  ;;  %v3618_v16 = vmul.f32 -0.25, %v3617_v44 }
 0xa64   :  { %v3557_v55 = vmul.f32 0.36787945, %v3556_v7  ;;  %v3619_v47 = vmul.f32 0.40528473, %v3618_v16 }
 0xa66   :  { %v3558_v30 = vadd.f32 %v3557_v55, %v3554_v52  ;;  %v3620_v50 = vmul.f32 1.442695, %v3619_v47  ;;  %v3784_v55 = vrot.slane %v3777_v53, %v6152_v46 }
 0xa68   :  { %v6038_v59 = vmax.f32 %v3558_v30, 0.0 }
 0xa6a   :  { %v3563_v13 = vmul.f32 %v6038_v59, %v6038_v59  ;;  %v4053_v14 = vmul.f32 0.1, %v6038_v59 }
 0xa6c   :  { %v3568_v63 = vrot.slane %v3563_v13, %v5289_v56  ;;  %v3572_v15 = vrot.slane %v3563_v13, %v5215_v29  ;;  %v4057_v36 = vsub.f32 %v6042_v3, %v4053_v14 }
 0xa6e   :  { %v3575_v22 = vsel %vm582_vm1, %v3568_v63, 0.0  ;;  %v3576_v6 = vsel %vm582_vm1, %v3572_v15, 0.0  ;;  %v4058_v10 = vmul.f32 0.9048374, %v4057_v36 }
 0xa6f   :  { %v3577_v18 = vadd.f32 %v3576_v6, %v3575_v22 }
 0xa70   :  { %v4059_v51 = vadd.f32 %v4058_v10, %v4053_v14 }
 0xa71   :  { %3578 = vadd.xlane.f32.xlu0 %v3577_v18 }
 0xa72   :  { %4092 = vst.msk [vmem:[#allocation10] sm:$0x3] %vm5187_vm0, %v4059_v51 }
 0xafa   :  { %v3579_v32 = vpop.xlane.xlu0 %3578 }
 0xafb   :  { %v3580_v42 = vmul.f32 0.078125, %v3579_v32 }
 0xafd   :  { %v3581_v45 = vadd.f32 1.0, %v3580_v42 }
 0xaff   :  { %4850 = vrcp.f32 %v3581_v45 }
 0xb00   :  { %4852 = vpow2.f32 %v3620_v50 }
 0xb0c   :  { %v4851_v28 = vpop.eup %4850 }
 0xb0d   :  { %v3587_v4 = vrot.slane %v4851_v28, %v5289_v56  ;;  %v4853_v30 = vpop.eup %4852 }
 0xb0e   :  { %v3622_v57 = vmul.f32 10.0, %v4853_v30 }
 0xb0f   :  { %v3589_v58 = vmul.f32 %v3587_v4, %v3563_v13 }
 0xb10   :  { %v3786_v13 = vadd.f32 %v3784_v55, %v3622_v57 }
 0xb11   :  { %4542 = vst.msk [vmem:[%s6110_s9 + $0x6] ss:$8 sm:$0x3] %vm5187_vm0, %v3589_v58  ;;  %v3795_v48 = vrot.slane %v3589_v58, %v5215_v29  ;;  %v3791_v49 = vrot.slane %v3589_v58, %v5289_v56 }
 0xb12   :  { %4097 = vst.msk [vmem:[#allocation13] sm:$0x3] %vm5187_vm0, %v3786_v13 }
 0xb13   :  { %v3799_v52 = vpack.c.bf16 %v3795_v48, %v3795_v48  ;;  %v3798_v7 = vpack.c.bf16 %v3791_v49, %v3791_v49 }
 0xb15   :  { %4024 = vmatprep.mubr.bf16.mxu0 %v3799_v52 }
 0xb16   :  { %4025 = vmatmul.mubr.bf16.vlgmr.msra.gmra.mxu0 %v3798_v7 }
 0xbd6   :  { %v4026_v14 = vpop.f32.mrf.mxu0 }
 0xbd8   :  { %v4028_v63 = vpop.f32.mrf.mxu0 }
 0xbd9   :  { %v4035_v15 = vcombine.low %v4026_v14, %v4028_v63 }
 0xbda   :  { %v4030_v36 = vpop.f32.mrf.mxu0 }
 0xbdb   :  { %v4042_v22 = vrot.slane %v4035_v15, %v6152_v46 }
 0xbdc   :  { %v4031_v6 = vpop.f32.mrf.mxu0 }
 0xbdd   :  { %v4049_v10 = vrot.slane %v4042_v22, %v6152_v46 }
 0xbdf   :  { %v4051_v18 = vadd.f32 %v4049_v10, %v3786_v13 }
 0xbe1   :  { %v4052_v51 = vsub.f32 %v4051_v18, %v6042_v3  ;;  %4098 = vst.msk [vmem:[#allocation15] sm:$0x3] %vm5187_vm0, %v4051_v18 }
 0xbe3   :  { %v4054_v23 = vsub.f32 %v6038_v59, %v4052_v51 }
 0xbe5   :  { %v4055_v54 = vmul.f32 0.36787945, %v4054_v23 }
 0xbe7   :  { %v4056_v35 = vadd.f32 %v4055_v54, %v4052_v51 }
 0xbe9   :  { %v4060_v24 = vmax.f32 %v4056_v35, 0.0 }
 0xbeb   :  { %v4061_v25 = vmul.f32 %v4060_v24, %v4060_v24  ;;  %4091 = vst.msk [vmem:[#allocation9] sm:$0x3] %vm5187_vm0, %v4060_v24 }
 0xbed   :  { %v4066_v39 = vrot.slane %v4061_v25, %v5289_v56  ;;  %v4070_v40 = vrot.slane %v4061_v25, %v5215_v29 }
 0xbef   :  { %v4073_v46 = vsel %vm582_vm1, %v4066_v39, 0.0  ;;  %v4074_v3 = vsel %vm582_vm1, %v4070_v40, 0.0 }
 0xbf0   :  { %v4075_v34 = vadd.f32 %v4074_v3, %v4073_v46 }
 0xbf2   :  { %4076 = vadd.xlane.f32.xlu1 %v4075_v34 }
 0xbf3   :  { %4921 = shalt.err (!%p4918_p5)
}
 0xbf4   :  { %4120 = dma.vmem_to_hbm [thread:$0]  %s4118_s21, 32, %s6112_s11, [#allocation11]  }
 0xbf5   :  { %s4930_s27 = scalar_lea.vmem %s4138_s23, 32  ;;  %p4935_p7 = scmp.lt.s32.totalorder %s4138_s23, %s4138_s23 }
 0xbf6   :  { %p4931_p6 = scmp.ne.s32.totalorder %s4138_s23, %s4930_s27  ;;  %p4936_p8 = scmp.lt.s32.totalorder %s4930_s27, %s4930_s27 }
 0xbf8   :  { %p4937_p9 = por %p4936_p8, %p4935_p7 }
 0xbfa   :  { %p4938_p10 = pnand %p4937_p9, %p4931_p6 }
 0xbfc   :  { %4941 = shalt.err (!%p4938_p10)
}
 0xbfd   :  { %4140 = dma.vmem_to_hbm [thread:$0]  %s4138_s23, 32, %s6114_s13, [#allocation14]  }
 0xbfe   :  { %s5031_s2 = smov [#allocation9]  }
 0xbff   :  { %s4107_s6 = sshll.u32 %s5031_s2, 4  ;;  %s4108_s6 = int_to_ptr.vmem [resolvable:$true] %s4107_s6 }
 0xc00   :  { %s4950_s8 = scalar_lea.vmem %s4108_s6, 32  ;;  %p4955_p12 = scmp.lt.s32.totalorder %s4108_s6, %s4108_s6 }
 0xc01   :  { %p4951_p11 = scmp.ne.s32.totalorder %s4108_s6, %s4950_s8  ;;  %p4956_p13 = scmp.lt.s32.totalorder %s4950_s8, %s4950_s8 }
 0xc03   :  { %p4957_p0 = por %p4956_p13, %p4955_p12 }
 0xc05   :  { %p4958_p1 = pnand %p4957_p0, %p4951_p11 }
 0xc07   :  { %4961 = shalt.err (!%p4958_p1)
}
 0xc08   :  { %4110 = dma.vmem_to_hbm [thread:$0]  %s4108_s6, 32, %s6111_s10, [#allocation4]  }
 0xc09   :  { %s5032_s30 = smov [#allocation15]  }
 0xc0a   :  { %s4147_s3 = sshll.u32 %s5032_s30, 4  ;;  %s4148_s3 = int_to_ptr.vmem [resolvable:$true] %s4147_s3 }
 0xc0b   :  { %s4970_s15 = scalar_lea.vmem %s4148_s3, 32  ;;  %p4975_p3 = scmp.lt.s32.totalorder %s4148_s3, %s4148_s3 }
 0xc0c   :  { %p4971_p2 = scmp.ne.s32.totalorder %s4148_s3, %s4970_s15  ;;  %p4976_p4 = scmp.lt.s32.totalorder %s4970_s15, %s4970_s15 }
 0xc0e   :  { %p4977_p5 = por %p4976_p4, %p4975_p3 }
 0xc10   :  { %p4978_p6 = pnand %p4977_p5, %p4971_p2 }
 0xc12   :  { %4981 = shalt.err (!%p4978_p6)
}
 0xc13   :  { %4150 = dma.vmem_to_hbm [thread:$0]  %s4148_s3, 32, %s6115_s14, [#allocation14]  }
 0xc14   :  { %s5033_s10 = smov [#allocation12]  }
 0xc15   :  { %s4127_s17 = sshll.u32 %s5033_s10, 4  ;;  %s4128_s17 = int_to_ptr.vmem [resolvable:$true] %s4127_s17 }
 0xc16   :  { %s4990_s14 = scalar_lea.vmem %s4128_s17, 32  ;;  %p4995_p8 = scmp.lt.s32.totalorder %s4128_s17, %s4128_s17 }
 0xc17   :  { %p4991_p7 = scmp.ne.s32.totalorder %s4128_s17, %s4990_s14  ;;  %p4996_p9 = scmp.lt.s32.totalorder %s4990_s14, %s4990_s14 }
 0xc19   :  { %p4997_p10 = por %p4996_p9, %p4995_p8 }
 0xc1b   :  { %p4998_p11 = pnand %p4997_p10, %p4991_p7 }
 0xc7b   :  { %v4077_v29 = vpop.xlane.xlu1 %4076 }
 0xc7c   :  { %v4078_v59 = vmul.f32 0.078125, %v4077_v29 }
 0xc7e   :  { %v4079_v17 = vadd.f32 1.0, %v4078_v59 }
 0xc80   :  { %4854 = vrcp.f32 %v4079_v17 }
 0xc8d   :  { %v4855_v61 = vpop.eup %4854 }
 0xc8e   :  { %v4085_v5 = vrot.slane %v4855_v61, %v5289_v56 }
 0xc90   :  { %v4087_v27 = vmul.f32 %v4085_v5, %v4061_v25 }
 0xc92   :  { %4595 = vst.msk [vmem:[%s6110_s9 + $0x7] ss:$8 sm:$0x3] %vm5187_vm0, %v4087_v27  ;;  %4093 = vst.msk [vmem:[#allocation12] sm:$0x3] %vm5187_vm0, %v4087_v27 }
 0xc93   :  { %5001 = shalt.err (!%p4998_p11)
}
 0xc94   :  { %4130 = dma.vmem_to_hbm [thread:$0]  %s4128_s17, 32, %s6113_s12, [#allocation11]  }
 0xc95   :  { %5016 = dma.done.wait [#allocation4], 32  }
 0xc96   :  { %5017 = vsyncadd [#allocation4], 4294967264 }
 0xc97   :  { %5018 = dma.done.wait [#allocation11], 64  }
 0xc98   :  { %5019 = vsyncadd [#allocation11], 4294967232 }
 0xc99   :  { %5020 = dma.done.wait [#allocation14], 64  }
 0xc9a   :  { %5021 = vsyncadd [#allocation14], 4294967232 }
 0xc9b   :  { %4168 = vsyncpa [#allocation3], 1 }
 0xc9c   :  { %4169 = vsyncpa [#allocation8], 1 }
 0xc9d   :  { %4170 = vsyncpa [#allocation4], 1 }
 0xc9e   :  { %4171 = vsyncpa [#allocation11], 1 }
 0xc9f   :  { %4172 = vsyncpa [#allocation14], 1 }
 0xca0   :  { %4173 = vsyncpa [#allocation5], 1 }

</bundles_post_ra>
